<compile_context>
chip_gen: v5e
topology: v5e:2x2
jax: 0.10.0
libtpu: 0.0.40
codegen_flags: <defaults>
</compile_context>

<pallas_src>
import jax
import jax.numpy as jnp
from jax.experimental import pallas as pl
from jax.experimental.pallas import tpu as pltpu

# ---- small, TPU-friendly shapes consistent with the module ------------------
D = 128          # hidden_dim == out_dim
DEG = 8          # fixed in-degree per node
N = 64           # nodes per graph
B = 4            # graphs per batch (grid)
NEIG = 2
NUM_ATOM_FEATS = 3
ATOM_VOCAB = 16
N_LAYERS = 4
READOUT_OUT = 128
BN_EPS = 1e-5


# ------------------------- fused, batched GSN kernel -------------------------
def gsn_kernel(h0_ref, smax_ref, amean_ref, adir_ref, pernode_ref,
               wpre_ref, wpost_ref, wro_ref, bro_ref, o_ref):
    # Per-graph operands (leading batch dim squeezed by BlockSpec):
    h = h0_ref[...]                                  # (N, D)   f32, stays on-chip all layers
    a_mean = amean_ref[...]                          # (N, N)   bf16 (multiplicity/DEG, exact)
    a_dir = adir_ref[...]                            # (N, N)   f32  (eig-weighted adjacency)
    pernode = pernode_ref[...]                       # (N, 2)   f32
    eig_w_sum = pernode[:, 0:1]                      # (N, 1)
    snorm = pernode[:, 1:2]                          # (N, 1)   snorm_n * eval-BN scale

    # Fully unrolled static layer loop: weights indexed statically, whole
    # pipeline visible to the scheduler, h never leaves the chip.
    for li in range(N_LAYERS):
        h_bf = h.astype(jnp.bfloat16)
        # pretrans(cat([h_src, h_dst])): one packed (N,D)@(D,2D) bf16 MXU matmul.
        # The gather of h_src commutes with the linear map, so we gather the
        # already-transformed features below.  (b_pre is zero at init -> dropped.)
        hw = jnp.dot(h_bf, wpre_ref[li], preferred_element_type=jnp.float32)   # (N, 2D) f32
        hw_src = hw[:, :D]
        hw_dst = hw[:, D:]
        hw_src_bf = hw_src.astype(jnp.bfloat16)

        # max aggregator: DEG per-slot (N,N)@(N,D) one-hot matmuls + running
        # elementwise (VPU) max -> no (N,DEG,D) mailbox, no cross-sublane reduce.
        mx = jnp.dot(smax_ref[0], hw_src_bf, preferred_element_type=jnp.float32)
        for k in range(1, DEG):
            mx = jnp.maximum(
                mx, jnp.dot(smax_ref[k], hw_src_bf, preferred_element_type=jnp.float32))
        agg_max = mx + hw_dst                                                  # (N, D)

        # mean aggregator ('sum' folded into w_post at init: sum == DEG*mean
        # for the fixed in-degree layout).
        agg_mean = jnp.dot(a_mean, hw_src_bf,
                           preferred_element_type=jnp.float32) + hw_dst        # (N, D)

        # dir_dx aggregator: |A_dir @ hw_src + eig_w_sum*(hw_dst - h)|  (f32 path)
        agg_dir = jnp.abs(jnp.dot(a_dir, hw_src, preferred_element_type=jnp.float32)
                          + eig_w_sum * (hw_dst - h))                          # (N, D)

        # posttrans as 4 accumulated DxD matmuls (no lane-concat);
        # b_post is zero at init -> dropped.
        base = li * 4
        out = (jnp.dot(h_bf, wpost_ref[base + 0], preferred_element_type=jnp.float32)
               + jnp.dot(agg_mean.astype(jnp.bfloat16), wpost_ref[base + 1],
                         preferred_element_type=jnp.float32)
               + jnp.dot(agg_max.astype(jnp.bfloat16), wpost_ref[base + 2],
                         preferred_element_type=jnp.float32)
               + jnp.dot(agg_dir.astype(jnp.bfloat16), wpost_ref[base + 3],
                         preferred_element_type=jnp.float32))                  # (N, D)

        out = out * snorm            # snorm_n * eval-mode BatchNorm scale (pre-folded)
        h = jnp.maximum(out, 0.0)    # ReLU; dropout is identity in eval mode
        # TODO(synk): training-mode BatchNorm batch-stats and F.dropout are stochastic;
        #             eval-mode semantics (identity dropout, running BN stats) used.

    # graph readout: node mean + zero-padded 128-lane-dense MLPReadout (fused tail)
    y = jnp.mean(h, axis=0, keepdims=True)                                     # (1, D)
    for l in range(2):
        y = jnp.maximum(
            jnp.dot(y.astype(jnp.bfloat16), wro_ref[l],
                    preferred_element_type=jnp.float32) + bro_ref[l], 0.0)
    o_ref[...] = (jnp.dot(y.astype(jnp.bfloat16), wro_ref[2],
                          preferred_element_type=jnp.float32) + bro_ref[2])    # (1, 128)


def gsn_batched(h0, s_max, a_mean, a_dir, pernode, w_pre, w_post, w_ro, b_ro):
    b = h0.shape[0]
    const3 = lambda i: (0, 0, 0)
    grid_spec = pltpu.PrefetchScalarGridSpec(
        num_scalar_prefetch=0,
        grid=(b,),
        in_specs=[
            # per-graph tensors: pipelined over the graph grid
            pl.BlockSpec((None, N, D), lambda i: (i, 0, 0)),          # h0
            pl.BlockSpec((None, DEG, N, N), lambda i: (i, 0, 0, 0)),  # per-slot one-hot (max)
            pl.BlockSpec((None, N, N), lambda i: (i, 0, 0)),          # A_mean
            pl.BlockSpec((None, N, N), lambda i: (i, 0, 0)),          # A_dir
            pl.BlockSpec((None, N, 2), lambda i: (i, 0, 0)),          # [eig_w_sum | snorm]
            # weights: constant index_map -> DMA'd once, VMEM-resident for all graphs
            pl.BlockSpec((N_LAYERS, D, 2 * D), const3),               # w_pre  (bf16)
            pl.BlockSpec((N_LAYERS * 4, D, D), const3),               # w_post (bf16, 4 blocks/layer)
            pl.BlockSpec((3, D, D), const3),                          # readout weights (bf16, padded)
            pl.BlockSpec((3, 1, D), const3),                          # readout biases  (f32, padded)
        ],
        out_specs=pl.BlockSpec((None, 1, READOUT_OUT), lambda i: (i, 0, 0)),
    )
    out = pl.pallas_call(
        gsn_kernel,
        out_shape=jax.ShapeDtypeStruct((b, 1, READOUT_OUT), jnp.float32),
        grid_spec=grid_spec,
        compiler_params=pltpu.CompilerParams(
            dimension_semantics=("parallel",),          # shard graphs across v7x's 2 TCs
            vmem_limit_bytes=32 * 1024 * 1024),
    )(h0, s_max, a_mean, a_dir, pernode, w_pre, w_post, w_ro, b_ro)
    return out.reshape(b, READOUT_OUT)


# ----------------------------- parameter init --------------------------------
def xavier_uniform(key, shape, gain):
    fan_in, fan_out = shape
    bound = gain * (6.0 / (fan_in + fan_out)) ** 0.5
    return jax.random.uniform(key, shape, jnp.float32, -bound, bound)


def torch_linear_init(key, in_size, out_size):
    kw, kb = jax.random.split(key)
    bound = 1.0 / (in_size ** 0.5)
    w = jax.random.uniform(kw, (in_size, out_size), jnp.float32, -bound, bound)
    b = jax.random.uniform(kb, (1, out_size), jnp.float32, -bound, bound)
    return w, b


def init_params(key):
    keys = jax.random.split(key, 2 + N_LAYERS)
    params = {}
    # AtomEncoder: sum of per-feature embedding tables (OGB-style; external class)
    params["atom_emb"] = 0.1 * jax.random.normal(
        keys[0], (NUM_ATOM_FEATS, ATOM_VOCAB, D), jnp.float32)

    w_pre_l, w_post_l = [], []
    for li in range(N_LAYERS):
        k_pre, k_post = jax.random.split(keys[1 + li])

        # pretrans: Linear(2D -> D), xavier_uniform gain = 1/(2D), zero bias (dropped).
        # Pack as (D, 2D) RHS: columns [0:D] = W_src, [D:2D] = W_dst.
        w_pre_full = xavier_uniform(k_pre, (2 * D, D), 1.0 / (2 * D))
        w_pre_l.append(jnp.concatenate([w_pre_full[:D], w_pre_full[D:]], axis=1))

        # posttrans: Linear(5D -> D) over cat([h, mean, sum, max, dir]),
        # xavier_uniform gain = 1/(5D), zero bias (dropped).  Fold sum = DEG*mean
        # (exact for fixed in-degree) into the mean block and split into 4 DxD blocks.
        w_post_full = xavier_uniform(k_post, (5 * D, D), 1.0 / (5 * D))
        w_post_l.append(jnp.stack([
            w_post_full[:D],                                        # h block
            w_post_full[D:2 * D] + DEG * w_post_full[2 * D:3 * D],  # mean + DEG*sum
            w_post_full[3 * D:4 * D],                               # max block
            w_post_full[4 * D:5 * D],                               # dir block
        ], axis=0))                                                 # (4, D, D)

    params["w_pre"] = jnp.stack(w_pre_l).astype(jnp.bfloat16)               # (L, D, 2D)
    params["w_post"] = jnp.concatenate(w_post_l, axis=0).astype(jnp.bfloat16)  # (L*4, D, D)

    # MLPReadout(D, 128, L=2): D -> D//2 -> D//4 -> 128, packed into padded
    # 128-lane-dense slabs (zero-padded rows/cols keep semantics exact).
    kr1, kr2, kr3 = jax.random.split(keys[-1], 3)
    w1, b1 = torch_linear_init(kr1, D, D // 2)
    w2, b2 = torch_linear_init(kr2, D // 2, D // 4)
    w3, b3 = torch_linear_init(kr3, D // 4, READOUT_OUT)
    wro = jnp.zeros((3, D, D), jnp.float32)
    bro = jnp.zeros((3, 1, D), jnp.float32)
    wro = wro.at[0, :D, :D // 2].set(w1)
    wro = wro.at[1, :D // 2, :D // 4].set(w2)
    wro = wro.at[2, :D // 4, :READOUT_OUT].set(w3)
    bro = bro.at[0, :, :D // 2].set(b1)
    bro = bro.at[1, :, :D // 4].set(b2)
    bro = bro.at[2, :, :READOUT_OUT].set(b3)
    params["w_ro"] = wro.astype(jnp.bfloat16)
    params["b_ro"] = bro
    return params


# ----------------------------- full forward ----------------------------------
@jax.jit
def forward(params, node_feats, src_idx, eig, snorm_n):
    b, n = node_feats.shape[:2]

    # AtomEncoder: sum of embedding lookups over atom feature columns (glue).
    emb = params["atom_emb"]
    h0 = jnp.zeros((b, n, D), jnp.float32)
    for f in range(NUM_ATOM_FEATS):
        h0 = h0 + jnp.take(emb[f], node_feats[:, :, f], axis=0)

    # Layer-invariant eig normalisation (hoisted; eig_idx = 1).
    eig1 = eig[:, :, :, 1]                                              # (B, N, DEG)
    eig_w = eig1 / (jnp.sum(jnp.abs(eig1), axis=-1, keepdims=True) + 1e-8)
    eig_w_sum = jnp.sum(eig_w, axis=-1, keepdims=True)                  # (B, N, 1)

    # Per-edge one-hot selectors (exact in bf16) and precomputed adjacencies.
    # Assumes every node has exactly DEG real incoming edges (no padded edges).
    one_hot = jax.nn.one_hot(src_idx, n, dtype=jnp.float32)             # (B, N, DEG, N)
    s_max = jnp.transpose(one_hot, (0, 2, 1, 3)).astype(jnp.bfloat16)   # (B, DEG, N, N)
    a_mean = (jnp.sum(one_hot, axis=2) / DEG).astype(jnp.bfloat16)      # (B, N, N) exact in bf16
    a_dir = jnp.einsum("bnk,bnkm->bnm", eig_w, one_hot)                 # (B, N, N) f32

    # snorm with eval-mode BatchNorm scale 1/sqrt(var+eps) folded in
    # (running_mean=0, running_var=1, gamma=1, beta=0).
    # TODO(synk): a trained checkpoint needs a per-channel (1,D) BN scale/shift instead.
    snorm_scaled = snorm_n * ((1.0 + BN_EPS) ** -0.5)
    pernode = jnp.concatenate([eig_w_sum, snorm_scaled], axis=-1)        # (B, N, 2)

    return gsn_batched(h0, s_max, a_mean, a_dir, pernode,
                       params["w_pre"], params["w_post"],
                       params["w_ro"], params["b_ro"])


# ----------------------------------- main -------------------------------------
if __name__ == "__main__":
    key = jax.random.PRNGKey(0)
    k_param, k_feat, k_idx, k_eig, k_snorm = jax.random.split(key, 5)

    params = init_params(k_param)

    node_feats = jax.random.randint(k_feat, (B, N, NUM_ATOM_FEATS), 0, ATOM_VOCAB,
                                    dtype=jnp.int32)
    src_idx = jax.random.randint(k_idx, (B, N, DEG), 0, N, dtype=jnp.int32)
    eig = jax.random.normal(k_eig, (B, N, DEG, NEIG), jnp.float32)
    snorm_n = jax.random.uniform(k_snorm, (B, N, 1), jnp.float32, 0.5, 1.0)

    out = forward(params, node_feats, src_idx, eig, snorm_n)
    out = jax.block_until_ready(out)
    assert out.shape == (B, READOUT_OUT)
    print("KERNEL_OK")
</pallas_src>

<mosaic_0001>
module attributes {stable_mosaic.version = 11 : i64} {
  func.func @gsn_kernel(%arg0: i32, %arg1: memref<1x64x128xf32, #tpu.memory_space<vmem>>, %arg2: memref<1x8x64x64xbf16, #tpu.memory_space<vmem>>, %arg3: memref<1x64x64xbf16, #tpu.memory_space<vmem>>, %arg4: memref<1x64x64xf32, #tpu.memory_space<vmem>>, %arg5: memref<1x64x2xf32, #tpu.memory_space<vmem>>, %arg6: memref<4x128x256xbf16, #tpu.memory_space<vmem>>, %arg7: memref<16x128x128xbf16, #tpu.memory_space<vmem>>, %arg8: memref<3x128x128xbf16, #tpu.memory_space<vmem>>, %arg9: memref<3x1x128xf32, #tpu.memory_space<vmem>>, %arg10: memref<1x1x128xf32, #tpu.memory_space<vmem>>) attributes {dimension_semantics = [#tpu.dimension_semantics<parallel>], iteration_bounds = array<i64: 4>, scalar_prefetch = 0 : i64, scratch_operands = 0 : i64, tpu.core_type = #tpu.core_type<tc>, window_params = [{transform_indices = @transform_0, window_bounds = array<i64: 1, 64, 128>}, {transform_indices = @transform_1, window_bounds = array<i64: 1, 8, 64, 64>}, {transform_indices = @transform_2, window_bounds = array<i64: 1, 64, 64>}, {transform_indices = @transform_3, window_bounds = array<i64: 1, 64, 64>}, {transform_indices = @transform_4, window_bounds = array<i64: 1, 64, 2>}, {pipeline_mode = #tpu.pipeline_mode<synchronous>, transform_indices = @transform_5, window_bounds = array<i64: 4, 128, 256>}, {pipeline_mode = #tpu.pipeline_mode<synchronous>, transform_indices = @transform_6, window_bounds = array<i64: 16, 128, 128>}, {pipeline_mode = #tpu.pipeline_mode<synchronous>, transform_indices = @transform_7, window_bounds = array<i64: 3, 128, 128>}, {pipeline_mode = #tpu.pipeline_mode<synchronous>, transform_indices = @transform_8, window_bounds = array<i64: 3, 1, 128>}, {transform_indices = @transform_9, window_bounds = array<i64: 1, 1, 128>}]} {
    %c0 = arith.constant 0 : index
    %c0_0 = arith.constant 0 : index
    %c0_1 = arith.constant 0 : index
    %0 = vector.load %arg1[%c0, %c0_0, %c0_1] : memref<1x64x128xf32, #tpu.memory_space<vmem>>, vector<1x64x128xf32>
    %1 = vector.shape_cast %0 : vector<1x64x128xf32> to vector<64x128xf32>
    %c0_2 = arith.constant 0 : index
    %c0_3 = arith.constant 0 : index
    %c0_4 = arith.constant 0 : index
    %2 = vector.load %arg3[%c0_2, %c0_3, %c0_4] : memref<1x64x64xbf16, #tpu.memory_space<vmem>>, vector<1x64x64xbf16>
    %3 = vector.shape_cast %2 : vector<1x64x64xbf16> to vector<64x64xbf16>
    %c0_5 = arith.constant 0 : index
    %c0_6 = arith.constant 0 : index
    %c0_7 = arith.constant 0 : index
    %4 = vector.load %arg4[%c0_5, %c0_6, %c0_7] : memref<1x64x64xf32, #tpu.memory_space<vmem>>, vector<1x64x64xf32>
    %5 = vector.shape_cast %4 : vector<1x64x64xf32> to vector<64x64xf32>
    %c0_8 = arith.constant 0 : index
    %c0_9 = arith.constant 0 : index
    %c0_10 = arith.constant 0 : index
    %6 = vector.load %arg5[%c0_8, %c0_9, %c0_10] : memref<1x64x2xf32, #tpu.memory_space<vmem>>, vector<1x64x2xf32>
    %7 = vector.shape_cast %6 : vector<1x64x2xf32> to vector<64x2xf32>
    %8 = vector.extract_strided_slice %7 {offsets = [0, 0], sizes = [64, 1], strides = [1, 1]} : vector<64x2xf32> to vector<64x1xf32>
    %9 = vector.extract_strided_slice %7 {offsets = [0, 1], sizes = [64, 1], strides = [1, 1]} : vector<64x2xf32> to vector<64x1xf32>
    %10 = arith.truncf %1 : vector<64x128xf32> to vector<64x128xbf16>
    %c0_11 = arith.constant 0 : index
    %c0_12 = arith.constant 0 : index
    %c0_13 = arith.constant 0 : index
    %11 = vector.load %arg6[%c0_11, %c0_12, %c0_13] : memref<4x128x256xbf16, #tpu.memory_space<vmem>>, vector<1x128x256xbf16>
    %12 = vector.shape_cast %11 : vector<1x128x256xbf16> to vector<128x256xbf16>
    %cst = arith.constant dense<0.000000e+00> : vector<64x256xf32>
    %13 = tpu.matmul %10, %12, %cst {dimension_numbers = #tpu.dot_dimension_numbers<[1], [0], [0], [1], [0, 0, 1, 1], [], []>} : vector<64x128xbf16>, vector<128x256xbf16>, vector<64x256xf32> -> vector<64x256xf32>
    %14 = vector.extract_strided_slice %13 {offsets = [0, 0], sizes = [64, 128], strides = [1, 1]} : vector<64x256xf32> to vector<64x128xf32>
    %15 = vector.extract_strided_slice %13 {offsets = [0, 128], sizes = [64, 128], strides = [1, 1]} : vector<64x256xf32> to vector<64x128xf32>
    %16 = arith.truncf %14 : vector<64x128xf32> to vector<64x128xbf16>
    %c0_14 = arith.constant 0 : index
    %c0_15 = arith.constant 0 : index
    %c0_16 = arith.constant 0 : index
    %c0_17 = arith.constant 0 : index
    %17 = vector.load %arg2[%c0_14, %c0_15, %c0_16, %c0_17] : memref<1x8x64x64xbf16, #tpu.memory_space<vmem>>, vector<1x1x64x64xbf16>
    %18 = vector.shape_cast %17 : vector<1x1x64x64xbf16> to vector<64x64xbf16>
    %cst_18 = arith.constant dense<0.000000e+00> : vector<64x128xf32>
    %19 = tpu.matmul %18, %16, %cst_18 {dimension_numbers = #tpu.dot_dimension_numbers<[1], [0], [0], [1], [0, 0, 1, 1], [], []>} : vector<64x64xbf16>, vector<64x128xbf16>, vector<64x128xf32> -> vector<64x128xf32>
    %c0_19 = arith.constant 0 : index
    %c1 = arith.constant 1 : index
    %c0_20 = arith.constant 0 : index
    %c0_21 = arith.constant 0 : index
    %20 = vector.load %arg2[%c0_19, %c1, %c0_20, %c0_21] : memref<1x8x64x64xbf16, #tpu.memory_space<vmem>>, vector<1x1x64x64xbf16>
    %21 = vector.shape_cast %20 : vector<1x1x64x64xbf16> to vector<64x64xbf16>
    %cst_22 = arith.constant dense<0.000000e+00> : vector<64x128xf32>
    %22 = tpu.matmul %21, %16, %cst_22 {dimension_numbers = #tpu.dot_dimension_numbers<[1], [0], [0], [1], [0, 0, 1, 1], [], []>} : vector<64x64xbf16>, vector<64x128xbf16>, vector<64x128xf32> -> vector<64x128xf32>
    %23 = arith.maximumf %19, %22 : vector<64x128xf32>
    %c0_23 = arith.constant 0 : index
    %c2 = arith.constant 2 : index
    %c0_24 = arith.constant 0 : index
    %c0_25 = arith.constant 0 : index
    %24 = vector.load %arg2[%c0_23, %c2, %c0_24, %c0_25] : memref<1x8x64x64xbf16, #tpu.memory_space<vmem>>, vector<1x1x64x64xbf16>
    %25 = vector.shape_cast %24 : vector<1x1x64x64xbf16> to vector<64x64xbf16>
    %cst_26 = arith.constant dense<0.000000e+00> : vector<64x128xf32>
    %26 = tpu.matmul %25, %16, %cst_26 {dimension_numbers = #tpu.dot_dimension_numbers<[1], [0], [0], [1], [0, 0, 1, 1], [], []>} : vector<64x64xbf16>, vector<64x128xbf16>, vector<64x128xf32> -> vector<64x128xf32>
    %27 = arith.maximumf %23, %26 : vector<64x128xf32>
    %c0_27 = arith.constant 0 : index
    %c3 = arith.constant 3 : index
    %c0_28 = arith.constant 0 : index
    %c0_29 = arith.constant 0 : index
    %28 = vector.load %arg2[%c0_27, %c3, %c0_28, %c0_29] : memref<1x8x64x64xbf16, #tpu.memory_space<vmem>>, vector<1x1x64x64xbf16>
    %29 = vector.shape_cast %28 : vector<1x1x64x64xbf16> to vector<64x64xbf16>
    %cst_30 = arith.constant dense<0.000000e+00> : vector<64x128xf32>
    %30 = tpu.matmul %29, %16, %cst_30 {dimension_numbers = #tpu.dot_dimension_numbers<[1], [0], [0], [1], [0, 0, 1, 1], [], []>} : vector<64x64xbf16>, vector<64x128xbf16>, vector<64x128xf32> -> vector<64x128xf32>
    %31 = arith.maximumf %27, %30 : vector<64x128xf32>
    %c0_31 = arith.constant 0 : index
    %c4 = arith.constant 4 : index
    %c0_32 = arith.constant 0 : index
    %c0_33 = arith.constant 0 : index
    %32 = vector.load %arg2[%c0_31, %c4, %c0_32, %c0_33] : memref<1x8x64x64xbf16, #tpu.memory_space<vmem>>, vector<1x1x64x64xbf16>
    %33 = vector.shape_cast %32 : vector<1x1x64x64xbf16> to vector<64x64xbf16>
    %cst_34 = arith.constant dense<0.000000e+00> : vector<64x128xf32>
    %34 = tpu.matmul %33, %16, %cst_34 {dimension_numbers = #tpu.dot_dimension_numbers<[1], [0], [0], [1], [0, 0, 1, 1], [], []>} : vector<64x64xbf16>, vector<64x128xbf16>, vector<64x128xf32> -> vector<64x128xf32>
    %35 = arith.maximumf %31, %34 : vector<64x128xf32>
    %c0_35 = arith.constant 0 : index
    %c5 = arith.constant 5 : index
    %c0_36 = arith.constant 0 : index
    %c0_37 = arith.constant 0 : index
    %36 = vector.load %arg2[%c0_35, %c5, %c0_36, %c0_37] : memref<1x8x64x64xbf16, #tpu.memory_space<vmem>>, vector<1x1x64x64xbf16>
    %37 = vector.shape_cast %36 : vector<1x1x64x64xbf16> to vector<64x64xbf16>
    %cst_38 = arith.constant dense<0.000000e+00> : vector<64x128xf32>
    %38 = tpu.matmul %37, %16, %cst_38 {dimension_numbers = #tpu.dot_dimension_numbers<[1], [0], [0], [1], [0, 0, 1, 1], [], []>} : vector<64x64xbf16>, vector<64x128xbf16>, vector<64x128xf32> -> vector<64x128xf32>
    %39 = arith.maximumf %35, %38 : vector<64x128xf32>
    %c0_39 = arith.constant 0 : index
    %c6 = arith.constant 6 : index
    %c0_40 = arith.constant 0 : index
    %c0_41 = arith.constant 0 : index
    %40 = vector.load %arg2[%c0_39, %c6, %c0_40, %c0_41] : memref<1x8x64x64xbf16, #tpu.memory_space<vmem>>, vector<1x1x64x64xbf16>
    %41 = vector.shape_cast %40 : vector<1x1x64x64xbf16> to vector<64x64xbf16>
    %cst_42 = arith.constant dense<0.000000e+00> : vector<64x128xf32>
    %42 = tpu.matmul %41, %16, %cst_42 {dimension_numbers = #tpu.dot_dimension_numbers<[1], [0], [0], [1], [0, 0, 1, 1], [], []>} : vector<64x64xbf16>, vector<64x128xbf16>, vector<64x128xf32> -> vector<64x128xf32>
    %43 = arith.maximumf %39, %42 : vector<64x128xf32>
    %c0_43 = arith.constant 0 : index
    %c7 = arith.constant 7 : index
    %c0_44 = arith.constant 0 : index
    %c0_45 = arith.constant 0 : index
    %44 = vector.load %arg2[%c0_43, %c7, %c0_44, %c0_45] : memref<1x8x64x64xbf16, #tpu.memory_space<vmem>>, vector<1x1x64x64xbf16>
    %45 = vector.shape_cast %44 : vector<1x1x64x64xbf16> to vector<64x64xbf16>
    %cst_46 = arith.constant dense<0.000000e+00> : vector<64x128xf32>
    %46 = tpu.matmul %45, %16, %cst_46 {dimension_numbers = #tpu.dot_dimension_numbers<[1], [0], [0], [1], [0, 0, 1, 1], [], []>} : vector<64x64xbf16>, vector<64x128xbf16>, vector<64x128xf32> -> vector<64x128xf32>
    %47 = arith.maximumf %43, %46 : vector<64x128xf32>
    %48 = arith.addf %47, %15 : vector<64x128xf32>
    %cst_47 = arith.constant dense<0.000000e+00> : vector<64x128xf32>
    %49 = tpu.matmul %3, %16, %cst_47 {dimension_numbers = #tpu.dot_dimension_numbers<[1], [0], [0], [1], [0, 0, 1, 1], [], []>} : vector<64x64xbf16>, vector<64x128xbf16>, vector<64x128xf32> -> vector<64x128xf32>
    %50 = arith.addf %49, %15 : vector<64x128xf32>
    %cst_48 = arith.constant dense<0.000000e+00> : vector<64x128xf32>
    %51 = tpu.matmul %5, %14, %cst_48 {dimension_numbers = #tpu.dot_dimension_numbers<[1], [0], [0], [1], [0, 0, 1, 1], [], []>} : vector<64x64xf32>, vector<64x128xf32>, vector<64x128xf32> -> vector<64x128xf32>
    %52 = arith.subf %15, %1 : vector<64x128xf32>
    %53 = vector.broadcast %8 : vector<64x1xf32> to vector<64x128xf32>
    %54 = arith.mulf %53, %52 : vector<64x128xf32>
    %55 = arith.addf %51, %54 : vector<64x128xf32>
    %56 = math.absf %55 : vector<64x128xf32>
    %c0_49 = arith.constant 0 : index
    %c0_50 = arith.constant 0 : index
    %c0_51 = arith.constant 0 : index
    %57 = vector.load %arg7[%c0_49, %c0_50, %c0_51] : memref<16x128x128xbf16, #tpu.memory_space<vmem>>, vector<1x128x128xbf16>
    %58 = vector.shape_cast %57 : vector<1x128x128xbf16> to vector<128x128xbf16>
    %cst_52 = arith.constant dense<0.000000e+00> : vector<64x128xf32>
    %59 = tpu.matmul %10, %58, %cst_52 {dimension_numbers = #tpu.dot_dimension_numbers<[1], [0], [0], [1], [0, 0, 1, 1], [], []>} : vector<64x128xbf16>, vector<128x128xbf16>, vector<64x128xf32> -> vector<64x128xf32>
    %60 = arith.truncf %50 : vector<64x128xf32> to vector<64x128xbf16>
    %c1_53 = arith.constant 1 : index
    %c0_54 = arith.constant 0 : index
    %c0_55 = arith.constant 0 : index
    %61 = vector.load %arg7[%c1_53, %c0_54, %c0_55] : memref<16x128x128xbf16, #tpu.memory_space<vmem>>, vector<1x128x128xbf16>
    %62 = vector.shape_cast %61 : vector<1x128x128xbf16> to vector<128x128xbf16>
    %cst_56 = arith.constant dense<0.000000e+00> : vector<64x128xf32>
    %63 = tpu.matmul %60, %62, %cst_56 {dimension_numbers = #tpu.dot_dimension_numbers<[1], [0], [0], [1], [0, 0, 1, 1], [], []>} : vector<64x128xbf16>, vector<128x128xbf16>, vector<64x128xf32> -> vector<64x128xf32>
    %64 = arith.addf %59, %63 : vector<64x128xf32>
    %65 = arith.truncf %48 : vector<64x128xf32> to vector<64x128xbf16>
    %c2_57 = arith.constant 2 : index
    %c0_58 = arith.constant 0 : index
    %c0_59 = arith.constant 0 : index
    %66 = vector.load %arg7[%c2_57, %c0_58, %c0_59] : memref<16x128x128xbf16, #tpu.memory_space<vmem>>, vector<1x128x128xbf16>
    %67 = vector.shape_cast %66 : vector<1x128x128xbf16> to vector<128x128xbf16>
    %cst_60 = arith.constant dense<0.000000e+00> : vector<64x128xf32>
    %68 = tpu.matmul %65, %67, %cst_60 {dimension_numbers = #tpu.dot_dimension_numbers<[1], [0], [0], [1], [0, 0, 1, 1], [], []>} : vector<64x128xbf16>, vector<128x128xbf16>, vector<64x128xf32> -> vector<64x128xf32>
    %69 = arith.addf %64, %68 : vector<64x128xf32>
    %70 = arith.truncf %56 : vector<64x128xf32> to vector<64x128xbf16>
    %c3_61 = arith.constant 3 : index
    %c0_62 = arith.constant 0 : index
    %c0_63 = arith.constant 0 : index
    %71 = vector.load %arg7[%c3_61, %c0_62, %c0_63] : memref<16x128x128xbf16, #tpu.memory_space<vmem>>, vector<1x128x128xbf16>
    %72 = vector.shape_cast %71 : vector<1x128x128xbf16> to vector<128x128xbf16>
    %cst_64 = arith.constant dense<0.000000e+00> : vector<64x128xf32>
    %73 = tpu.matmul %70, %72, %cst_64 {dimension_numbers = #tpu.dot_dimension_numbers<[1], [0], [0], [1], [0, 0, 1, 1], [], []>} : vector<64x128xbf16>, vector<128x128xbf16>, vector<64x128xf32> -> vector<64x128xf32>
    %74 = arith.addf %69, %73 : vector<64x128xf32>
    %75 = vector.broadcast %9 : vector<64x1xf32> to vector<64x128xf32>
    %76 = arith.mulf %74, %75 : vector<64x128xf32>
    %cst_65 = arith.constant 0.000000e+00 : f32
    %77 = vector.broadcast %cst_65 : f32 to vector<64x128xf32>
    %78 = arith.maximumf %76, %77 : vector<64x128xf32>
    %79 = arith.truncf %78 : vector<64x128xf32> to vector<64x128xbf16>
    %c1_66 = arith.constant 1 : index
    %c0_67 = arith.constant 0 : index
    %c0_68 = arith.constant 0 : index
    %80 = vector.load %arg6[%c1_66, %c0_67, %c0_68] : memref<4x128x256xbf16, #tpu.memory_space<vmem>>, vector<1x128x256xbf16>
    %81 = vector.shape_cast %80 : vector<1x128x256xbf16> to vector<128x256xbf16>
    %cst_69 = arith.constant dense<0.000000e+00> : vector<64x256xf32>
    %82 = tpu.matmul %79, %81, %cst_69 {dimension_numbers = #tpu.dot_dimension_numbers<[1], [0], [0], [1], [0, 0, 1, 1], [], []>} : vector<64x128xbf16>, vector<128x256xbf16>, vector<64x256xf32> -> vector<64x256xf32>
    %83 = vector.extract_strided_slice %82 {offsets = [0, 0], sizes = [64, 128], strides = [1, 1]} : vector<64x256xf32> to vector<64x128xf32>
    %84 = vector.extract_strided_slice %82 {offsets = [0, 128], sizes = [64, 128], strides = [1, 1]} : vector<64x256xf32> to vector<64x128xf32>
    %85 = arith.truncf %83 : vector<64x128xf32> to vector<64x128xbf16>
    %c0_70 = arith.constant 0 : index
    %c0_71 = arith.constant 0 : index
    %c0_72 = arith.constant 0 : index
    %c0_73 = arith.constant 0 : index
    %86 = vector.load %arg2[%c0_70, %c0_71, %c0_72, %c0_73] : memref<1x8x64x64xbf16, #tpu.memory_space<vmem>>, vector<1x1x64x64xbf16>
    %87 = vector.shape_cast %86 : vector<1x1x64x64xbf16> to vector<64x64xbf16>
    %cst_74 = arith.constant dense<0.000000e+00> : vector<64x128xf32>
    %88 = tpu.matmul %87, %85, %cst_74 {dimension_numbers = #tpu.dot_dimension_numbers<[1], [0], [0], [1], [0, 0, 1, 1], [], []>} : vector<64x64xbf16>, vector<64x128xbf16>, vector<64x128xf32> -> vector<64x128xf32>
    %c0_75 = arith.constant 0 : index
    %c1_76 = arith.constant 1 : index
    %c0_77 = arith.constant 0 : index
    %c0_78 = arith.constant 0 : index
    %89 = vector.load %arg2[%c0_75, %c1_76, %c0_77, %c0_78] : memref<1x8x64x64xbf16, #tpu.memory_space<vmem>>, vector<1x1x64x64xbf16>
    %90 = vector.shape_cast %89 : vector<1x1x64x64xbf16> to vector<64x64xbf16>
    %cst_79 = arith.constant dense<0.000000e+00> : vector<64x128xf32>
    %91 = tpu.matmul %90, %85, %cst_79 {dimension_numbers = #tpu.dot_dimension_numbers<[1], [0], [0], [1], [0, 0, 1, 1], [], []>} : vector<64x64xbf16>, vector<64x128xbf16>, vector<64x128xf32> -> vector<64x128xf32>
    %92 = arith.maximumf %88, %91 : vector<64x128xf32>
    %c0_80 = arith.constant 0 : index
    %c2_81 = arith.constant 2 : index
    %c0_82 = arith.constant 0 : index
    %c0_83 = arith.constant 0 : index
    %93 = vector.load %arg2[%c0_80, %c2_81, %c0_82, %c0_83] : memref<1x8x64x64xbf16, #tpu.memory_space<vmem>>, vector<1x1x64x64xbf16>
    %94 = vector.shape_cast %93 : vector<1x1x64x64xbf16> to vector<64x64xbf16>
    %cst_84 = arith.constant dense<0.000000e+00> : vector<64x128xf32>
    %95 = tpu.matmul %94, %85, %cst_84 {dimension_numbers = #tpu.dot_dimension_numbers<[1], [0], [0], [1], [0, 0, 1, 1], [], []>} : vector<64x64xbf16>, vector<64x128xbf16>, vector<64x128xf32> -> vector<64x128xf32>
    %96 = arith.maximumf %92, %95 : vector<64x128xf32>
    %c0_85 = arith.constant 0 : index
    %c3_86 = arith.constant 3 : index
    %c0_87 = arith.constant 0 : index
    %c0_88 = arith.constant 0 : index
    %97 = vector.load %arg2[%c0_85, %c3_86, %c0_87, %c0_88] : memref<1x8x64x64xbf16, #tpu.memory_space<vmem>>, vector<1x1x64x64xbf16>
    %98 = vector.shape_cast %97 : vector<1x1x64x64xbf16> to vector<64x64xbf16>
    %cst_89 = arith.constant dense<0.000000e+00> : vector<64x128xf32>
    %99 = tpu.matmul %98, %85, %cst_89 {dimension_numbers = #tpu.dot_dimension_numbers<[1], [0], [0], [1], [0, 0, 1, 1], [], []>} : vector<64x64xbf16>, vector<64x128xbf16>, vector<64x128xf32> -> vector<64x128xf32>
    %100 = arith.maximumf %96, %99 : vector<64x128xf32>
    %c0_90 = arith.constant 0 : index
    %c4_91 = arith.constant 4 : index
    %c0_92 = arith.constant 0 : index
    %c0_93 = arith.constant 0 : index
    %101 = vector.load %arg2[%c0_90, %c4_91, %c0_92, %c0_93] : memref<1x8x64x64xbf16, #tpu.memory_space<vmem>>, vector<1x1x64x64xbf16>
    %102 = vector.shape_cast %101 : vector<1x1x64x64xbf16> to vector<64x64xbf16>
    %cst_94 = arith.constant dense<0.000000e+00> : vector<64x128xf32>
    %103 = tpu.matmul %102, %85, %cst_94 {dimension_numbers = #tpu.dot_dimension_numbers<[1], [0], [0], [1], [0, 0, 1, 1], [], []>} : vector<64x64xbf16>, vector<64x128xbf16>, vector<64x128xf32> -> vector<64x128xf32>
    %104 = arith.maximumf %100, %103 : vector<64x128xf32>
    %c0_95 = arith.constant 0 : index
    %c5_96 = arith.constant 5 : index
    %c0_97 = arith.constant 0 : index
    %c0_98 = arith.constant 0 : index
    %105 = vector.load %arg2[%c0_95, %c5_96, %c0_97, %c0_98] : memref<1x8x64x64xbf16, #tpu.memory_space<vmem>>, vector<1x1x64x64xbf16>
    %106 = vector.shape_cast %105 : vector<1x1x64x64xbf16> to vector<64x64xbf16>
    %cst_99 = arith.constant dense<0.000000e+00> : vector<64x128xf32>
    %107 = tpu.matmul %106, %85, %cst_99 {dimension_numbers = #tpu.dot_dimension_numbers<[1], [0], [0], [1], [0, 0, 1, 1], [], []>} : vector<64x64xbf16>, vector<64x128xbf16>, vector<64x128xf32> -> vector<64x128xf32>
    %108 = arith.maximumf %104, %107 : vector<64x128xf32>
    %c0_100 = arith.constant 0 : index
    %c6_101 = arith.constant 6 : index
    %c0_102 = arith.constant 0 : index
    %c0_103 = arith.constant 0 : index
    %109 = vector.load %arg2[%c0_100, %c6_101, %c0_102, %c0_103] : memref<1x8x64x64xbf16, #tpu.memory_space<vmem>>, vector<1x1x64x64xbf16>
    %110 = vector.shape_cast %109 : vector<1x1x64x64xbf16> to vector<64x64xbf16>
    %cst_104 = arith.constant dense<0.000000e+00> : vector<64x128xf32>
    %111 = tpu.matmul %110, %85, %cst_104 {dimension_numbers = #tpu.dot_dimension_numbers<[1], [0], [0], [1], [0, 0, 1, 1], [], []>} : vector<64x64xbf16>, vector<64x128xbf16>, vector<64x128xf32> -> vector<64x128xf32>
    %112 = arith.maximumf %108, %111 : vector<64x128xf32>
    %c0_105 = arith.constant 0 : index
    %c7_106 = arith.constant 7 : index
    %c0_107 = arith.constant 0 : index
    %c0_108 = arith.constant 0 : index
    %113 = vector.load %arg2[%c0_105, %c7_106, %c0_107, %c0_108] : memref<1x8x64x64xbf16, #tpu.memory_space<vmem>>, vector<1x1x64x64xbf16>
    %114 = vector.shape_cast %113 : vector<1x1x64x64xbf16> to vector<64x64xbf16>
    %cst_109 = arith.constant dense<0.000000e+00> : vector<64x128xf32>
    %115 = tpu.matmul %114, %85, %cst_109 {dimension_numbers = #tpu.dot_dimension_numbers<[1], [0], [0], [1], [0, 0, 1, 1], [], []>} : vector<64x64xbf16>, vector<64x128xbf16>, vector<64x128xf32> -> vector<64x128xf32>
    %116 = arith.maximumf %112, %115 : vector<64x128xf32>
    %117 = arith.addf %116, %84 : vector<64x128xf32>
    %cst_110 = arith.constant dense<0.000000e+00> : vector<64x128xf32>
    %118 = tpu.matmul %3, %85, %cst_110 {dimension_numbers = #tpu.dot_dimension_numbers<[1], [0], [0], [1], [0, 0, 1, 1], [], []>} : vector<64x64xbf16>, vector<64x128xbf16>, vector<64x128xf32> -> vector<64x128xf32>
    %119 = arith.addf %118, %84 : vector<64x128xf32>
    %cst_111 = arith.constant dense<0.000000e+00> : vector<64x128xf32>
    %120 = tpu.matmul %5, %83, %cst_111 {dimension_numbers = #tpu.dot_dimension_numbers<[1], [0], [0], [1], [0, 0, 1, 1], [], []>} : vector<64x64xf32>, vector<64x128xf32>, vector<64x128xf32> -> vector<64x128xf32>
    %121 = arith.subf %84, %78 : vector<64x128xf32>
    %122 = vector.broadcast %8 : vector<64x1xf32> to vector<64x128xf32>
    %123 = arith.mulf %122, %121 : vector<64x128xf32>
    %124 = arith.addf %120, %123 : vector<64x128xf32>
    %125 = math.absf %124 : vector<64x128xf32>
    %c4_112 = arith.constant 4 : index
    %c0_113 = arith.constant 0 : index
    %c0_114 = arith.constant 0 : index
    %126 = vector.load %arg7[%c4_112, %c0_113, %c0_114] : memref<16x128x128xbf16, #tpu.memory_space<vmem>>, vector<1x128x128xbf16>
    %127 = vector.shape_cast %126 : vector<1x128x128xbf16> to vector<128x128xbf16>
    %cst_115 = arith.constant dense<0.000000e+00> : vector<64x128xf32>
    %128 = tpu.matmul %79, %127, %cst_115 {dimension_numbers = #tpu.dot_dimension_numbers<[1], [0], [0], [1], [0, 0, 1, 1], [], []>} : vector<64x128xbf16>, vector<128x128xbf16>, vector<64x128xf32> -> vector<64x128xf32>
    %129 = arith.truncf %119 : vector<64x128xf32> to vector<64x128xbf16>
    %c5_116 = arith.constant 5 : index
    %c0_117 = arith.constant 0 : index
    %c0_118 = arith.constant 0 : index
    %130 = vector.load %arg7[%c5_116, %c0_117, %c0_118] : memref<16x128x128xbf16, #tpu.memory_space<vmem>>, vector<1x128x128xbf16>
    %131 = vector.shape_cast %130 : vector<1x128x128xbf16> to vector<128x128xbf16>
    %cst_119 = arith.constant dense<0.000000e+00> : vector<64x128xf32>
    %132 = tpu.matmul %129, %131, %cst_119 {dimension_numbers = #tpu.dot_dimension_numbers<[1], [0], [0], [1], [0, 0, 1, 1], [], []>} : vector<64x128xbf16>, vector<128x128xbf16>, vector<64x128xf32> -> vector<64x128xf32>
    %133 = arith.addf %128, %132 : vector<64x128xf32>
    %134 = arith.truncf %117 : vector<64x128xf32> to vector<64x128xbf16>
    %c6_120 = arith.constant 6 : index
    %c0_121 = arith.constant 0 : index
    %c0_122 = arith.constant 0 : index
    %135 = vector.load %arg7[%c6_120, %c0_121, %c0_122] : memref<16x128x128xbf16, #tpu.memory_space<vmem>>, vector<1x128x128xbf16>
    %136 = vector.shape_cast %135 : vector<1x128x128xbf16> to vector<128x128xbf16>
    %cst_123 = arith.constant dense<0.000000e+00> : vector<64x128xf32>
    %137 = tpu.matmul %134, %136, %cst_123 {dimension_numbers = #tpu.dot_dimension_numbers<[1], [0], [0], [1], [0, 0, 1, 1], [], []>} : vector<64x128xbf16>, vector<128x128xbf16>, vector<64x128xf32> -> vector<64x128xf32>
    %138 = arith.addf %133, %137 : vector<64x128xf32>
    %139 = arith.truncf %125 : vector<64x128xf32> to vector<64x128xbf16>
    %c7_124 = arith.constant 7 : index
    %c0_125 = arith.constant 0 : index
    %c0_126 = arith.constant 0 : index
    %140 = vector.load %arg7[%c7_124, %c0_125, %c0_126] : memref<16x128x128xbf16, #tpu.memory_space<vmem>>, vector<1x128x128xbf16>
    %141 = vector.shape_cast %140 : vector<1x128x128xbf16> to vector<128x128xbf16>
    %cst_127 = arith.constant dense<0.000000e+00> : vector<64x128xf32>
    %142 = tpu.matmul %139, %141, %cst_127 {dimension_numbers = #tpu.dot_dimension_numbers<[1], [0], [0], [1], [0, 0, 1, 1], [], []>} : vector<64x128xbf16>, vector<128x128xbf16>, vector<64x128xf32> -> vector<64x128xf32>
    %143 = arith.addf %138, %142 : vector<64x128xf32>
    %144 = vector.broadcast %9 : vector<64x1xf32> to vector<64x128xf32>
    %145 = arith.mulf %143, %144 : vector<64x128xf32>
    %cst_128 = arith.constant 0.000000e+00 : f32
    %146 = vector.broadcast %cst_128 : f32 to vector<64x128xf32>
    %147 = arith.maximumf %145, %146 : vector<64x128xf32>
    %148 = arith.truncf %147 : vector<64x128xf32> to vector<64x128xbf16>
    %c2_129 = arith.constant 2 : index
    %c0_130 = arith.constant 0 : index
    %c0_131 = arith.constant 0 : index
    %149 = vector.load %arg6[%c2_129, %c0_130, %c0_131] : memref<4x128x256xbf16, #tpu.memory_space<vmem>>, vector<1x128x256xbf16>
    %150 = vector.shape_cast %149 : vector<1x128x256xbf16> to vector<128x256xbf16>
    %cst_132 = arith.constant dense<0.000000e+00> : vector<64x256xf32>
    %151 = tpu.matmul %148, %150, %cst_132 {dimension_numbers = #tpu.dot_dimension_numbers<[1], [0], [0], [1], [0, 0, 1, 1], [], []>} : vector<64x128xbf16>, vector<128x256xbf16>, vector<64x256xf32> -> vector<64x256xf32>
    %152 = vector.extract_strided_slice %151 {offsets = [0, 0], sizes = [64, 128], strides = [1, 1]} : vector<64x256xf32> to vector<64x128xf32>
    %153 = vector.extract_strided_slice %151 {offsets = [0, 128], sizes = [64, 128], strides = [1, 1]} : vector<64x256xf32> to vector<64x128xf32>
    %154 = arith.truncf %152 : vector<64x128xf32> to vector<64x128xbf16>
    %c0_133 = arith.constant 0 : index
    %c0_134 = arith.constant 0 : index
    %c0_135 = arith.constant 0 : index
    %c0_136 = arith.constant 0 : index
    %155 = vector.load %arg2[%c0_133, %c0_134, %c0_135, %c0_136] : memref<1x8x64x64xbf16, #tpu.memory_space<vmem>>, vector<1x1x64x64xbf16>
    %156 = vector.shape_cast %155 : vector<1x1x64x64xbf16> to vector<64x64xbf16>
    %cst_137 = arith.constant dense<0.000000e+00> : vector<64x128xf32>
    %157 = tpu.matmul %156, %154, %cst_137 {dimension_numbers = #tpu.dot_dimension_numbers<[1], [0], [0], [1], [0, 0, 1, 1], [], []>} : vector<64x64xbf16>, vector<64x128xbf16>, vector<64x128xf32> -> vector<64x128xf32>
    %c0_138 = arith.constant 0 : index
    %c1_139 = arith.constant 1 : index
    %c0_140 = arith.constant 0 : index
    %c0_141 = arith.constant 0 : index
    %158 = vector.load %arg2[%c0_138, %c1_139, %c0_140, %c0_141] : memref<1x8x64x64xbf16, #tpu.memory_space<vmem>>, vector<1x1x64x64xbf16>
    %159 = vector.shape_cast %158 : vector<1x1x64x64xbf16> to vector<64x64xbf16>
    %cst_142 = arith.constant dense<0.000000e+00> : vector<64x128xf32>
    %160 = tpu.matmul %159, %154, %cst_142 {dimension_numbers = #tpu.dot_dimension_numbers<[1], [0], [0], [1], [0, 0, 1, 1], [], []>} : vector<64x64xbf16>, vector<64x128xbf16>, vector<64x128xf32> -> vector<64x128xf32>
    %161 = arith.maximumf %157, %160 : vector<64x128xf32>
    %c0_143 = arith.constant 0 : index
    %c2_144 = arith.constant 2 : index
    %c0_145 = arith.constant 0 : index
    %c0_146 = arith.constant 0 : index
    %162 = vector.load %arg2[%c0_143, %c2_144, %c0_145, %c0_146] : memref<1x8x64x64xbf16, #tpu.memory_space<vmem>>, vector<1x1x64x64xbf16>
    %163 = vector.shape_cast %162 : vector<1x1x64x64xbf16> to vector<64x64xbf16>
    %cst_147 = arith.constant dense<0.000000e+00> : vector<64x128xf32>
    %164 = tpu.matmul %163, %154, %cst_147 {dimension_numbers = #tpu.dot_dimension_numbers<[1], [0], [0], [1], [0, 0, 1, 1], [], []>} : vector<64x64xbf16>, vector<64x128xbf16>, vector<64x128xf32> -> vector<64x128xf32>
    %165 = arith.maximumf %161, %164 : vector<64x128xf32>
    %c0_148 = arith.constant 0 : index
    %c3_149 = arith.constant 3 : index
    %c0_150 = arith.constant 0 : index
    %c0_151 = arith.constant 0 : index
    %166 = vector.load %arg2[%c0_148, %c3_149, %c0_150, %c0_151] : memref<1x8x64x64xbf16, #tpu.memory_space<vmem>>, vector<1x1x64x64xbf16>
    %167 = vector.shape_cast %166 : vector<1x1x64x64xbf16> to vector<64x64xbf16>
    %cst_152 = arith.constant dense<0.000000e+00> : vector<64x128xf32>
    %168 = tpu.matmul %167, %154, %cst_152 {dimension_numbers = #tpu.dot_dimension_numbers<[1], [0], [0], [1], [0, 0, 1, 1], [], []>} : vector<64x64xbf16>, vector<64x128xbf16>, vector<64x128xf32> -> vector<64x128xf32>
    %169 = arith.maximumf %165, %168 : vector<64x128xf32>
    %c0_153 = arith.constant 0 : index
    %c4_154 = arith.constant 4 : index
    %c0_155 = arith.constant 0 : index
    %c0_156 = arith.constant 0 : index
    %170 = vector.load %arg2[%c0_153, %c4_154, %c0_155, %c0_156] : memref<1x8x64x64xbf16, #tpu.memory_space<vmem>>, vector<1x1x64x64xbf16>
    %171 = vector.shape_cast %170 : vector<1x1x64x64xbf16> to vector<64x64xbf16>
    %cst_157 = arith.constant dense<0.000000e+00> : vector<64x128xf32>
    %172 = tpu.matmul %171, %154, %cst_157 {dimension_numbers = #tpu.dot_dimension_numbers<[1], [0], [0], [1], [0, 0, 1, 1], [], []>} : vector<64x64xbf16>, vector<64x128xbf16>, vector<64x128xf32> -> vector<64x128xf32>
    %173 = arith.maximumf %169, %172 : vector<64x128xf32>
    %c0_158 = arith.constant 0 : index
    %c5_159 = arith.constant 5 : index
    %c0_160 = arith.constant 0 : index
    %c0_161 = arith.constant 0 : index
    %174 = vector.load %arg2[%c0_158, %c5_159, %c0_160, %c0_161] : memref<1x8x64x64xbf16, #tpu.memory_space<vmem>>, vector<1x1x64x64xbf16>
    %175 = vector.shape_cast %174 : vector<1x1x64x64xbf16> to vector<64x64xbf16>
    %cst_162 = arith.constant dense<0.000000e+00> : vector<64x128xf32>
    %176 = tpu.matmul %175, %154, %cst_162 {dimension_numbers = #tpu.dot_dimension_numbers<[1], [0], [0], [1], [0, 0, 1, 1], [], []>} : vector<64x64xbf16>, vector<64x128xbf16>, vector<64x128xf32> -> vector<64x128xf32>
    %177 = arith.maximumf %173, %176 : vector<64x128xf32>
    %c0_163 = arith.constant 0 : index
    %c6_164 = arith.constant 6 : index
    %c0_165 = arith.constant 0 : index
    %c0_166 = arith.constant 0 : index
    %178 = vector.load %arg2[%c0_163, %c6_164, %c0_165, %c0_166] : memref<1x8x64x64xbf16, #tpu.memory_space<vmem>>, vector<1x1x64x64xbf16>
    %179 = vector.shape_cast %178 : vector<1x1x64x64xbf16> to vector<64x64xbf16>
    %cst_167 = arith.constant dense<0.000000e+00> : vector<64x128xf32>
    %180 = tpu.matmul %179, %154, %cst_167 {dimension_numbers = #tpu.dot_dimension_numbers<[1], [0], [0], [1], [0, 0, 1, 1], [], []>} : vector<64x64xbf16>, vector<64x128xbf16>, vector<64x128xf32> -> vector<64x128xf32>
    %181 = arith.maximumf %177, %180 : vector<64x128xf32>
    %c0_168 = arith.constant 0 : index
    %c7_169 = arith.constant 7 : index
    %c0_170 = arith.constant 0 : index
    %c0_171 = arith.constant 0 : index
    %182 = vector.load %arg2[%c0_168, %c7_169, %c0_170, %c0_171] : memref<1x8x64x64xbf16, #tpu.memory_space<vmem>>, vector<1x1x64x64xbf16>
    %183 = vector.shape_cast %182 : vector<1x1x64x64xbf16> to vector<64x64xbf16>
    %cst_172 = arith.constant dense<0.000000e+00> : vector<64x128xf32>
    %184 = tpu.matmul %183, %154, %cst_172 {dimension_numbers = #tpu.dot_dimension_numbers<[1], [0], [0], [1], [0, 0, 1, 1], [], []>} : vector<64x64xbf16>, vector<64x128xbf16>, vector<64x128xf32> -> vector<64x128xf32>
    %185 = arith.maximumf %181, %184 : vector<64x128xf32>
    %186 = arith.addf %185, %153 : vector<64x128xf32>
    %cst_173 = arith.constant dense<0.000000e+00> : vector<64x128xf32>
    %187 = tpu.matmul %3, %154, %cst_173 {dimension_numbers = #tpu.dot_dimension_numbers<[1], [0], [0], [1], [0, 0, 1, 1], [], []>} : vector<64x64xbf16>, vector<64x128xbf16>, vector<64x128xf32> -> vector<64x128xf32>
    %188 = arith.addf %187, %153 : vector<64x128xf32>
    %cst_174 = arith.constant dense<0.000000e+00> : vector<64x128xf32>
    %189 = tpu.matmul %5, %152, %cst_174 {dimension_numbers = #tpu.dot_dimension_numbers<[1], [0], [0], [1], [0, 0, 1, 1], [], []>} : vector<64x64xf32>, vector<64x128xf32>, vector<64x128xf32> -> vector<64x128xf32>
    %190 = arith.subf %153, %147 : vector<64x128xf32>
    %191 = vector.broadcast %8 : vector<64x1xf32> to vector<64x128xf32>
    %192 = arith.mulf %191, %190 : vector<64x128xf32>
    %193 = arith.addf %189, %192 : vector<64x128xf32>
    %194 = math.absf %193 : vector<64x128xf32>
    %c8 = arith.constant 8 : index
    %c0_175 = arith.constant 0 : index
    %c0_176 = arith.constant 0 : index
    %195 = vector.load %arg7[%c8, %c0_175, %c0_176] : memref<16x128x128xbf16, #tpu.memory_space<vmem>>, vector<1x128x128xbf16>
    %196 = vector.shape_cast %195 : vector<1x128x128xbf16> to vector<128x128xbf16>
    %cst_177 = arith.constant dense<0.000000e+00> : vector<64x128xf32>
    %197 = tpu.matmul %148, %196, %cst_177 {dimension_numbers = #tpu.dot_dimension_numbers<[1], [0], [0], [1], [0, 0, 1, 1], [], []>} : vector<64x128xbf16>, vector<128x128xbf16>, vector<64x128xf32> -> vector<64x128xf32>
    %198 = arith.truncf %188 : vector<64x128xf32> to vector<64x128xbf16>
    %c9 = arith.constant 9 : index
    %c0_178 = arith.constant 0 : index
    %c0_179 = arith.constant 0 : index
    %199 = vector.load %arg7[%c9, %c0_178, %c0_179] : memref<16x128x128xbf16, #tpu.memory_space<vmem>>, vector<1x128x128xbf16>
    %200 = vector.shape_cast %199 : vector<1x128x128xbf16> to vector<128x128xbf16>
    %cst_180 = arith.constant dense<0.000000e+00> : vector<64x128xf32>
    %201 = tpu.matmul %198, %200, %cst_180 {dimension_numbers = #tpu.dot_dimension_numbers<[1], [0], [0], [1], [0, 0, 1, 1], [], []>} : vector<64x128xbf16>, vector<128x128xbf16>, vector<64x128xf32> -> vector<64x128xf32>
    %202 = arith.addf %197, %201 : vector<64x128xf32>
    %203 = arith.truncf %186 : vector<64x128xf32> to vector<64x128xbf16>
    %c10 = arith.constant 10 : index
    %c0_181 = arith.constant 0 : index
    %c0_182 = arith.constant 0 : index
    %204 = vector.load %arg7[%c10, %c0_181, %c0_182] : memref<16x128x128xbf16, #tpu.memory_space<vmem>>, vector<1x128x128xbf16>
    %205 = vector.shape_cast %204 : vector<1x128x128xbf16> to vector<128x128xbf16>
    %cst_183 = arith.constant dense<0.000000e+00> : vector<64x128xf32>
    %206 = tpu.matmul %203, %205, %cst_183 {dimension_numbers = #tpu.dot_dimension_numbers<[1], [0], [0], [1], [0, 0, 1, 1], [], []>} : vector<64x128xbf16>, vector<128x128xbf16>, vector<64x128xf32> -> vector<64x128xf32>
    %207 = arith.addf %202, %206 : vector<64x128xf32>
    %208 = arith.truncf %194 : vector<64x128xf32> to vector<64x128xbf16>
    %c11 = arith.constant 11 : index
    %c0_184 = arith.constant 0 : index
    %c0_185 = arith.constant 0 : index
    %209 = vector.load %arg7[%c11, %c0_184, %c0_185] : memref<16x128x128xbf16, #tpu.memory_space<vmem>>, vector<1x128x128xbf16>
    %210 = vector.shape_cast %209 : vector<1x128x128xbf16> to vector<128x128xbf16>
    %cst_186 = arith.constant dense<0.000000e+00> : vector<64x128xf32>
    %211 = tpu.matmul %208, %210, %cst_186 {dimension_numbers = #tpu.dot_dimension_numbers<[1], [0], [0], [1], [0, 0, 1, 1], [], []>} : vector<64x128xbf16>, vector<128x128xbf16>, vector<64x128xf32> -> vector<64x128xf32>
    %212 = arith.addf %207, %211 : vector<64x128xf32>
    %213 = vector.broadcast %9 : vector<64x1xf32> to vector<64x128xf32>
    %214 = arith.mulf %212, %213 : vector<64x128xf32>
    %cst_187 = arith.constant 0.000000e+00 : f32
    %215 = vector.broadcast %cst_187 : f32 to vector<64x128xf32>
    %216 = arith.maximumf %214, %215 : vector<64x128xf32>
    %217 = arith.truncf %216 : vector<64x128xf32> to vector<64x128xbf16>
    %c3_188 = arith.constant 3 : index
    %c0_189 = arith.constant 0 : index
    %c0_190 = arith.constant 0 : index
    %218 = vector.load %arg6[%c3_188, %c0_189, %c0_190] : memref<4x128x256xbf16, #tpu.memory_space<vmem>>, vector<1x128x256xbf16>
    %219 = vector.shape_cast %218 : vector<1x128x256xbf16> to vector<128x256xbf16>
    %cst_191 = arith.constant dense<0.000000e+00> : vector<64x256xf32>
    %220 = tpu.matmul %217, %219, %cst_191 {dimension_numbers = #tpu.dot_dimension_numbers<[1], [0], [0], [1], [0, 0, 1, 1], [], []>} : vector<64x128xbf16>, vector<128x256xbf16>, vector<64x256xf32> -> vector<64x256xf32>
    %221 = vector.extract_strided_slice %220 {offsets = [0, 0], sizes = [64, 128], strides = [1, 1]} : vector<64x256xf32> to vector<64x128xf32>
    %222 = vector.extract_strided_slice %220 {offsets = [0, 128], sizes = [64, 128], strides = [1, 1]} : vector<64x256xf32> to vector<64x128xf32>
    %223 = arith.truncf %221 : vector<64x128xf32> to vector<64x128xbf16>
    %c0_192 = arith.constant 0 : index
    %c0_193 = arith.constant 0 : index
    %c0_194 = arith.constant 0 : index
    %c0_195 = arith.constant 0 : index
    %224 = vector.load %arg2[%c0_192, %c0_193, %c0_194, %c0_195] : memref<1x8x64x64xbf16, #tpu.memory_space<vmem>>, vector<1x1x64x64xbf16>
    %225 = vector.shape_cast %224 : vector<1x1x64x64xbf16> to vector<64x64xbf16>
    %cst_196 = arith.constant dense<0.000000e+00> : vector<64x128xf32>
    %226 = tpu.matmul %225, %223, %cst_196 {dimension_numbers = #tpu.dot_dimension_numbers<[1], [0], [0], [1], [0, 0, 1, 1], [], []>} : vector<64x64xbf16>, vector<64x128xbf16>, vector<64x128xf32> -> vector<64x128xf32>
    %c0_197 = arith.constant 0 : index
    %c1_198 = arith.constant 1 : index
    %c0_199 = arith.constant 0 : index
    %c0_200 = arith.constant 0 : index
    %227 = vector.load %arg2[%c0_197, %c1_198, %c0_199, %c0_200] : memref<1x8x64x64xbf16, #tpu.memory_space<vmem>>, vector<1x1x64x64xbf16>
    %228 = vector.shape_cast %227 : vector<1x1x64x64xbf16> to vector<64x64xbf16>
    %cst_201 = arith.constant dense<0.000000e+00> : vector<64x128xf32>
    %229 = tpu.matmul %228, %223, %cst_201 {dimension_numbers = #tpu.dot_dimension_numbers<[1], [0], [0], [1], [0, 0, 1, 1], [], []>} : vector<64x64xbf16>, vector<64x128xbf16>, vector<64x128xf32> -> vector<64x128xf32>
    %230 = arith.maximumf %226, %229 : vector<64x128xf32>
    %c0_202 = arith.constant 0 : index
    %c2_203 = arith.constant 2 : index
    %c0_204 = arith.constant 0 : index
    %c0_205 = arith.constant 0 : index
    %231 = vector.load %arg2[%c0_202, %c2_203, %c0_204, %c0_205] : memref<1x8x64x64xbf16, #tpu.memory_space<vmem>>, vector<1x1x64x64xbf16>
    %232 = vector.shape_cast %231 : vector<1x1x64x64xbf16> to vector<64x64xbf16>
    %cst_206 = arith.constant dense<0.000000e+00> : vector<64x128xf32>
    %233 = tpu.matmul %232, %223, %cst_206 {dimension_numbers = #tpu.dot_dimension_numbers<[1], [0], [0], [1], [0, 0, 1, 1], [], []>} : vector<64x64xbf16>, vector<64x128xbf16>, vector<64x128xf32> -> vector<64x128xf32>
    %234 = arith.maximumf %230, %233 : vector<64x128xf32>
    %c0_207 = arith.constant 0 : index
    %c3_208 = arith.constant 3 : index
    %c0_209 = arith.constant 0 : index
    %c0_210 = arith.constant 0 : index
    %235 = vector.load %arg2[%c0_207, %c3_208, %c0_209, %c0_210] : memref<1x8x64x64xbf16, #tpu.memory_space<vmem>>, vector<1x1x64x64xbf16>
    %236 = vector.shape_cast %235 : vector<1x1x64x64xbf16> to vector<64x64xbf16>
    %cst_211 = arith.constant dense<0.000000e+00> : vector<64x128xf32>
    %237 = tpu.matmul %236, %223, %cst_211 {dimension_numbers = #tpu.dot_dimension_numbers<[1], [0], [0], [1], [0, 0, 1, 1], [], []>} : vector<64x64xbf16>, vector<64x128xbf16>, vector<64x128xf32> -> vector<64x128xf32>
    %238 = arith.maximumf %234, %237 : vector<64x128xf32>
    %c0_212 = arith.constant 0 : index
    %c4_213 = arith.constant 4 : index
    %c0_214 = arith.constant 0 : index
    %c0_215 = arith.constant 0 : index
    %239 = vector.load %arg2[%c0_212, %c4_213, %c0_214, %c0_215] : memref<1x8x64x64xbf16, #tpu.memory_space<vmem>>, vector<1x1x64x64xbf16>
    %240 = vector.shape_cast %239 : vector<1x1x64x64xbf16> to vector<64x64xbf16>
    %cst_216 = arith.constant dense<0.000000e+00> : vector<64x128xf32>
    %241 = tpu.matmul %240, %223, %cst_216 {dimension_numbers = #tpu.dot_dimension_numbers<[1], [0], [0], [1], [0, 0, 1, 1], [], []>} : vector<64x64xbf16>, vector<64x128xbf16>, vector<64x128xf32> -> vector<64x128xf32>
    %242 = arith.maximumf %238, %241 : vector<64x128xf32>
    %c0_217 = arith.constant 0 : index
    %c5_218 = arith.constant 5 : index
    %c0_219 = arith.constant 0 : index
    %c0_220 = arith.constant 0 : index
    %243 = vector.load %arg2[%c0_217, %c5_218, %c0_219, %c0_220] : memref<1x8x64x64xbf16, #tpu.memory_space<vmem>>, vector<1x1x64x64xbf16>
    %244 = vector.shape_cast %243 : vector<1x1x64x64xbf16> to vector<64x64xbf16>
    %cst_221 = arith.constant dense<0.000000e+00> : vector<64x128xf32>
    %245 = tpu.matmul %244, %223, %cst_221 {dimension_numbers = #tpu.dot_dimension_numbers<[1], [0], [0], [1], [0, 0, 1, 1], [], []>} : vector<64x64xbf16>, vector<64x128xbf16>, vector<64x128xf32> -> vector<64x128xf32>
    %246 = arith.maximumf %242, %245 : vector<64x128xf32>
    %c0_222 = arith.constant 0 : index
    %c6_223 = arith.constant 6 : index
    %c0_224 = arith.constant 0 : index
    %c0_225 = arith.constant 0 : index
    %247 = vector.load %arg2[%c0_222, %c6_223, %c0_224, %c0_225] : memref<1x8x64x64xbf16, #tpu.memory_space<vmem>>, vector<1x1x64x64xbf16>
    %248 = vector.shape_cast %247 : vector<1x1x64x64xbf16> to vector<64x64xbf16>
    %cst_226 = arith.constant dense<0.000000e+00> : vector<64x128xf32>
    %249 = tpu.matmul %248, %223, %cst_226 {dimension_numbers = #tpu.dot_dimension_numbers<[1], [0], [0], [1], [0, 0, 1, 1], [], []>} : vector<64x64xbf16>, vector<64x128xbf16>, vector<64x128xf32> -> vector<64x128xf32>
    %250 = arith.maximumf %246, %249 : vector<64x128xf32>
    %c0_227 = arith.constant 0 : index
    %c7_228 = arith.constant 7 : index
    %c0_229 = arith.constant 0 : index
    %c0_230 = arith.constant 0 : index
    %251 = vector.load %arg2[%c0_227, %c7_228, %c0_229, %c0_230] : memref<1x8x64x64xbf16, #tpu.memory_space<vmem>>, vector<1x1x64x64xbf16>
    %252 = vector.shape_cast %251 : vector<1x1x64x64xbf16> to vector<64x64xbf16>
    %cst_231 = arith.constant dense<0.000000e+00> : vector<64x128xf32>
    %253 = tpu.matmul %252, %223, %cst_231 {dimension_numbers = #tpu.dot_dimension_numbers<[1], [0], [0], [1], [0, 0, 1, 1], [], []>} : vector<64x64xbf16>, vector<64x128xbf16>, vector<64x128xf32> -> vector<64x128xf32>
    %254 = arith.maximumf %250, %253 : vector<64x128xf32>
    %255 = arith.addf %254, %222 : vector<64x128xf32>
    %cst_232 = arith.constant dense<0.000000e+00> : vector<64x128xf32>
    %256 = tpu.matmul %3, %223, %cst_232 {dimension_numbers = #tpu.dot_dimension_numbers<[1], [0], [0], [1], [0, 0, 1, 1], [], []>} : vector<64x64xbf16>, vector<64x128xbf16>, vector<64x128xf32> -> vector<64x128xf32>
    %257 = arith.addf %256, %222 : vector<64x128xf32>
    %cst_233 = arith.constant dense<0.000000e+00> : vector<64x128xf32>
    %258 = tpu.matmul %5, %221, %cst_233 {dimension_numbers = #tpu.dot_dimension_numbers<[1], [0], [0], [1], [0, 0, 1, 1], [], []>} : vector<64x64xf32>, vector<64x128xf32>, vector<64x128xf32> -> vector<64x128xf32>
    %259 = arith.subf %222, %216 : vector<64x128xf32>
    %260 = vector.broadcast %8 : vector<64x1xf32> to vector<64x128xf32>
    %261 = arith.mulf %260, %259 : vector<64x128xf32>
    %262 = arith.addf %258, %261 : vector<64x128xf32>
    %263 = math.absf %262 : vector<64x128xf32>
    %c12 = arith.constant 12 : index
    %c0_234 = arith.constant 0 : index
    %c0_235 = arith.constant 0 : index
    %264 = vector.load %arg7[%c12, %c0_234, %c0_235] : memref<16x128x128xbf16, #tpu.memory_space<vmem>>, vector<1x128x128xbf16>
    %265 = vector.shape_cast %264 : vector<1x128x128xbf16> to vector<128x128xbf16>
    %cst_236 = arith.constant dense<0.000000e+00> : vector<64x128xf32>
    %266 = tpu.matmul %217, %265, %cst_236 {dimension_numbers = #tpu.dot_dimension_numbers<[1], [0], [0], [1], [0, 0, 1, 1], [], []>} : vector<64x128xbf16>, vector<128x128xbf16>, vector<64x128xf32> -> vector<64x128xf32>
    %267 = arith.truncf %257 : vector<64x128xf32> to vector<64x128xbf16>
    %c13 = arith.constant 13 : index
    %c0_237 = arith.constant 0 : index
    %c0_238 = arith.constant 0 : index
    %268 = vector.load %arg7[%c13, %c0_237, %c0_238] : memref<16x128x128xbf16, #tpu.memory_space<vmem>>, vector<1x128x128xbf16>
    %269 = vector.shape_cast %268 : vector<1x128x128xbf16> to vector<128x128xbf16>
    %cst_239 = arith.constant dense<0.000000e+00> : vector<64x128xf32>
    %270 = tpu.matmul %267, %269, %cst_239 {dimension_numbers = #tpu.dot_dimension_numbers<[1], [0], [0], [1], [0, 0, 1, 1], [], []>} : vector<64x128xbf16>, vector<128x128xbf16>, vector<64x128xf32> -> vector<64x128xf32>
    %271 = arith.addf %266, %270 : vector<64x128xf32>
    %272 = arith.truncf %255 : vector<64x128xf32> to vector<64x128xbf16>
    %c14 = arith.constant 14 : index
    %c0_240 = arith.constant 0 : index
    %c0_241 = arith.constant 0 : index
    %273 = vector.load %arg7[%c14, %c0_240, %c0_241] : memref<16x128x128xbf16, #tpu.memory_space<vmem>>, vector<1x128x128xbf16>
    %274 = vector.shape_cast %273 : vector<1x128x128xbf16> to vector<128x128xbf16>
    %cst_242 = arith.constant dense<0.000000e+00> : vector<64x128xf32>
    %275 = tpu.matmul %272, %274, %cst_242 {dimension_numbers = #tpu.dot_dimension_numbers<[1], [0], [0], [1], [0, 0, 1, 1], [], []>} : vector<64x128xbf16>, vector<128x128xbf16>, vector<64x128xf32> -> vector<64x128xf32>
    %276 = arith.addf %271, %275 : vector<64x128xf32>
    %277 = arith.truncf %263 : vector<64x128xf32> to vector<64x128xbf16>
    %c15 = arith.constant 15 : index
    %c0_243 = arith.constant 0 : index
    %c0_244 = arith.constant 0 : index
    %278 = vector.load %arg7[%c15, %c0_243, %c0_244] : memref<16x128x128xbf16, #tpu.memory_space<vmem>>, vector<1x128x128xbf16>
    %279 = vector.shape_cast %278 : vector<1x128x128xbf16> to vector<128x128xbf16>
    %cst_245 = arith.constant dense<0.000000e+00> : vector<64x128xf32>
    %280 = tpu.matmul %277, %279, %cst_245 {dimension_numbers = #tpu.dot_dimension_numbers<[1], [0], [0], [1], [0, 0, 1, 1], [], []>} : vector<64x128xbf16>, vector<128x128xbf16>, vector<64x128xf32> -> vector<64x128xf32>
    %281 = arith.addf %276, %280 : vector<64x128xf32>
    %282 = vector.broadcast %9 : vector<64x1xf32> to vector<64x128xf32>
    %283 = arith.mulf %281, %282 : vector<64x128xf32>
    %cst_246 = arith.constant 0.000000e+00 : f32
    %284 = vector.broadcast %cst_246 : f32 to vector<64x128xf32>
    %285 = arith.maximumf %283, %284 : vector<64x128xf32>
    %cst_247 = arith.constant dense<0.000000e+00> : vector<128xf32>
    %286 = vector.multi_reduction <add>, %285, %cst_247 [0] : vector<64x128xf32> to vector<128xf32>
    %287 = vector.shape_cast %286 : vector<128xf32> to vector<1x128xf32>
    %cst_248 = arith.constant 6.400000e+01 : f32
    %288 = vector.broadcast %cst_248 : f32 to vector<1x128xf32>
    %289 = arith.divf %287, %288 : vector<1x128xf32>
    %290 = arith.truncf %289 : vector<1x128xf32> to vector<1x128xbf16>
    %c0_249 = arith.constant 0 : index
    %c0_250 = arith.constant 0 : index
    %c0_251 = arith.constant 0 : index
    %291 = vector.load %arg8[%c0_249, %c0_250, %c0_251] : memref<3x128x128xbf16, #tpu.memory_space<vmem>>, vector<1x128x128xbf16>
    %292 = vector.shape_cast %291 : vector<1x128x128xbf16> to vector<128x128xbf16>
    %cst_252 = arith.constant dense<0.000000e+00> : vector<1x128xf32>
    %293 = tpu.matmul %290, %292, %cst_252 {dimension_numbers = #tpu.dot_dimension_numbers<[1], [0], [0], [1], [0, 0, 1, 1], [], []>} : vector<1x128xbf16>, vector<128x128xbf16>, vector<1x128xf32> -> vector<1x128xf32>
    %c0_253 = arith.constant 0 : index
    %c0_254 = arith.constant 0 : index
    %c0_255 = arith.constant 0 : index
    %294 = vector.load %arg9[%c0_253, %c0_254, %c0_255] : memref<3x1x128xf32, #tpu.memory_space<vmem>>, vector<1x1x128xf32>
    %295 = vector.shape_cast %294 : vector<1x1x128xf32> to vector<1x128xf32>
    %296 = arith.addf %293, %295 : vector<1x128xf32>
    %cst_256 = arith.constant 0.000000e+00 : f32
    %297 = vector.broadcast %cst_256 : f32 to vector<1x128xf32>
    %298 = arith.maximumf %296, %297 : vector<1x128xf32>
    %299 = arith.truncf %298 : vector<1x128xf32> to vector<1x128xbf16>
    %c1_257 = arith.constant 1 : index
    %c0_258 = arith.constant 0 : index
    %c0_259 = arith.constant 0 : index
    %300 = vector.load %arg8[%c1_257, %c0_258, %c0_259] : memref<3x128x128xbf16, #tpu.memory_space<vmem>>, vector<1x128x128xbf16>
    %301 = vector.shape_cast %300 : vector<1x128x128xbf16> to vector<128x128xbf16>
    %cst_260 = arith.constant dense<0.000000e+00> : vector<1x128xf32>
    %302 = tpu.matmul %299, %301, %cst_260 {dimension_numbers = #tpu.dot_dimension_numbers<[1], [0], [0], [1], [0, 0, 1, 1], [], []>} : vector<1x128xbf16>, vector<128x128xbf16>, vector<1x128xf32> -> vector<1x128xf32>
    %c1_261 = arith.constant 1 : index
    %c0_262 = arith.constant 0 : index
    %c0_263 = arith.constant 0 : index
    %303 = vector.load %arg9[%c1_261, %c0_262, %c0_263] : memref<3x1x128xf32, #tpu.memory_space<vmem>>, vector<1x1x128xf32>
    %304 = vector.shape_cast %303 : vector<1x1x128xf32> to vector<1x128xf32>
    %305 = arith.addf %302, %304 : vector<1x128xf32>
    %cst_264 = arith.constant 0.000000e+00 : f32
    %306 = vector.broadcast %cst_264 : f32 to vector<1x128xf32>
    %307 = arith.maximumf %305, %306 : vector<1x128xf32>
    %308 = arith.truncf %307 : vector<1x128xf32> to vector<1x128xbf16>
    %c2_265 = arith.constant 2 : index
    %c0_266 = arith.constant 0 : index
    %c0_267 = arith.constant 0 : index
    %309 = vector.load %arg8[%c2_265, %c0_266, %c0_267] : memref<3x128x128xbf16, #tpu.memory_space<vmem>>, vector<1x128x128xbf16>
    %310 = vector.shape_cast %309 : vector<1x128x128xbf16> to vector<128x128xbf16>
    %cst_268 = arith.constant dense<0.000000e+00> : vector<1x128xf32>
    %311 = tpu.matmul %308, %310, %cst_268 {dimension_numbers = #tpu.dot_dimension_numbers<[1], [0], [0], [1], [0, 0, 1, 1], [], []>} : vector<1x128xbf16>, vector<128x128xbf16>, vector<1x128xf32> -> vector<1x128xf32>
    %c2_269 = arith.constant 2 : index
    %c0_270 = arith.constant 0 : index
    %c0_271 = arith.constant 0 : index
    %312 = vector.load %arg9[%c2_269, %c0_270, %c0_271] : memref<3x1x128xf32, #tpu.memory_space<vmem>>, vector<1x1x128xf32>
    %313 = vector.shape_cast %312 : vector<1x1x128xf32> to vector<1x128xf32>
    %314 = arith.addf %311, %313 : vector<1x128xf32>
    %c0_272 = arith.constant 0 : index
    %c0_273 = arith.constant 0 : index
    %c0_274 = arith.constant 0 : index
    %315 = vector.load %arg10[%c0_272, %c0_273, %c0_274] : memref<1x1x128xf32, #tpu.memory_space<vmem>>, vector<1x1x128xf32>
    %316 = vector.shape_cast %315 : vector<1x1x128xf32> to vector<1x128xf32>
    %317 = vector.shape_cast %314 : vector<1x128xf32> to vector<1x1x128xf32>
    tpu.vector_store %arg10[%c0_272, %c0_273, %c0_274], %317 {strides = array<i32>} : memref<1x1x128xf32, #tpu.memory_space<vmem>>, vector<1x1x128xf32>,
    return
  }
  func.func @transform_0(%arg0: i32) -> (i32, i32, i32) {
    %c0_i32 = arith.constant 0 : i32
    %c0_i32_0 = arith.constant 0 : i32
    %c0_i32_1 = arith.constant 0 : i32
    return %arg0, %c0_i32, %c0_i32_0 : i32, i32, i32
  }
  func.func @transform_1(%arg0: i32) -> (i32, i32, i32, i32) {
    %c0_i32 = arith.constant 0 : i32
    %c0_i32_0 = arith.constant 0 : i32
    %c0_i32_1 = arith.constant 0 : i32
    %c0_i32_2 = arith.constant 0 : i32
    return %arg0, %c0_i32, %c0_i32_0, %c0_i32_1 : i32, i32, i32, i32
  }
  func.func @transform_2(%arg0: i32) -> (i32, i32, i32) {
    %c0_i32 = arith.constant 0 : i32
    %c0_i32_0 = arith.constant 0 : i32
    %c0_i32_1 = arith.constant 0 : i32
    return %arg0, %c0_i32, %c0_i32_0 : i32, i32, i32
  }
  func.func @transform_3(%arg0: i32) -> (i32, i32, i32) {
    %c0_i32 = arith.constant 0 : i32
    %c0_i32_0 = arith.constant 0 : i32
    %c0_i32_1 = arith.constant 0 : i32
    return %arg0, %c0_i32, %c0_i32_0 : i32, i32, i32
  }
  func.func @transform_4(%arg0: i32) -> (i32, i32, i32) {
    %c0_i32 = arith.constant 0 : i32
    %c0_i32_0 = arith.constant 0 : i32
    %c0_i32_1 = arith.constant 0 : i32
    return %arg0, %c0_i32, %c0_i32_0 : i32, i32, i32
  }
  func.func @transform_5(%arg0: i32) -> (i32, i32, i32) {
    %c0_i32 = arith.constant 0 : i32
    %c0_i32_0 = arith.constant 0 : i32
    %c0_i32_1 = arith.constant 0 : i32
    %c0_i32_2 = arith.constant 0 : i32
    return %c0_i32, %c0_i32_0, %c0_i32_1 : i32, i32, i32
  }
  func.func @transform_6(%arg0: i32) -> (i32, i32, i32) {
    %c0_i32 = arith.constant 0 : i32
    %c0_i32_0 = arith.constant 0 : i32
    %c0_i32_1 = arith.constant 0 : i32
    %c0_i32_2 = arith.constant 0 : i32
    return %c0_i32, %c0_i32_0, %c0_i32_1 : i32, i32, i32
  }
  func.func @transform_7(%arg0: i32) -> (i32, i32, i32) {
    %c0_i32 = arith.constant 0 : i32
    %c0_i32_0 = arith.constant 0 : i32
    %c0_i32_1 = arith.constant 0 : i32
    %c0_i32_2 = arith.constant 0 : i32
    return %c0_i32, %c0_i32_0, %c0_i32_1 : i32, i32, i32
  }
  func.func @transform_8(%arg0: i32) -> (i32, i32, i32) {
    %c0_i32 = arith.constant 0 : i32
    %c0_i32_0 = arith.constant 0 : i32
    %c0_i32_1 = arith.constant 0 : i32
    %c0_i32_2 = arith.constant 0 : i32
    return %c0_i32, %c0_i32_0, %c0_i32_1 : i32, i32, i32
  }
  func.func @transform_9(%arg0: i32) -> (i32, i32, i32) {
    %c0_i32 = arith.constant 0 : i32
    %c0_i32_0 = arith.constant 0 : i32
    %c0_i32_1 = arith.constant 0 : i32
    return %arg0, %c0_i32, %c0_i32_0 : i32, i32, i32
  }
}

</mosaic_0001>

<bundles_post_ra>
// kernel: forward.1
= control target key start
LH: loop header
LB: loop body
LE: loop exit
PB: predicated region body
PF: predicated region fallthrough
CT: control target
= control target key end

     0   :  { %s9713_s0 = inlined_call_operand.vmem [shape: f32[4,64,128], index: 0, kind: input, shape index: {}]   ;;  %s9714_s1 = inlined_call_operand.vmem [shape: bf16[4,8,64,64], index: 1, kind: input, shape index: {}]   ;;  %s9715_s2 = inlined_call_operand.vmem [shape: bf16[4,64,64], index: 2, kind: input, shape index: {}]   ;;  %s9716_s3 = inlined_call_operand.vmem [shape: f32[4,64,64], index: 3, kind: input, shape index: {}]   ;;  %s9717_s4 = inlined_call_operand.vmem [shape: f32[4,64,2], index: 4, kind: input, shape index: {}]   ;;  %s9718_s5 = inlined_call_operand.vmem [shape: bf16[4,128,256], index: 5, kind: input, shape index: {}]   ;;  %s9719_s6 = inlined_call_operand.vmem [shape: bf16[16,128,128], index: 6, kind: input, shape index: {}]   ;;  %s9720_s7 = inlined_call_operand.vmem [shape: bf16[3,128,128], index: 7, kind: input, shape index: {}]   ;;  %s9721_s8 = inlined_call_operand.vmem [shape: f32[3,1,128], index: 8, kind: input, shape index: {}]   ;;  %s9722_s9 = inlined_call_operand.hbm [shape: f32[4,1,128], index: 9, kind: output, shape index: {}]  }
   0x1   :  { %9778 = sst [smem:[#allocation25_spill]] %s9713_s0 }
   0x2   :  { %9779 = sst [smem:[#allocation26_spill]] %s9714_s1 }
   0x3   :  { %14 = vsyncpa [#allocation3], 0 }
   0x4   :  { %16 = vsyncpa [#allocation3 + $0x1], 0  ;;  %s7302_s30 = smov 0   ;;  %s7304_s10 = smov 0  }
   0x5   :  { %s7306_s11 = smov 0   ;;  %s7308_s12 = smov 0  }
   0x6 LB: > { %s7323_s13 = sadd.s32 4294967295, %s7247_s12   ;;  %s5170_s14 = sadd.s32 4294967294, %s7247_s12   ;;  %s7247_s12 = sphi %s7308_s12, %s9895_s12   ;;  %s7243_s11 = sphi %s7306_s11, %s9894_s11   ;;  %s7239_s10 = sphi %s7304_s10, %s9893_s10   ;;  %s7235_s30 = sphi %s7302_s30, %s9892_s30  }
   0x7   : > { %s7327_s15 = sadd.s32 1, %s7247_s12   ;;  %s243_s16 = sadd.s32 1, %s7243_s11 }
   0x8   : > { %s240_s17 = ssub.s32 %s7247_s12, %s7327_s15  ;;  %p253_p0 = scmp.ne.s32.totalorder %s7243_s11, %s7239_s10 }
   0x9   : > { %p241_p1 = scmp.eq.s32.totalorder %s240_s17, 0  ;;  %p254_p2 = scmp.eq.s32.totalorder %s7323_s13, 3 }
   0xa   : > { %p259_p3 = scmp.ne.s32.totalorder %s7239_s10, %s7235_s30  ;;  %p260_p4 = scmp.eq.s32.totalorder %s5170_s14, 3 }
   0xb   : > { %s7338_s18 = scalar_select %p241_p1, %s7243_s11, %s243_s16  }
   0xc   : > { %p7340_p5 = por %p254_p2, %p253_p0  ;;  %p7344_p6 = por %p260_p4, %p259_p3 }
   0xd   : > { %p5173_p7 = scmp.ge.s32.totalorder %s7247_s12, 1  ;;  %p330_p8 = scmp.lt.s32.totalorder %s7247_s12, 5 }
   0xf   : > { %p331_p9 = pnand %p5173_p7, %p330_p8 }
  0x11   : > { %334 = sbr.rel (%p331_p9) target bundleno = 3020 (0xbcc), region = 56 }
  0x16   : > { %v5242_v0 = vld [vmem:[%s9718_s5 + $0x70] sm:$0xf]  ;;  %v6772_v1 = vld [vmem:[%s9718_s5 + $0x74] sm:$0xf0]  ;;  %v5234_v2 = vld [vmem:[%s9718_s5 + $0x60] sm:$0xf] }
  0x17   : > { %v5243_v3 = vor.u32 %v6772_v1, %v5242_v0  ;;  %v6770_v4 = vld [vmem:[%s9718_s5 + $0x64] sm:$0xf0]  ;;  %v5226_v6 = vld [vmem:[%s9718_s5 + $0x50] sm:$0xf]  ;;  %v6768_v7 = vld [vmem:[%s9718_s5 + $0x54] sm:$0xf0] }
  0x18   : > { %v5235_v5 = vor.u32 %v6770_v4, %v5234_v2  ;;  %v5227_v8 = vor.u32 %v6768_v7, %v5226_v6  ;;  %v5218_v9 = vld [vmem:[%s9718_s5 + $0x40] sm:$0xf]  ;;  %v6766_v10 = vld [vmem:[%s9718_s5 + $0x44] sm:$0xf0]  ;;  %v5210_v12 = vld [vmem:[%s9718_s5 + $0x30] sm:$0xf] }
  0x19   : > { %543 = vmatpush.bf16.msra.mxu0 %v5243_v3  ;;  %v5219_v11 = vor.u32 %v6766_v10, %v5218_v9  ;;  %v6764_v13 = vld [vmem:[%s9718_s5 + $0x34] sm:$0xf0]  ;;  %p385_p10 = scmp.lt.s32.totalorder %s7323_s13, 3  ;;  %v5202_v15 = vld [vmem:[%s9718_s5 + $0x20] sm:$0xf]  ;;  %s9782_s0 = sld [smem:[#allocation25_spill]] }
  0x1a   : > { %v5211_v14 = vor.u32 %v6764_v13, %v5210_v12  ;;  %v6762_v16 = vld [vmem:[%s9718_s5 + $0x24] sm:$0xf0]  ;;  %v5194_v18 = vld [vmem:[%s9718_s5 + $0x10] sm:$0xf]  ;;  %v6760_v19 = vld [vmem:[%s9718_s5 + $0x14] sm:$0xf0] }
  0x1b   : > { %s7388_s21 = scalar_select %p385_p10, %s7323_s13, 3  ;;  %v5203_v17 = vor.u32 %v6762_v16, %v5202_v15  ;;  %v5195_v20 = vor.u32 %v6760_v19, %v5194_v18  ;;  %v5186_v21 = vld [vmem:[%s9718_s5] sm:$0xf]  ;;  %v6758_v22 = vld [vmem:[%s9718_s5 + $0x4] sm:$0xf0]  ;;  %vm633_vm0 = vcmask 523264  }
  0x1c   : > { %v5187_v23 = vor.u32 %v6758_v22, %v5186_v21  ;;  %v6771_v30 = vld [vmem:[%s9718_s5 + $0x74] sm:$0xf]  ;;  %v5244_v31 = vld [vmem:[%s9718_s5 + $0x78] sm:$0xf0]  ;;  %v6769_v32 = vld [vmem:[%s9718_s5 + $0x64] sm:$0xf] }
  0x1d   : > { %544 = vmatpush.bf16.msra.mxu0 %v5235_v5  ;;  %s7397_s26 = sshll.u32 %s7388_s21, 6  ;;  %v5247_v33 = vor.u32 %v6771_v30, %v5244_v31  ;;  %v5236_v34 = vld [vmem:[%s9718_s5 + $0x68] sm:$0xf0]  ;;  %v6767_v36 = vld [vmem:[%s9718_s5 + $0x54] sm:$0xf]  ;;  %v7249_v5 = vmov 0  }
  0x1e   : > { %v5239_v35 = vor.u32 %v6769_v32, %v5236_v34  ;;  %v5228_v37 = vld [vmem:[%s9718_s5 + $0x58] sm:$0xf0]  ;;  %v6765_v39 = vld [vmem:[%s9718_s5 + $0x44] sm:$0xf]  ;;  %v5220_v40 = vld [vmem:[%s9718_s5 + $0x48] sm:$0xf0]  ;;  %s7517_s27 = scalar_lea.vmem %s9717_s4, %s7397_s26  ;;  %7047 = vset.pattern.permute.xlu0 %v7249_v5  ;;  %7048 = vset.pattern.permute.xlu1 %v7249_v5 }
  0x1f   : > { %s7409_s22 = scalar_lea.vmem %s9782_s0, %s7397_s26  ;;  %572 = vmatpush.bf16.msra.mxu1 %v5247_v33  ;;  %v5231_v38 = vor.u32 %v6767_v36, %v5228_v37  ;;  %v5223_v43 = vor.u32 %v6765_v39, %v5220_v40  ;;  %v6763_v45 = vld [vmem:[%s9718_s5 + $0x34] sm:$0xf]  ;;  %v5212_v46 = vld [vmem:[%s9718_s5 + $0x38] sm:$0xf0]  ;;  %v6761_v48 = vld [vmem:[%s9718_s5 + $0x24] sm:$0xf]  ;;  %7049 = vset.pattern.permute.xlu2 %v7249_v5  ;;  %s5063_s0 = scalar_lea.hbm %s9722_s9, %s7323_s13 }
  0x20   : > { %v7412_v24 = vld [vmem:[%s7409_s22] sm:$0xff]  ;;  %v7415_v25 = vld [vmem:[%s7409_s22 + $0x8] sm:$0xff]  ;;  %v7423_v27 = vld [vmem:[%s7409_s22 + $0x10] sm:$0xff]  ;;  %v5215_v47 = vor.u32 %v6763_v45, %v5212_v46  ;;  %s6749_s28 = sshll.u32 %s7388_s21, 8  ;;  %s9783_s1 = sld [smem:[#allocation26_spill]] }
  0x21   : > { %545 = vmatpush.bf16.msra.mxu0 %v5227_v8  ;;  %v7419_v26 = vpack.c.bf16 %v7415_v25, %v7412_v24  ;;  %v7426_v28 = vld [vmem:[%s7409_s22 + $0x18] sm:$0xff]  ;;  %v7458_v41 = vld [vmem:[%s7409_s22 + $0x20] sm:$0xff]  ;;  %v7461_v42 = vld [vmem:[%s7409_s22 + $0x28] sm:$0xff]  ;;  %s6750_s16 = sshll.u32 %s7388_s21, 5 }
  0x22   : > { %v7430_v29 = vpack.c.bf16 %v7426_v28, %v7423_v27  ;;  %v7465_v44 = vpack.c.bf16 %v7461_v42, %v7458_v41  ;;  %v5204_v49 = vld [vmem:[%s9718_s5 + $0x28] sm:$0xf0]  ;;  %v7481_v51 = vld [vmem:[%s7409_s22 + $0x30] sm:$0xff]  ;;  %v7484_v52 = vld [vmem:[%s7409_s22 + $0x38] sm:$0xff]  ;;  %s7614_s23 = scalar_lea.vmem %s9715_s2, %s6750_s16 }
  0x23   : > { %573 = vmatpush.bf16.msra.mxu1 %v5239_v35  ;;  %v5207_v50 = vor.u32 %v6761_v48, %v5204_v49  ;;  %v7488_v53 = vpack.c.bf16 %v7484_v52, %v7481_v51  ;;  %v6759_v54 = vld [vmem:[%s9718_s5 + $0x14] sm:$0xf]  ;;  %v5196_v55 = vld [vmem:[%s9718_s5 + $0x18] sm:$0xf0]  ;;  %v6757_v56 = vld [vmem:[%s9718_s5 + $0x4] sm:$0xf] }
  0x24   : > { %v5199_v57 = vor.u32 %v6759_v54, %v5196_v55  ;;  %v5188_v58 = vld [vmem:[%s9718_s5 + $0x8] sm:$0xf0]  ;;  %v7522_v6 = vld [vmem:[%s7517_s27] sm:$0xff]  ;;  %v7540_v10 = vld [vmem:[%s7517_s27 + $0x10] sm:$0xff] }
  0x25   : > { %546 = vmatpush.bf16.msra.mxu0 %v5219_v11  ;;  %v5191_v59 = vor.u32 %v6757_v56, %v5188_v58  ;;  %1300 = vperm.xlu0 %7047, %v7522_v6   ;;  %v7532_v9 = vld [vmem:[%s7517_s27 + $0x8] sm:$0xff]  ;;  %v7558_v16 = vld [vmem:[%s7517_s27 + $0x18] sm:$0xff]  ;;  %v7583_v31 = vld [vmem:[%s7517_s27 + $0x20] sm:$0xff] }
  0x26   : > { %s7537_s14 = scalar_lea.vmem %s9783_s1, %s6749_s28  ;;  %1310 = vperm.xlu1 %7048, %v7540_v10   ;;  %v7586_v32 = vld [vmem:[%s7517_s27 + $0x38] sm:$0xff]  ;;  %v7589_v33 = vld [vmem:[%s7517_s27 + $0x30] sm:$0xff]  ;;  %1320 = vperm.xlu2 %7049, %v7583_v31   ;;  %v7595_v34 = vld [vmem:[%s7517_s27 + $0x28] sm:$0xff]  ;;  %s7621_s27 = scalar_lea.vmem %s9716_s3, %s7397_s26 }
  0x27   : > { %574 = vmatpush.bf16.msra.mxu1 %v5231_v38  ;;  %v6773_v12 = vld [vmem:[%s7537_s14] sm:$0xff]  ;;  %v6774_v18 = vld [vmem:[%s7537_s14 + $0x8] sm:$0xff]  ;;  %v6779_v21 = vld [vmem:[%s7537_s14 + $0x30] sm:$0xff]  ;;  %s5067_s1 = sshll.u32 %s5063_s0, 4  ;;  %s7205_s28 = scalar_lea.hbm %s9722_s9, 4  ;;  %s5068_s1 = int_to_ptr.hbm [resolvable:$true] %s5067_s1 }
  0x28   : > { %v6777_v13 = vld [vmem:[%s7537_s14 + $0x20] sm:$0xff]  ;;  %v6790_v19 = vld [vmem:[%s7537_s14 + $0x88] sm:$0xff]  ;;  %v6775_v22 = vld [vmem:[%s7537_s14 + $0x10] sm:$0xff] }
  0x29   : > { %547 = vmatpush.bf16.msra.mxu0 %v5211_v14  ;;  %v6789_v14 = vld [vmem:[%s7537_s14 + $0x80] sm:$0xff]  ;;  %v6795_v30 = vld [vmem:[%s7537_s14 + $0xb0] sm:$0xff]  ;;  %v6780_v35 = vld [vmem:[%s7537_s14 + $0x38] sm:$0xff] }
  0x2a   : > { %v6793_v15 = vld [vmem:[%s7537_s14 + $0xa0] sm:$0xff]  ;;  %v6776_v36 = vld [vmem:[%s7537_s14 + $0x18] sm:$0xff]  ;;  %v428_v49 = vld [vmem:[%s7621_s27 + $0x8] sm:$0xff] }
  0x2b   : > { %575 = vmatpush.bf16.msra.mxu1 %v5223_v43  ;;  %v6792_v37 = vld [vmem:[%s7537_s14 + $0x98] sm:$0xff]  ;;  %v6785_v43 = vld [vmem:[%s7537_s14 + $0x60] sm:$0xff]  ;;  %v6782_v55 = vld [vmem:[%s7537_s14 + $0x48] sm:$0xff] }
  0x2c   : > { %v6796_v38 = vld [vmem:[%s7537_s14 + $0xb8] sm:$0xff]  ;;  %v6781_v45 = vld [vmem:[%s7537_s14 + $0x40] sm:$0xff]  ;;  %v6754_v56 = vld [vmem:[%s7614_s23 + $0x8] sm:$0xff] }
  0x2d   : > { %548 = vmatpush.bf16.msra.mxu0 %v5203_v17  ;;  %1305 = vperm.xlu0 %7047, %v7532_v9   ;;  %v6778_v17 = vld [vmem:[%s7537_s14 + $0x28] sm:$0xff]  ;;  %v6753_v46 = vld [vmem:[%s7614_s23] sm:$0xff]  ;;  %v6756_v5 = vld [vmem:[%s7614_s23 + $0x18] sm:$0xff] }
  0x2e   : > { %1315 = vperm.xlu1 %7048, %v7558_v16   ;;  %1325 = vperm.xlu2 %7049, %v7595_v34  }
  0x2f   : > { %576 = vmatpush.bf16.msra.mxu1 %v5215_v47  ;;  %v427_v47 = vld [vmem:[%s7621_s27] sm:$0xff] }
  0x31   : > { %549 = vmatpush.bf16.msra.mxu0 %v5195_v20  ;;  %v6794_v20 = vld [vmem:[%s7537_s14 + $0xa8] sm:$0xff] }
  0x33   : > { %577 = vmatpush.bf16.msra.mxu1 %v5207_v50  ;;  %v6786_v50 = vld [vmem:[%s7537_s14 + $0x68] sm:$0xff] }
  0x35   : > { %550 = vmatpush.bf16.msra.mxu0 %v5187_v23  ;;  %v6791_v23 = vld [vmem:[%s7537_s14 + $0x90] sm:$0xff]  ;;  %1330 = vperm.xlu0 %7047, %v7589_v33  }
  0x36   : > { %1335 = vperm.xlu1 %7048, %v7586_v32  }
  0x37   : > { %578 = vmatpush.bf16.msra.mxu1 %v5199_v57  ;;  %v429_v57 = vld [vmem:[%s7621_s27 + $0x10] sm:$0xff] }
  0x38   : > { %551 = vmatmul.bf16.vlgmr.msra.gmra.mxu0 %v7419_v26 }
  0x3b   : > { %579 = vmatpush.bf16.msra.mxu1 %v5191_v59  ;;  %v430_v59 = vld [vmem:[%s7621_s27 + $0x18] sm:$0xff] }
  0x3e   : > { %580 = vmatmul.bf16.vlgmr.msra.gmra.mxu1 %v7419_v26 }
  0x48   : > { %556 = vmatmul.bf16.gmra.mxu0 %v7430_v29 }
  0x4e   : > { %585 = vmatmul.bf16.gmra.mxu1 %v7430_v29 }
  0x58   : > { %561 = vmatmul.bf16.gmra.mxu0 %v7465_v44 }
  0x5e   : > { %590 = vmatmul.bf16.gmra.mxu1 %v7465_v44 }
  0x68   : > { %566 = vmatmul.bf16.gmra.mxu0 %v7488_v53 }
  0x6e   : > { %595 = vmatmul.bf16.gmra.mxu1 %v7488_v53 }
  0xb5   : > { %v7505_v60 = vpop.f32.mrf.mxu0 }
  0xbb   : > { %v7602_v39 = vpop.f32.mrf.mxu1 }
  0xbd   : > { %v7507_v61 = vpop.f32.mrf.mxu0 }
  0xbe   : > { %v601_v11 = vpack.c.bf16 %v7507_v61, %v7505_v60 }
  0xc3   : > { %v7609_v40 = vpop.f32.mrf.mxu1 }
  0xc5   : > { %v7510_v62 = vpop.f32.mrf.mxu0 }
  0xcb   : > { %v7630_v48 = vpop.f32.mrf.mxu1 }
  0xcd   : > { %v559_v63 = vpop.f32.mrf.mxu0 }
  0xce   : > { %v602_v8 = vpack.c.bf16 %v559_v63, %v7510_v62 }
  0xd3   : > { %v7635_v54 = vpop.f32.mrf.mxu1 }
  0xd5   : > { %v562_v0 = vpop.f32.mrf.mxu0 }
  0xdb   : > { %v7644_v58 = vpop.f32.mrf.mxu1 }
  0xdd   : > { %v564_v1 = vpop.f32.mrf.mxu0 }
  0xde   : > { %v603_v7 = vpack.c.bf16 %v564_v1, %v562_v0 }
  0xe5   : > { %v567_v2 = vpop.f32.mrf.mxu0 }
  0xed   : > { %v569_v3 = vpop.f32.mrf.mxu0 }
  0xee   : > { %v7519_v4 = vpack.c.bf16 %v569_v3, %v567_v2 }
  0xf0   : > { %650 = vmatpush.bf16.msra.mxu2 %v7519_v4  ;;  %720 = vmatpush.bf16.msra.mxu3 %v7519_v4 }
  0xf1   : > { %954 = vmatpush.bf16.msrb.mxu0 %v7519_v4  ;;  %1032 = vmatpush.bf16.msrb.mxu1 %v7519_v4 }
  0xf4   : > { %651 = vmatpush.bf16.msra.mxu2 %v603_v7  ;;  %721 = vmatpush.bf16.msra.mxu3 %v603_v7 }
  0xf5   : > { %955 = vmatpush.bf16.msrb.mxu0 %v603_v7  ;;  %1033 = vmatpush.bf16.msrb.mxu1 %v603_v7 }
  0xf8   : > { %652 = vmatpush.bf16.msra.mxu2 %v602_v8  ;;  %722 = vmatpush.bf16.msra.mxu3 %v602_v8 }
  0xf9   : > { %956 = vmatpush.bf16.msrb.mxu0 %v602_v8  ;;  %1034 = vmatpush.bf16.msrb.mxu1 %v602_v8 }
  0xfc   : > { %653 = vmatpush.bf16.msra.mxu2 %v601_v11  ;;  %723 = vmatpush.bf16.msra.mxu3 %v601_v11 }
  0xfd   : > { %957 = vmatpush.bf16.msrb.mxu0 %v601_v11  ;;  %1035 = vmatpush.bf16.msrb.mxu1 %v601_v11 }
  0xff   : > { %5264 = vmatmul.msk.bf16.vlgmr.msra.gmra.mxu2 %vm633_vm0, %v6773_v12  ;;  %5292 = vmatmul.msk.bf16.vlgmr.msra.gmra.mxu3 %vm633_vm0, %v6777_v13  ;;  %v6801_v12 = vld [vmem:[%s7537_s14 + $0xe0] sm:$0xff] }
 0x100   : > { %798 = vmatpush.bf16.msrb.mxu2 %v7519_v4  ;;  %876 = vmatpush.bf16.msrb.mxu3 %v7519_v4  ;;  %v6797_v13 = vld [vmem:[%s7537_s14 + $0xc0] sm:$0xff] }
 0x101   : > { %1265 = vmatpush.bf16.msra.mxu0 %v7519_v4  ;;  %1378 = vmatpush.msra.mxu1 %v569_v3  ;;  %v6788_v3 = vld [vmem:[%s7537_s14 + $0x78] sm:$0xff] }
 0x102   : > { %5376 = vmatmul.msk.bf16.vlgmr.msrb.gmra.mxu0 %vm633_vm0, %v6789_v14  ;;  %5404 = vmatmul.msk.bf16.vlgmr.msrb.gmra.mxu1 %vm633_vm0, %v6793_v15 }
 0x103   : > { %1379 = vmatpush.msra.mxu1 %v567_v2 }
 0x104   : > { %799 = vmatpush.bf16.msrb.mxu2 %v603_v7  ;;  %877 = vmatpush.bf16.msrb.mxu3 %v603_v7 }
 0x105   : > { %1266 = vmatpush.bf16.msra.mxu0 %v603_v7  ;;  %1380 = vmatpush.msra.mxu1 %v564_v1  ;;  %v432_v1 = vld [vmem:[%s7621_s27 + $0x28] sm:$0xff] }
 0x107   : > { %1381 = vmatpush.msra.mxu1 %v562_v0  ;;  %v7653_v0 = vpop.f32.mrf.mxu1 }
 0x108   : > { %800 = vmatpush.bf16.msrb.mxu2 %v602_v8  ;;  %878 = vmatpush.bf16.msrb.mxu3 %v602_v8 }
 0x109   : > { %1267 = vmatpush.bf16.msra.mxu0 %v602_v8  ;;  %1382 = vmatpush.msra.mxu1 %v559_v63  ;;  %v431_v63 = vld [vmem:[%s7621_s27 + $0x20] sm:$0xff] }
 0x10b   : > { %1383 = vmatpush.msra.mxu1 %v7510_v62  ;;  %v6755_v62 = vld [vmem:[%s7614_s23 + $0x10] sm:$0xff] }
 0x10c   : > { %801 = vmatpush.bf16.msrb.mxu2 %v601_v11  ;;  %879 = vmatpush.bf16.msrb.mxu3 %v601_v11 }
 0x10d   : > { %1268 = vmatpush.bf16.msra.mxu0 %v601_v11  ;;  %1384 = vmatpush.msra.mxu1 %v7507_v61  ;;  %v6783_v61 = vld [vmem:[%s7537_s14 + $0x50] sm:$0xff] }
 0x10f   : > { %1385 = vmatpush.msra.mxu1 %v7505_v60  ;;  %5293 = vmatmul.msk.bf16.gmra.mxu3 %vm633_vm0, %v6778_v17  ;;  %v6787_v60 = vld [vmem:[%s7537_s14 + $0x70] sm:$0xff]  ;;  %v7660_v2 = vpop.f32.mrf.mxu1 }
 0x110   : > { %1110 = vmatpush.bf16.msra.mxu2 %v7519_v4  ;;  %1188 = vmatpush.bf16.msra.mxu3 %v7519_v4  ;;  %v6784_v4 = vld [vmem:[%s7537_s14 + $0x58] sm:$0xff] }
 0x111   : > { %5265 = vmatmul.msk.bf16.gmra.mxu2 %vm633_vm0, %v6774_v18 }
 0x112   : > { %5377 = vmatmul.msk.bf16.gmra.mxu0 %vm633_vm0, %v6790_v19  ;;  %5405 = vmatmul.msk.bf16.gmra.mxu1 %vm633_vm0, %v6794_v20 }
 0x114   : > { %1111 = vmatpush.bf16.msra.mxu2 %v603_v7  ;;  %1189 = vmatpush.bf16.msra.mxu3 %v603_v7  ;;  %v433_v7 = vld [vmem:[%s7621_s27 + $0x30] sm:$0xff] }
 0x118   : > { %1112 = vmatpush.bf16.msra.mxu2 %v602_v8  ;;  %1190 = vmatpush.bf16.msra.mxu3 %v602_v8  ;;  %v7670_v8 = vpop.f32.mrf.mxu1 }
 0x11c   : > { %1113 = vmatpush.bf16.msra.mxu2 %v601_v11  ;;  %1191 = vmatpush.bf16.msra.mxu3 %v601_v11  ;;  %v434_v11 = vld [vmem:[%s7621_s27 + $0x38] sm:$0xff] }
 0x11f   : > { %5294 = vmatmul.msk.bf16.gmra.mxu3 %vm633_vm0, %v6779_v21 }
 0x121   : > { %5266 = vmatmul.msk.bf16.gmra.mxu2 %vm633_vm0, %v6775_v22 }
 0x122   : > { %5378 = vmatmul.msk.bf16.gmra.mxu0 %vm633_vm0, %v6791_v23  ;;  %5406 = vmatmul.msk.bf16.gmra.mxu1 %vm633_vm0, %v6795_v30  ;;  %v6820_v30 = vld [vmem:[%s9719_s6 + $0x78] sm:$0xff] }
 0x12f   : > { %5295 = vmatmul.msk.bf16.gmra.mxu3 %vm633_vm0, %v6780_v35  ;;  %v6812_v35 = vld [vmem:[%s9719_s6 + $0x38] sm:$0xff] }
 0x131   : > { %5267 = vmatmul.msk.bf16.gmra.mxu2 %vm633_vm0, %v6776_v36 }
 0x132   : > { %5379 = vmatmul.msk.bf16.gmra.mxu0 %vm633_vm0, %v6792_v37  ;;  %5407 = vmatmul.msk.bf16.gmra.mxu1 %vm633_vm0, %v6796_v38  ;;  %v6802_v37 = vld [vmem:[%s7537_s14 + $0xe8] sm:$0xff] }
 0x133   : > { %v6798_v38 = vld [vmem:[%s7537_s14 + $0xc8] sm:$0xff] }
 0x13f   : > { %5348 = vmatmul.msk.bf16.vlgmr.msrb.gmra.mxu3 %vm633_vm0, %v6785_v43  ;;  %v6836_v43 = vld [vmem:[%s9719_s6 + $0xf8] sm:$0xff] }
 0x140   : > { %1581 = vmatpush.bf16.msrb.mxu3 %v6812_v35  ;;  %1785 = vmatpush.bf16.msrb.mxu1 %v6836_v43  ;;  %v6799_v35 = vld [vmem:[%s7537_s14 + $0xd0] sm:$0xff] }
 0x141   : > { %5320 = vmatmul.msk.bf16.vlgmr.msrb.gmra.mxu2 %vm633_vm0, %v6781_v45 }
 0x142   : > { %5480 = vmatmul.msk.bf16.vlgmr.msra.gmra.mxu0 %vm633_vm0, %v6753_v46  ;;  %5484 = vmatmul.msk.f32.vlgmr.msra.gmra.mxu1 %vm633_vm0, %v427_v47  ;;  %v6819_v47 = vld [vmem:[%s9719_s6 + $0x70] sm:$0xff] }
 0x143   : > { %1504 = vmatpush.bf16.msrb.mxu2 %v6820_v30  ;;  %v1291_v30 = vsub.f32 %v7609_v40, %v7415_v25 }
 0x147   : > { %1505 = vmatpush.bf16.msrb.mxu2 %v6819_v47  ;;  %v6815_v47 = vld [vmem:[%s9719_s6 + $0x50] sm:$0xff] }
 0x14a   : > { %5485 = vmatmul.msk.f32.gmra.mxu1 %vm633_vm0, %v428_v49  ;;  %v6811_v49 = vld [vmem:[%s9719_s6 + $0x30] sm:$0xff] }
 0x14b   : > { %1582 = vmatpush.bf16.msrb.mxu3 %v6811_v49  ;;  %v6807_v49 = vld [vmem:[%s9719_s6 + $0x10] sm:$0xff] }
 0x14f   : > { %5349 = vmatmul.msk.bf16.gmra.mxu3 %vm633_vm0, %v6786_v50  ;;  %v6835_v50 = vld [vmem:[%s9719_s6 + $0xf0] sm:$0xff] }
 0x150   : > { %1786 = vmatpush.bf16.msrb.mxu1 %v6835_v50  ;;  %v6831_v50 = vld [vmem:[%s9719_s6 + $0xd0] sm:$0xff] }
 0x151   : > { %5321 = vmatmul.msk.bf16.gmra.mxu2 %vm633_vm0, %v6782_v55 }
 0x152   : > { %5481 = vmatmul.msk.bf16.gmra.mxu0 %vm633_vm0, %v6754_v56  ;;  %5486 = vmatmul.msk.f32.gmra.mxu1 %vm633_vm0, %v429_v57  ;;  %v6818_v56 = vld [vmem:[%s9719_s6 + $0x68] sm:$0xff] }
 0x153   : > { %v6810_v57 = vld [vmem:[%s9719_s6 + $0x28] sm:$0xff]  ;;  %1506 = vmatpush.bf16.msrb.mxu2 %v6818_v56 }
 0x154   : > { %1583 = vmatpush.bf16.msrb.mxu3 %v6810_v57  ;;  %v6814_v57 = vld [vmem:[%s9719_s6 + $0x48] sm:$0xff] }
 0x15a   : > { %5487 = vmatmul.msk.f32.gmra.mxu1 %vm633_vm0, %v430_v59 }
 0x15f   : > { %5350 = vmatmul.msk.bf16.gmra.mxu3 %vm633_vm0, %v6787_v60 }
 0x161   : > { %5322 = vmatmul.msk.bf16.gmra.mxu2 %vm633_vm0, %v6783_v61  ;;  %v6834_v61 = vld [vmem:[%s9719_s6 + $0xe8] sm:$0xff] }
 0x162   : > { %5482 = vmatmul.msk.bf16.gmra.mxu0 %vm633_vm0, %v6755_v62  ;;  %5488 = vmatmul.msk.f32.gmra.mxu1 %vm633_vm0, %v431_v63 }
 0x163   : > { %1787 = vmatpush.bf16.msrb.mxu1 %v6834_v61  ;;  %v6806_v61 = vld [vmem:[%s9719_s6 + $0x8] sm:$0xff] }
 0x16a   : > { %5489 = vmatmul.msk.f32.gmra.mxu1 %vm633_vm0, %v432_v1  ;;  %v6817_v1 = vld [vmem:[%s9719_s6 + $0x60] sm:$0xff] }
 0x16b   : > { %1507 = vmatpush.bf16.msrb.mxu2 %v6817_v1 }
 0x16f   : > { %5351 = vmatmul.msk.bf16.gmra.mxu3 %vm633_vm0, %v6788_v3  ;;  %v6809_v3 = vld [vmem:[%s9719_s6 + $0x20] sm:$0xff] }
 0x170   : > { %1584 = vmatpush.bf16.msrb.mxu3 %v6809_v3  ;;  %v7842_v3 = vpop.permute.xlu0 %1300 }
 0x171   : > { %5323 = vmatmul.msk.bf16.gmra.mxu2 %vm633_vm0, %v6784_v4  ;;  %v6833_v4 = vld [vmem:[%s9719_s6 + $0xe0] sm:$0xff]  ;;  %9797 = vst [vmem:[#allocation18_spill] sm:$0xff] %v7842_v3 }
 0x172   : > { %5483 = vmatmul.msk.bf16.gmra.mxu0 %vm633_vm0, %v6756_v5  ;;  %5490 = vmatmul.msk.f32.gmra.mxu1 %vm633_vm0, %v433_v7  ;;  %v6816_v7 = vld [vmem:[%s9719_s6 + $0x58] sm:$0xff] }
 0x173   : > { %1788 = vmatpush.bf16.msrb.mxu1 %v6833_v4  ;;  %1508 = vmatpush.bf16.msrb.mxu2 %v6816_v7  ;;  %v6830_v4 = vld [vmem:[%s9719_s6 + $0xc8] sm:$0xff] }
 0x177   : > { %1509 = vmatpush.bf16.msrb.mxu2 %v6815_v47 }
 0x17a   : > { %5491 = vmatmul.msk.f32.gmra.mxu1 %vm633_vm0, %v434_v11  ;;  %v6808_v11 = vld [vmem:[%s9719_s6 + $0x18] sm:$0xff] }
 0x17b   : > { %1585 = vmatpush.bf16.msrb.mxu3 %v6808_v11  ;;  %1510 = vmatpush.bf16.msrb.mxu2 %v6814_v57 }
 0x17f   : > { %v7676_v14 = vpop.f32.mrf.mxu0  ;;  %v7678_v15 = vpop.f32.mrf.mxu1  ;;  %5460 = vmatmul.msk.bf16.vlgmr.msra.gmra.mxu3 %vm633_vm0, %v6801_v12 }
 0x180   : > { %1586 = vmatpush.bf16.msrb.mxu3 %v6807_v49 }
 0x181   : > { %5432 = vmatmul.msk.bf16.vlgmr.msra.gmra.mxu2 %vm633_vm0, %v6797_v13  ;;  %v6803_v13 = vld [vmem:[%s7537_s14 + $0xf0] sm:$0xff] }
 0x182   : > { %v7682_v17 = vpop.f32.mrf.mxu2  ;;  %v7684_v18 = vpop.f32.mrf.mxu3 }
 0x184   : > { %1587 = vmatpush.bf16.msrb.mxu3 %v6806_v61  ;;  %v7822_v61 = vld [vmem:[%s7537_s14 + $0xd8] sm:$0xff] }
 0x185   : > { %9792 = vst [vmem:[#allocation13_spill] sm:$0xff] %v7822_v61 }
 0x187   : > { %v7688_v20 = vpop.f32.mrf.mxu0  ;;  %v7690_v21 = vpop.f32.mrf.mxu1 }
 0x18a   : > { %v7692_v22 = vpop.f32.mrf.mxu2  ;;  %v7694_v23 = vpop.f32.mrf.mxu3 }
 0x18f   : > { %v7709_v45 = vpop.f32.mrf.mxu0  ;;  %v7711_v46 = vpop.f32.mrf.mxu1  ;;  %5461 = vmatmul.msk.bf16.gmra.mxu3 %vm633_vm0, %v6802_v37  ;;  %v6832_v37 = vld [vmem:[%s9719_s6 + $0xd8] sm:$0xff] }
 0x190   : > { %1789 = vmatpush.bf16.msrb.mxu1 %v6832_v37  ;;  %v6829_v37 = vld [vmem:[%s9719_s6 + $0xc0] sm:$0xff] }
 0x191   : > { %5433 = vmatmul.msk.bf16.gmra.mxu2 %vm633_vm0, %v6798_v38 }
 0x192   : > { %v7724_v55 = vpop.f32.mrf.mxu3 }
 0x194   : > { %v7732_v59 = vpop.f32.mrf.mxu2  ;;  %1790 = vmatpush.bf16.msrb.mxu1 %v6831_v50  ;;  %v7817_v50 = vld [vmem:[%s7537_s14 + $0xf8] sm:$0xff] }
 0x195   : > { %9791 = vst [vmem:[#allocation12_spill] sm:$0xff] %v7817_v50 }
 0x197   : > { %v7739_v62 = vpop.f32.mrf.mxu0  ;;  %v7741_v63 = vpop.f32.mrf.mxu1 }
 0x198   : > { %9784 = vst [vmem:[#allocation5_spill] sm:$0xff] %v7741_v63  ;;  %1791 = vmatpush.bf16.msrb.mxu1 %v6830_v4 }
 0x19a   : > { %v7752_v5 = vpop.f32.mrf.mxu3 }
 0x19c   : > { %v7760_v12 = vpop.f32.mrf.mxu2  ;;  %1792 = vmatpush.bf16.msrb.mxu1 %v6829_v37 }
 0x19f   : > { %v7769_v38 = vpop.f32.mrf.mxu0  ;;  %v7771_v43 = vpop.f32.mrf.mxu1  ;;  %5462 = vmatmul.msk.bf16.gmra.mxu3 %vm633_vm0, %v6803_v13  ;;  %v6813_v13 = vld [vmem:[%s9719_s6 + $0x40] sm:$0xff] }
 0x1a0   : > { %9785 = vst [vmem:[#allocation6_spill] sm:$0xff] %v7769_v38  ;;  %1511 = vmatpush.bf16.msrb.mxu2 %v6813_v13 }
 0x1a1   : > { %9786 = vst [vmem:[#allocation7_spill] sm:$0xff] %v7771_v43  ;;  %5434 = vmatmul.msk.bf16.gmra.mxu2 %vm633_vm0, %v6799_v35  ;;  %v6805_v35 = vld [vmem:[%s9719_s6] sm:$0xff] }
 0x1a2   : > { %v7784_v56 = vpop.f32.mrf.mxu3  ;;  %1588 = vmatpush.bf16.msrb.mxu3 %v6805_v35 }
 0x1a4   : > { %v7792_v1 = vpop.f32.mrf.mxu2 }
 0x1a7   : > { %v7799_v7 = vpop.f32.mrf.mxu0  ;;  %v7801_v11 = vpop.f32.mrf.mxu1 }
 0x1a8   : > { %9787 = vst [vmem:[#allocation8_spill] sm:$0xff] %v7799_v7 }
 0x1a9   : > { %9788 = vst [vmem:[#allocation9_spill] sm:$0xff] %v7801_v11 }
 0x1aa   : > { %v7812_v47 = vpop.f32.mrf.mxu3 }
 0x1ab   : > { %9789 = vst [vmem:[#allocation10_spill] sm:$0xff] %v7812_v47 }
 0x1ac   : > { %v7814_v49 = vpop.f32.mrf.mxu2 }
 0x1ad   : > { %9790 = vst [vmem:[#allocation11_spill] sm:$0xff] %v7814_v49 }
 0x1af   : > { %v7824_v4 = vpop.f32.mrf.mxu0  ;;  %v7826_v35 = vpop.f32.mrf.mxu1  ;;  %5463 = vmatmul.msk.bf16.gmra.mxu3 %vm633_vm0, %v7817_v50  ;;  %v9800_v50 = vmax.f32 %v7682_v17, %v7684_v18 }
 0x1b0   : > { %9793 = vst [vmem:[#allocation14_spill] sm:$0xff] %v7824_v4  ;;  %v1290_v4 = vsub.f32 %v7602_v39, %v7412_v24 }
 0x1b1   : > { %9794 = vst [vmem:[#allocation15_spill] sm:$0xff] %v7826_v35  ;;  %5435 = vmatmul.msk.bf16.gmra.mxu2 %vm633_vm0, %v7822_v61 }
 0x1b2   : > { %v7832_v13 = vpop.f32.mrf.mxu3  ;;  %v1338_v11 = vmul.f32 %v7842_v3, %v1290_v4  ;;  %v7870_v4 = vpop.permute.xlu1 %1310 }
 0x1b4   : > { %v7834_v37 = vpop.f32.mrf.mxu2 }
 0x1b7   : > { %v7838_v57 = vpop.f32.mrf.mxu0  ;;  %v7840_v36 = vpop.f32.mrf.mxu1 }
 0x1b8   : > { %9795 = vst [vmem:[#allocation16_spill] sm:$0xff] %v7838_v57 }
 0x1b9   : > { %9796 = vst [vmem:[#allocation17_spill] sm:$0xff] %v7840_v36  ;;  %v7855_v36 = vpop.permute.xlu0 %1305 }
 0x1ba   : > { %v7844_v60 = vpop.f32.mrf.mxu3  ;;  %v1339_v24 = vmul.f32 %v7855_v36, %v1291_v30 }
 0x1bb   : > { %9798 = vst [vmem:[#allocation19_spill] sm:$0xff] %v7844_v60 }
 0x1bc   : > { %v7846_v19 = vpop.f32.mrf.mxu2 }
 0x1bd   : > { %9799 = vst [vmem:[#allocation20_spill] sm:$0xff] %v7846_v19 }
 0x1bf   : > { %v1270_v61 = vpop.f32.mrf.mxu0  ;;  %v1387_v35 = vpop.f32.mrf.mxu1  ;;  %1589 = vmatmul.bf16.vlgmr.msrb.gmra.mxu3 %v7419_v26 }
 0x1c0   : > { %v1388_v19 = vadd.f32 %v1387_v35, %v1338_v11  ;;  %v1271_v38 = vadd.f32 %v1270_v61, %v7602_v39  ;;  %v1292_v61 = vsub.f32 %v7630_v48, %v7423_v27  ;;  %v6828_v27 = vld [vmem:[%s9719_s6 + $0xb8] sm:$0xff] }
 0x1c1   : > { %1679 = vmatpush.bf16.msrb.mxu0 %v6828_v27 }
 0x1c2   : > { %v7857_v57 = vpop.f32.mrf.mxu3  ;;  %v1411_v3 = vand.u32 2147483647, %v1388_v19  ;;  %v7881_v19 = vpop.permute.xlu1 %1315 }
 0x1c3   : > { %9801 = vst [vmem:[#allocation21_spill] sm:$0xff] %v7881_v19 }
 0x1c4   : > { %v803_v43 = vpop.f32.mrf.mxu2 }
 0x1c5   : > { %v7863_v60 = vmax.f32 %v9800_v50, %v803_v43 }
 0x1c7   : > { %v1272_v7 = vpop.f32.mrf.mxu0  ;;  %v1390_v25 = vpop.f32.mrf.mxu1 }
 0x1c8   : > { %v1273_v47 = vadd.f32 %v1272_v7, %v7609_v40  ;;  %v1391_v49 = vadd.f32 %v1390_v25, %v1339_v24  ;;  %v1293_v7 = vsub.f32 %v7635_v54, %v7426_v28 }
 0x1ca   : > { %v1435_v63 = vpack.c.bf16 %v1273_v47, %v1271_v38  ;;  %v1412_v17 = vand.u32 2147483647, %v1391_v49  ;;  %v7872_v18 = vpop.f32.mrf.mxu3  ;;  %v9802_v47 = vmax.f32 %v7732_v59, %v7724_v55  ;;  %v1341_v35 = vmul.f32 %v7881_v19, %v1293_v7  ;;  %v7899_v59 = vpop.permute.xlu2 %1320 }
 0x1cb   : > { %9803 = vst [vmem:[#allocation22_spill] sm:$0xff] %v7899_v59 }
 0x1cc   : > { %v1716_v43 = vpack.c.bf16 %v1412_v17, %v1411_v3  ;;  %1512 = vmatmul.bf16.vlgmr.msrb.gmra.mxu2 %v1435_v63  ;;  %v7874_v30 = vpop.f32.mrf.mxu2  ;;  %v1340_v3 = vmul.f32 %v7870_v4, %v1292_v61  ;;  %v6827_v61 = vld [vmem:[%s9719_s6 + $0xb0] sm:$0xff] }
 0x1cd   : > { %1680 = vmatpush.bf16.msrb.mxu0 %v6827_v61 }
 0x1ce   : > { %1793 = vmatmul.bf16.vlgmr.msrb.gmra.mxu1 %v1716_v43 }
 0x1cf   : > { %v1275_v11 = vpop.f32.mrf.mxu0  ;;  %v1393_v50 = vpop.f32.mrf.mxu1  ;;  %1594 = vmatmul.bf16.gmra.mxu3 %v7430_v29 }
 0x1d0   : > { %v1394_v29 = vadd.f32 %v1393_v50, %v1340_v3  ;;  %v1276_v17 = vadd.f32 %v1275_v11, %v7630_v48  ;;  %v6826_v11 = vld [vmem:[%s9719_s6 + $0xa8] sm:$0xff] }
 0x1d1   : > { %1681 = vmatpush.bf16.msrb.mxu0 %v6826_v11 }
 0x1d2   : > { %v7883_v38 = vpop.f32.mrf.mxu3  ;;  %v1413_v50 = vand.u32 2147483647, %v1394_v29  ;;  %v1294_v29 = vsub.f32 %v7644_v58, %v7458_v41  ;;  %v9805_v41 = vmax.f32 %v7792_v1, %v7784_v56  ;;  %v6823_v1 = vld [vmem:[%s9719_s6 + $0x90] sm:$0xff] }
 0x1d4   : > { %v808_v63 = vpop.f32.mrf.mxu2  ;;  %v1342_v61 = vmul.f32 %v7899_v59, %v1294_v29 }
 0x1d5   : > { %v7889_v49 = vmax.f32 %v9802_v47, %v808_v63 }
 0x1d7   : > { %v1277_v24 = vpop.f32.mrf.mxu0  ;;  %v1396_v25 = vpop.f32.mrf.mxu1 }
 0x1d8   : > { %v1278_v43 = vadd.f32 %v1277_v24, %v7635_v54  ;;  %v1397_v55 = vadd.f32 %v1396_v25, %v1341_v35  ;;  %v6825_v25 = vld [vmem:[%s9719_s6 + $0xa0] sm:$0xff] }
 0x1d9   : > { %1682 = vmatpush.bf16.msrb.mxu0 %v6825_v25 }
 0x1da   : > { %v1436_v3 = vpack.c.bf16 %v1278_v43, %v1276_v17  ;;  %v1414_v7 = vand.u32 2147483647, %v1397_v55  ;;  %v7904_v63 = vpop.f32.mrf.mxu3  ;;  %v1295_v17 = vsub.f32 %v7653_v0, %v7461_v42  ;;  %v7919_v43 = vpop.permute.xlu2 %1325 }
 0x1db   : > { %9804 = vst [vmem:[#allocation23_spill] sm:$0xff] %v7919_v43 }
 0x1dc   : > { %1517 = vmatmul.bf16.gmra.mxu2 %v1436_v3  ;;  %v7906_v47 = vpop.f32.mrf.mxu2  ;;  %v1717_v27 = vpack.c.bf16 %v1414_v7, %v1413_v50  ;;  %v1343_v42 = vmul.f32 %v7919_v43, %v1295_v17 }
 0x1de   : > { %1798 = vmatmul.bf16.gmra.mxu1 %v1717_v27 }
 0x1df   : > { %v1280_v35 = vpop.f32.mrf.mxu0  ;;  %v1399_v24 = vpop.f32.mrf.mxu1  ;;  %1599 = vmatmul.bf16.gmra.mxu3 %v7465_v44  ;;  %v6824_v44 = vld [vmem:[%s9719_s6 + $0x98] sm:$0xff] }
 0x1e0   : > { %v1400_v7 = vadd.f32 %v1399_v24, %v1342_v61  ;;  %1683 = vmatpush.bf16.msrb.mxu0 %v6824_v44  ;;  %v1281_v29 = vadd.f32 %v1280_v35, %v7644_v58  ;;  %v6822_v35 = vld [vmem:[%s9719_s6 + $0x88] sm:$0xff] }
 0x1e2   : > { %v7921_v55 = vpop.f32.mrf.mxu3 }
 0x1e4   : > { %v813_v50 = vpop.f32.mrf.mxu2  ;;  %1684 = vmatpush.bf16.msrb.mxu0 %v6823_v1 }
 0x1e5   : > { %v7927_v3 = vmax.f32 %v9805_v41, %v813_v50  ;;  %v1415_v50 = vand.u32 2147483647, %v1400_v7  ;;  %v1296_v7 = vsub.f32 %v7660_v2, %v7481_v51  ;;  %v9807_v51 = vmax.f32 %v7834_v37, %v7832_v13 }
 0x1e7   : > { %v1282_v11 = vpop.f32.mrf.mxu0  ;;  %v1402_v25 = vpop.f32.mrf.mxu1 }
 0x1e8   : > { %v1283_v28 = vadd.f32 %v1282_v11, %v7653_v0  ;;  %v1403_v56 = vadd.f32 %v1402_v25, %v1343_v42  ;;  %1685 = vmatpush.bf16.msrb.mxu0 %v6822_v35  ;;  %v6821_v11 = vld [vmem:[%s9719_s6 + $0x80] sm:$0xff]  ;;  %v1297_v25 = vsub.f32 %v7670_v8, %v7484_v52 }
 0x1ea   : > { %v1437_v41 = vpack.c.bf16 %v1283_v28, %v1281_v29  ;;  %v1416_v24 = vand.u32 2147483647, %v1403_v56  ;;  %v7940_v61 = vpop.f32.mrf.mxu3  ;;  %v7950_v28 = vpop.permute.xlu0 %1330 }
 0x1eb   : > { %9806 = vst [vmem:[#allocation24_spill] sm:$0xff] %v7950_v28  ;;  %v7957_v29 = vpop.permute.xlu1 %1335  ;;  %v1344_v56 = vmul.f32 %v7950_v28, %v1296_v7 }
 0x1ec   : > { %1522 = vmatmul.bf16.gmra.mxu2 %v1437_v41  ;;  %v7942_v17 = vpop.f32.mrf.mxu2  ;;  %v1718_v27 = vpack.c.bf16 %v1416_v24, %v1415_v50  ;;  %1686 = vmatpush.bf16.msrb.mxu0 %v6821_v11  ;;  %v1345_v41 = vmul.f32 %v7957_v29, %v1297_v25 }
 0x1ee   : > { %1803 = vmatmul.bf16.gmra.mxu1 %v1718_v27 }
 0x1ef   : > { %v1285_v44 = vpop.f32.mrf.mxu0  ;;  %v1405_v42 = vpop.f32.mrf.mxu1  ;;  %1604 = vmatmul.bf16.gmra.mxu3 %v7488_v53 }
 0x1f0   : > { %v1406_v50 = vadd.f32 %v1405_v42, %v1344_v56  ;;  %v1286_v26 = vadd.f32 %v1285_v44, %v7660_v2  ;;  %v9808_v42 = vmax.f32 %v7692_v22, %v7694_v23  ;;  %v7250_v56 = vmov 1  }
 0x1f1   : > { %7051 = vset.pattern.permute.xlu0 %v7250_v56  ;;  %7052 = vset.pattern.permute.xlu1 %v7250_v56 }
 0x1f2   : > { %v7959_v27 = vpop.f32.mrf.mxu3  ;;  %v1417_v7 = vand.u32 2147483647, %v1406_v50  ;;  %v824_v25 = vmax.f32 %v9808_v42, %v7874_v30  ;;  %1827 = vperm.xlu0 %7051, %v7532_v9   ;;  %1831 = vperm.xlu1 %7052, %v7540_v10  }
 0x1f3   : > { %7050 = vset.pattern.permute.xlu2 %v7250_v56 }
 0x1f4   : > { %v818_v1 = vpop.f32.mrf.mxu2  ;;  %v902_v44 = vmax.f32 %v824_v25, %v7872_v18  ;;  %1823 = vperm.xlu2 %7050, %v7522_v6   ;;  %v9810_v6 = vmax.f32 %v7760_v12, %v7752_v5  ;;  %v9812_v12 = vld [vmem:[#allocation5_spill] sm:$0xff] }
 0x1f5   : > { %v7965_v53 = vmax.f32 %v9807_v51, %v818_v1 }
 0x1f6   : > { %v980_v22 = vmax.f32 %v902_v44, %v7688_v20  ;;  %v826_v10 = vmax.f32 %v9810_v6, %v7906_v47  ;;  %v9824_v6 = vld [vmem:[#allocation14_spill] sm:$0xff] }
 0x1f7   : > { %v907_v24 = vmax.f32 %v7965_v53, %v7959_v27  ;;  %v1287_v52 = vpop.f32.mrf.mxu0  ;;  %v1408_v35 = vpop.f32.mrf.mxu1 }
 0x1f8   : > { %v1288_v11 = vadd.f32 %v1287_v52, %v7670_v8  ;;  %v1409_v43 = vadd.f32 %v1408_v35, %v1345_v41  ;;  %v1058_v1 = vmax.f32 %v980_v22, %v7690_v21  ;;  %v904_v18 = vmax.f32 %v826_v10, %v7904_v63  ;;  %v9813_v63 = vld [vmem:[#allocation11_spill] sm:$0xff]  ;;  %v9814_v52 = vld [vmem:[#allocation10_spill] sm:$0xff]  ;;  %v9820_v22 = vld [vmem:[#allocation9_spill] sm:$0xff] }
 0x1f9   : > { %v9815_v35 = vmax.f32 %v9813_v63, %v9814_v52  ;;  %v985_v10 = vmax.f32 %v907_v24, %v9824_v6  ;;  %v5742_v24 = vld [vmem:[%s9718_s5 + $0xf0] sm:$0xf]  ;;  %v6849_v63 = vld [vmem:[%s9718_s5 + $0xe4] sm:$0xf]  ;;  %v5696_v6 = vld [vmem:[%s9718_s5 + $0x98] sm:$0xf0] }
 0x1fa   : > { %v1438_v28 = vpack.c.bf16 %v1288_v11, %v1286_v26  ;;  %v1418_v59 = vand.u32 2147483647, %v1409_v43  ;;  %v7972_v19 = vpop.f32.mrf.mxu3  ;;  %v9809_v26 = vmax.f32 %v7863_v60, %v7857_v57  ;;  %1847 = vperm.xlu0 %7051, %v7589_v33   ;;  %1839 = vperm.xlu1 %7052, %v7583_v31   ;;  %v9811_v33 = vmax.f32 %v7889_v49, %v7883_v38 }
 0x1fb   : > { %v982_v5 = vmax.f32 %v904_v18, %v7739_v62  ;;  %v9816_v62 = vld [vmem:[#allocation6_spill] sm:$0xff] }
 0x1fc   : > { %1527 = vmatmul.bf16.gmra.mxu2 %v1438_v28  ;;  %v7974_v13 = vpop.f32.mrf.mxu2  ;;  %v1719_v37 = vpack.c.bf16 %v1418_v59, %v1417_v7  ;;  %v979_v43 = vmax.f32 %v9809_v26, %v7676_v14  ;;  %1835 = vperm.xlu2 %7050, %v7558_v16   ;;  %v981_v31 = vmax.f32 %v9811_v33, %v7709_v45 }
 0x1fd   : > { %v1060_v47 = vmax.f32 %v982_v5, %v9812_v12 }
 0x1fe   : > { %1808 = vmatmul.bf16.gmra.mxu1 %v1719_v37  ;;  %v1057_v23 = vmax.f32 %v979_v43, %v7678_v15  ;;  %v9818_v43 = vld [vmem:[#allocation8_spill] sm:$0xff] }
 0x202   : > { %v1193_v28 = vpop.f32.mrf.mxu3  ;;  %1851 = vperm.xlu1 %7052, %v7586_v32   ;;  %v828_v32 = vmax.f32 %v9815_v35, %v7942_v17  ;;  %v5736_v35 = vld [vmem:[%s9718_s5 + $0xe8] sm:$0xf0] }
 0x204   : > { %v1115_v59 = vpop.f32.mrf.mxu2  ;;  %1843 = vperm.xlu2 %7050, %v7595_v34   ;;  %v906_v42 = vmax.f32 %v828_v32, %v7940_v61  ;;  %v5726_v32 = vld [vmem:[%s9718_s5 + $0xd0] sm:$0xf] }
 0x205   : > { %v1135_v30 = vmax.f32 %v1057_v23, %v1115_v59 }
 0x206   : > { %v984_v44 = vmax.f32 %v906_v42, %v9818_v43  ;;  %v5718_v42 = vld [vmem:[%s9718_s5 + $0xc0] sm:$0xf]  ;;  %v5720_v43 = vld [vmem:[%s9718_s5 + $0xc8] sm:$0xf0] }
 0x207   : > { %v1213_v9 = vmax.f32 %v1135_v30, %v1193_v28  ;;  %v9819_v28 = vld [vmem:[#allocation7_spill] sm:$0xff] }
 0x209   : > { %v1221_v15 = vadd.f32 %v1213_v9, %v7602_v39  ;;  %v1059_v39 = vmax.f32 %v981_v31, %v7711_v46  ;;  %v9817_v46 = vmax.f32 %v7927_v3, %v7921_v55  ;;  %v9821_v55 = vld [vmem:[#allocation20_spill] sm:$0xff]  ;;  %v9822_v3 = vld [vmem:[#allocation19_spill] sm:$0xff] }
 0x20a   : > { %v1195_v60 = vpop.f32.mrf.mxu3  ;;  %v9825_v31 = vld [vmem:[#allocation16_spill] sm:$0xff] }
 0x20b   : > { %v983_v37 = vmax.f32 %v9817_v46, %v9816_v62  ;;  %v5728_v62 = vld [vmem:[%s9718_s5 + $0xd8] sm:$0xf0] }
 0x20c   : > { %v1117_v14 = vpop.f32.mrf.mxu2 }
 0x20d   : > { %v1136_v57 = vmax.f32 %v1058_v1, %v1117_v14  ;;  %v1061_v17 = vmax.f32 %v983_v37, %v9819_v28  ;;  %v5710_v28 = vld [vmem:[%s9718_s5 + $0xb0] sm:$0xf] }
 0x20f   : > { %v1214_v20 = vmax.f32 %v1136_v57, %v1195_v60  ;;  %v9823_v60 = vmax.f32 %v9821_v55, %v9822_v3  ;;  %v5704_v3 = vld [vmem:[%s9718_s5 + $0xa8] sm:$0xf0] }
 0x211   : > { %v1222_v21 = vadd.f32 %v1214_v20, %v7609_v40  ;;  %v830_v61 = vmax.f32 %v9823_v60, %v7974_v13 }
 0x212   : > { %v1198_v50 = vpop.f32.mrf.mxu3 }
 0x213   : > { %v1610_v51 = vpack.c.bf16 %v1222_v21, %v1221_v15  ;;  %v908_v20 = vmax.f32 %v830_v61, %v7972_v19  ;;  %v5694_v61 = vld [vmem:[%s9718_s5 + $0x90] sm:$0xf] }
 0x214   : > { %v1120_v16 = vpop.f32.mrf.mxu2 }
 0x215   : > { %1687 = vmatmul.bf16.vlgmr.msrb.gmra.mxu0 %v1610_v51  ;;  %v1137_v40 = vmax.f32 %v1059_v39, %v1120_v16  ;;  %v986_v18 = vmax.f32 %v908_v20, %v9825_v31  ;;  %v9826_v51 = vld [vmem:[#allocation15_spill] sm:$0xff]  ;;  %v9827_v16 = vld [vmem:[#allocation17_spill] sm:$0xff] }
 0x216   : > { %v1063_v13 = vmax.f32 %v985_v10, %v9826_v51  ;;  %v6837_v31 = vld [vmem:[%s9718_s5 + $0x84] sm:$0xf]  ;;  %v5688_v51 = vld [vmem:[%s9718_s5 + $0x88] sm:$0xf0] }
 0x217   : > { %v1215_v45 = vmax.f32 %v1137_v40, %v1198_v50 }
 0x219   : > { %v1223_v7 = vadd.f32 %v1215_v45, %v7630_v48  ;;  %v1062_v48 = vmax.f32 %v984_v44, %v9820_v22  ;;  %v5734_v45 = vld [vmem:[%s9718_s5 + $0xe0] sm:$0xf] }
 0x21a   : > { %v1200_v41 = vpop.f32.mrf.mxu3 }
 0x21c   : > { %v1122_v38 = vpop.f32.mrf.mxu2 }
 0x21d   : > { %v1138_v49 = vmax.f32 %v1060_v47, %v1122_v38  ;;  %v6852_v47 = vld [vmem:[%s9718_s5 + $0xf4] sm:$0xf0] }
 0x21e   : > { %v5743_v38 = vor.u32 %v6852_v47, %v5742_v24 }
 0x21f   : > { %v1216_v11 = vmax.f32 %v1138_v49, %v1200_v41  ;;  %v6851_v41 = vld [vmem:[%s9718_s5 + $0xf4] sm:$0xf]  ;;  %v6850_v49 = vld [vmem:[%s9718_s5 + $0xe4] sm:$0xf0] }
 0x220   : > { %1971 = vmatpush.bf16.msra.mxu2 %v5743_v38  ;;  %v5735_v52 = vor.u32 %v6850_v49, %v5734_v45 }
 0x221   : > { %v1224_v34 = vadd.f32 %v1216_v11, %v7635_v54  ;;  %v6848_v11 = vld [vmem:[%s9718_s5 + $0xd4] sm:$0xf0] }
 0x222   : > { %v1203_v25 = vpop.f32.mrf.mxu3  ;;  %v5727_v46 = vor.u32 %v6848_v11, %v5726_v32 }
 0x223   : > { %v1611_v56 = vpack.c.bf16 %v1224_v34, %v1223_v7  ;;  %v5739_v7 = vor.u32 %v6849_v63, %v5736_v35  ;;  %v6847_v34 = vld [vmem:[%s9718_s5 + $0xd4] sm:$0xf] }
 0x224   : > { %v1125_v26 = vpop.f32.mrf.mxu2  ;;  %1972 = vmatpush.bf16.msra.mxu2 %v5735_v52  ;;  %v5731_v37 = vor.u32 %v6847_v34, %v5728_v62 }
 0x225   : > { %1692 = vmatmul.bf16.gmra.mxu0 %v1611_v56  ;;  %v1139_v59 = vmax.f32 %v1061_v17, %v1125_v26  ;;  %v6845_v56 = vld [vmem:[%s9718_s5 + $0xc4] sm:$0xf]  ;;  %v6844_v17 = vld [vmem:[%s9718_s5 + $0xb4] sm:$0xf0] }
 0x226   : > { %v5723_v44 = vor.u32 %v6845_v56, %v5720_v43  ;;  %v5711_v22 = vor.u32 %v6844_v17, %v5710_v28 }
 0x227   : > { %v1217_v30 = vmax.f32 %v1139_v59, %v1203_v25  ;;  %v6846_v25 = vld [vmem:[%s9718_s5 + $0xc4] sm:$0xf0]  ;;  %v6843_v59 = vld [vmem:[%s9718_s5 + $0xb4] sm:$0xf] }
 0x228   : > { %1973 = vmatpush.bf16.msra.mxu2 %v5727_v46  ;;  %v5719_v26 = vor.u32 %v6846_v25, %v5718_v42 }
 0x229   : > { %v1225_v9 = vadd.f32 %v1217_v30, %v7644_v58  ;;  %v1064_v58 = vmax.f32 %v986_v18, %v9827_v16  ;;  %v6842_v30 = vld [vmem:[%s9718_s5 + $0xa4] sm:$0xf0] }
 0x22a   : > { %v1205_v23 = vpop.f32.mrf.mxu3 }
 0x22c   : > { %v1127_v54 = vpop.f32.mrf.mxu2  ;;  %1974 = vmatpush.bf16.msra.mxu2 %v5719_v26 }
 0x22d   : > { %v1140_v1 = vmax.f32 %v1062_v48, %v1127_v54  ;;  %v5712_v48 = vld [vmem:[%s9718_s5 + $0xb8] sm:$0xf0]  ;;  %v5702_v54 = vld [vmem:[%s9718_s5 + $0xa0] sm:$0xf] }
 0x22e   : > { %v5703_v55 = vor.u32 %v6842_v30, %v5702_v54 }
 0x22f   : > { %v1218_v14 = vmax.f32 %v1140_v1, %v1205_v23  ;;  %v5715_v23 = vor.u32 %v6843_v59, %v5712_v48  ;;  %v6841_v1 = vld [vmem:[%s9718_s5 + $0xa4] sm:$0xf] }
 0x230   : > { %1975 = vmatpush.bf16.msra.mxu2 %v5711_v22  ;;  %v5707_v60 = vor.u32 %v6841_v1, %v5704_v3 }
 0x231   : > { %v1226_v57 = vadd.f32 %v1218_v14, %v7653_v0  ;;  %v6840_v14 = vld [vmem:[%s9718_s5 + $0x94] sm:$0xf0] }
 0x232   : > { %v1208_v33 = vpop.f32.mrf.mxu3 }
 0x233   : > { %v1612_v15 = vpack.c.bf16 %v1226_v57, %v1225_v9  ;;  %v6839_v9 = vld [vmem:[%s9718_s5 + $0x94] sm:$0xf]  ;;  %v5695_v57 = vor.u32 %v6840_v14, %v5694_v61 }
 0x234   : > { %v1130_v21 = vpop.f32.mrf.mxu2  ;;  %1976 = vmatpush.bf16.msra.mxu2 %v5703_v55  ;;  %v5699_v10 = vor.u32 %v6839_v9, %v5696_v6 }
 0x235   : > { %1697 = vmatmul.bf16.gmra.mxu0 %v1612_v15  ;;  %v1141_v50 = vmax.f32 %v1063_v13, %v1130_v21  ;;  %v5686_v21 = vld [vmem:[%s9718_s5 + $0x80] sm:$0xf]  ;;  %v5691_v13 = vor.u32 %v6837_v31, %v5688_v51 }
 0x237   : > { %v1219_v0 = vmax.f32 %v1141_v50, %v1208_v33  ;;  %v6838_v33 = vld [vmem:[%s9718_s5 + $0x84] sm:$0xf0] }
 0x238   : > { %1977 = vmatpush.bf16.msra.mxu2 %v5695_v57  ;;  %v5687_v18 = vor.u32 %v6838_v33, %v5686_v21 }
 0x239   : > { %v1227_v27 = vadd.f32 %v1219_v0, %v7660_v2  ;;  %v5744_v2 = vld [vmem:[%s9718_s5 + $0xf8] sm:$0xf0] }
 0x23a   : > { %v1210_v40 = vpop.f32.mrf.mxu3 }
 0x23c   : > { %v1132_v5 = vpop.f32.mrf.mxu2  ;;  %1978 = vmatpush.bf16.msra.mxu2 %v5687_v18 }
 0x23d   : > { %v1142_v39 = vmax.f32 %v1064_v58, %v1132_v5 }
 0x23f   : > { %v1220_v12 = vmax.f32 %v1142_v39, %v1210_v40 }
 0x241   : > { %v1228_v19 = vadd.f32 %v1220_v12, %v7670_v8  ;;  %v5747_v8 = vor.u32 %v6851_v41, %v5744_v2 }
 0x242   : > { %v1590_v20 = vpop.f32.mrf.mxu3 }
 0x243   : > { %v1613_v53 = vpack.c.bf16 %v1228_v19, %v1227_v27  ;;  %2000 = vmatpush.bf16.msra.mxu3 %v5747_v8 }
 0x245   : > { %1702 = vmatmul.bf16.gmra.mxu0 %v1613_v53 }
 0x247   : > { %2001 = vmatpush.bf16.msra.mxu3 %v5739_v7 }
 0x24a   : > { %v1592_v16 = vpop.f32.mrf.mxu3 }
 0x24b   : > { %2002 = vmatpush.bf16.msra.mxu3 %v5731_v37  ;;  %v1794_v50 = vpop.f32.mrf.mxu1 }
 0x24e   : > { %v8136_v38 = vpop.permute.xlu2 %1823 }
 0x24f   : > { %2003 = vmatpush.bf16.msra.mxu3 %v5723_v44  ;;  %v1513_v15 = vpop.f32.mrf.mxu2  ;;  %9828 = vst [vmem:[#allocation5_spill] sm:$0xff] %v8136_v38 }
 0x250   : > { %v1591_v39 = vadd.f32 %v1590_v20, %v1513_v15 }
 0x252   : > { %v1595_v40 = vpop.f32.mrf.mxu3 }
 0x253   : > { %2004 = vmatpush.bf16.msra.mxu3 %v5715_v23  ;;  %v1796_v5 = vpop.f32.mrf.mxu1 }
 0x256   : > { %v8161_v22 = vpop.permute.xlu2 %1835 }
 0x257   : > { %2005 = vmatpush.bf16.msra.mxu3 %v5707_v60  ;;  %v1515_v58 = vpop.f32.mrf.mxu2  ;;  %9831 = vst [vmem:[#allocation6_spill] sm:$0xff] %v8161_v22 }
 0x258   : > { %v1593_v19 = vadd.f32 %v1592_v16, %v1515_v58 }
 0x25a   : > { %v1597_v2 = vpop.f32.mrf.mxu3 }
 0x25b   : > { %2006 = vmatpush.bf16.msra.mxu3 %v5699_v10  ;;  %v1799_v24 = vpop.f32.mrf.mxu1 }
 0x25e   : > { %v8181_v18 = vpop.permute.xlu2 %1843 }
 0x25f   : > { %2007 = vmatpush.bf16.msra.mxu3 %v5691_v13  ;;  %v1518_v12 = vpop.f32.mrf.mxu2  ;;  %9833 = vst [vmem:[#allocation7_spill] sm:$0xff] %v8181_v18 }
 0x260   : > { %v1596_v7 = vadd.f32 %v1595_v40, %v1518_v12 }
 0x262   : > { %v1600_v37 = vpop.f32.mrf.mxu3 }
 0x263   : > { %v1801_v62 = vpop.f32.mrf.mxu1 }
 0x264   : > { %v8141_v63 = vpop.permute.xlu0 %1827  ;;  %v8156_v44 = vpop.permute.xlu1 %1831 }
 0x265   : > { %9829 = vst [vmem:[#allocation11_spill] sm:$0xff] %v8141_v63 }
 0x266   : > { %9830 = vst [vmem:[#allocation10_spill] sm:$0xff] %v8156_v44 }
 0x267   : > { %v1520_v49 = vpop.f32.mrf.mxu2 }
 0x268   : > { %v1598_v25 = vadd.f32 %v1597_v2, %v1520_v49 }
 0x26a   : > { %v1602_v23 = vpop.f32.mrf.mxu3 }
 0x26b   : > { %v1804_v59 = vpop.f32.mrf.mxu1 }
 0x26c   : > { %v8176_v21 = vpop.permute.xlu1 %1839 }
 0x26d   : > { %9832 = vst [vmem:[#allocation8_spill] sm:$0xff] %v8176_v21 }
 0x26f   : > { %v1523_v42 = vpop.f32.mrf.mxu2 }
 0x270   : > { %v1601_v3 = vadd.f32 %v1600_v37, %v1523_v42 }
 0x272   : > { %v1605_v10 = vpop.f32.mrf.mxu3 }
 0x273   : > { %v1806_v14 = vpop.f32.mrf.mxu1 }
 0x274   : > { %v8201_v49 = vpop.permute.xlu1 %1851 }
 0x275   : > { %9835 = vst [vmem:[#allocation20_spill] sm:$0xff] %v8201_v49 }
 0x277   : > { %v1525_v1 = vpop.f32.mrf.mxu2 }
 0x278   : > { %v1603_v9 = vadd.f32 %v1602_v23, %v1525_v1 }
 0x27a   : > { %v1607_v12 = vpop.f32.mrf.mxu3 }
 0x27b   : > { %v1809_v16 = vpop.f32.mrf.mxu1 }
 0x27f   : > { %v1528_v15 = vpop.f32.mrf.mxu2 }
 0x287   : > { %v1530_v40 = vpop.f32.mrf.mxu2 }
 0x292   : > { %v1688_v0 = vpop.f32.mrf.mxu0 }
 0x293   : > { %v1708_v27 = vadd.f32 %v1688_v0, %v1591_v39 }
 0x295   : > { %v1814_v53 = vadd.f32 %v1794_v50, %v1708_v27  ;;  %v1608_v27 = vadd.f32 %v1607_v12, %v1530_v40  ;;  %v7068_v40 = vld [vmem:[%s7537_s14 + $0x38] sm:$0xff] }
 0x296   : > { %v7069_v12 = vld [vmem:[%s7537_s14 + $0x58] sm:$0xff] }
 0x297   : > { %v8139_v8 = vmul.f32 %v8136_v38, %v1814_v53 }
 0x299   : > { %v9746_v35 = vmax.f32 %v8139_v8, 0.0 }
 0x29a   : > { %v1690_v47 = vpop.f32.mrf.mxu0 }
 0x29b   : > { %v1709_v41 = vadd.f32 %v1690_v47, %v1593_v19  ;;  %v1811_v47 = vpop.f32.mrf.mxu1 }
 0x29d   : > { %v1815_v45 = vadd.f32 %v1796_v5, %v1709_v41  ;;  %v1606_v5 = vadd.f32 %v1605_v10, %v1528_v15  ;;  %v8196_v41 = vpop.permute.xlu0 %1847  ;;  %v7060_v10 = vld [vmem:[%s7537_s14 + $0x28] sm:$0xff] }
 0x29e   : > { %9834 = vst [vmem:[#allocation9_spill] sm:$0xff] %v8196_v41  ;;  %v7062_v15 = vld [vmem:[%s7537_s14 + $0x68] sm:$0xff] }
 0x29f   : > { %v8144_v52 = vmul.f32 %v8141_v63, %v1815_v45 }
 0x2a1   : > { %v9745_v32 = vmax.f32 %v8144_v52, 0.0 }
 0x2a2   : > { %v1693_v11 = vpop.f32.mrf.mxu0 }
 0x2a3   : > { %v8152_v34 = vpack.c.bf16 %v9745_v32, %v9746_v35  ;;  %v1710_v46 = vadd.f32 %v1693_v11, %v1596_v7 }
 0x2a5   : > { %1979 = vmatmul.bf16.vlgmr.msra.gmra.mxu2 %v8152_v34  ;;  %2008 = vmatmul.bf16.vlgmr.msra.gmra.mxu3 %v8152_v34  ;;  %v1816_v56 = vadd.f32 %v1799_v24, %v1710_v46 }
 0x2a7   : > { %v8159_v28 = vmul.f32 %v8156_v44, %v1816_v56 }
 0x2a9   : > { %v9744_v54 = vmax.f32 %v8159_v28, 0.0 }
 0x2aa   : > { %v1695_v26 = vpop.f32.mrf.mxu0 }
 0x2ab   : > { %v1711_v43 = vadd.f32 %v1695_v26, %v1598_v25 }
 0x2ad   : > { %v1817_v17 = vadd.f32 %v1801_v62, %v1711_v43 }
 0x2af   : > { %v8164_v48 = vmul.f32 %v8161_v22, %v1817_v17 }
 0x2b1   : > { %v9743_v30 = vmax.f32 %v8164_v48, 0.0 }
 0x2b2   : > { %v1698_v55 = vpop.f32.mrf.mxu0 }
 0x2b3   : > { %v8172_v60 = vpack.c.bf16 %v9743_v30, %v9744_v54  ;;  %v1712_v61 = vadd.f32 %v1698_v55, %v1601_v3 }
 0x2b5   : > { %1984 = vmatmul.bf16.gmra.mxu2 %v8172_v60  ;;  %2013 = vmatmul.bf16.gmra.mxu3 %v8172_v60  ;;  %v1818_v57 = vadd.f32 %v1804_v59, %v1712_v61  ;;  %v7055_v61 = vld [vmem:[%s7537_s14] sm:$0xff] }
 0x2b7   : > { %v8179_v33 = vmul.f32 %v8176_v21, %v1818_v57  ;;  %v7058_v57 = vld [vmem:[%s7537_s14 + $0x60] sm:$0xff] }
 0x2b9   : > { %v9742_v13 = vmax.f32 %v8179_v33, 0.0 }
 0x2ba   : > { %v1700_v6 = vpop.f32.mrf.mxu0 }
 0x2bb   : > { %v1713_v20 = vadd.f32 %v1700_v6, %v1603_v9  ;;  %v7057_v9 = vld [vmem:[%s7537_s14 + $0x40] sm:$0xff]  ;;  %v7059_v6 = vld [vmem:[%s7537_s14 + $0x8] sm:$0xff] }
 0x2bd   : > { %v1819_v31 = vadd.f32 %v1806_v14, %v1713_v20  ;;  %v7056_v14 = vld [vmem:[%s7537_s14 + $0x20] sm:$0xff]  ;;  %v7061_v20 = vld [vmem:[%s7537_s14 + $0x48] sm:$0xff] }
 0x2bf   : > { %v8184_v51 = vmul.f32 %v8181_v18, %v1819_v31  ;;  %v7063_v31 = vld [vmem:[%s7537_s14 + $0x10] sm:$0xff] }
 0x2c1   : > { %v9741_v50 = vmax.f32 %v8184_v51, 0.0 }
 0x2c2   : > { %v1703_v58 = vpop.f32.mrf.mxu0 }
 0x2c3   : > { %v8192_v0 = vpack.c.bf16 %v9741_v50, %v9742_v13  ;;  %v1714_v39 = vadd.f32 %v1703_v58, %v1606_v5  ;;  %v7065_v58 = vld [vmem:[%s7537_s14 + $0x50] sm:$0xff] }
 0x2c4   : > { %v7066_v5 = vld [vmem:[%s7537_s14 + $0x70] sm:$0xff] }
 0x2c5   : > { %1989 = vmatmul.bf16.gmra.mxu2 %v8192_v0  ;;  %2018 = vmatmul.bf16.gmra.mxu3 %v8192_v0  ;;  %v1820_v19 = vadd.f32 %v1809_v16, %v1714_v39  ;;  %v7064_v16 = vld [vmem:[%s7537_s14 + $0x30] sm:$0xff]  ;;  %v7067_v39 = vld [vmem:[%s7537_s14 + $0x18] sm:$0xff] }
 0x2c7   : > { %v8199_v2 = vmul.f32 %v8196_v41, %v1820_v19  ;;  %v6868_v41 = vld [vmem:[%s9719_s6 + $0x178] sm:$0xff] }
 0x2c9   : > { %v9740_v7 = vmax.f32 %v8199_v2, 0.0 }
 0x2ca   : > { %v1705_v53 = vpop.f32.mrf.mxu0 }
 0x2cb   : > { %v1715_v24 = vadd.f32 %v1705_v53, %v1608_v27  ;;  %v7070_v27 = vld [vmem:[%s7537_s14 + $0x78] sm:$0xff] }
 0x2cd   : > { %v1821_v45 = vadd.f32 %v1811_v47, %v1715_v24  ;;  %v7071_v24 = vld [vmem:[%s7537_s14 + $0x80] sm:$0xff] }
 0x2ce   : > { %v7072_v47 = vld [vmem:[%s7537_s14 + $0xa0] sm:$0xff] }
 0x2cf   : > { %v8204_v11 = vmul.f32 %v8201_v49, %v1821_v45  ;;  %v6860_v45 = vld [vmem:[%s9719_s6 + $0x138] sm:$0xff] }
 0x2d1   : > { %v9739_v62 = vmax.f32 %v8204_v11, 0.0 }
 0x2d3   : > { %v8212_v46 = vpack.c.bf16 %v9739_v62, %v9740_v7 }
 0x2d5   : > { %1994 = vmatmul.bf16.gmra.mxu2 %v8212_v46  ;;  %2023 = vmatmul.bf16.gmra.mxu3 %v8212_v46 }
 0x328   : > { %v8216_v37 = vpop.f32.mrf.mxu2  ;;  %v8264_v19 = vpop.f32.mrf.mxu3 }
 0x330   : > { %v8218_v42 = vpop.f32.mrf.mxu2  ;;  %v8266_v53 = vpop.f32.mrf.mxu3 }
 0x331   : > { %v2029_v3 = vpack.c.bf16 %v8218_v42, %v8216_v37 }
 0x338   : > { %v8220_v25 = vpop.f32.mrf.mxu2 }
 0x340   : > { %v8222_v56 = vpop.f32.mrf.mxu2 }
 0x341   : > { %v2030_v55 = vpack.c.bf16 %v8222_v56, %v8220_v25 }
 0x348   : > { %v1990_v26 = vpop.f32.mrf.mxu2 }
 0x350   : > { %v1992_v43 = vpop.f32.mrf.mxu2 }
 0x351   : > { %v2031_v1 = vpack.c.bf16 %v1992_v43, %v1990_v26 }
 0x358   : > { %v1995_v17 = vpop.f32.mrf.mxu2 }
 0x360   : > { %v1997_v59 = vpop.f32.mrf.mxu2 }
 0x361   : > { %v2032_v23 = vpack.c.bf16 %v1997_v59, %v1995_v17 }
 0x363   : > { %2037 = vmatpush.bf16.msra.mxu0 %v2032_v23  ;;  %2066 = vmatpush.bf16.msra.mxu1 %v2032_v23 }
 0x364   : > { %2103 = vmatpush.bf16.msrb.mxu2 %v2032_v23  ;;  %2140 = vmatpush.bf16.msrb.mxu3 %v2032_v23 }
 0x367   : > { %2038 = vmatpush.bf16.msra.mxu0 %v2031_v1  ;;  %2067 = vmatpush.bf16.msra.mxu1 %v2031_v1 }
 0x368   : > { %2104 = vmatpush.bf16.msrb.mxu2 %v2031_v1  ;;  %2141 = vmatpush.bf16.msrb.mxu3 %v2031_v1 }
 0x36b   : > { %2039 = vmatpush.bf16.msra.mxu0 %v2030_v55  ;;  %2068 = vmatpush.bf16.msra.mxu1 %v2030_v55 }
 0x36c   : > { %2105 = vmatpush.bf16.msrb.mxu2 %v2030_v55  ;;  %2142 = vmatpush.bf16.msrb.mxu3 %v2030_v55 }
 0x36f   : > { %2040 = vmatpush.bf16.msra.mxu0 %v2029_v3  ;;  %2069 = vmatpush.bf16.msra.mxu1 %v2029_v3 }
 0x370   : > { %2106 = vmatpush.bf16.msrb.mxu2 %v2029_v3  ;;  %2143 = vmatpush.bf16.msrb.mxu3 %v2029_v3 }
 0x372   : > { %5748 = vmatmul.msk.bf16.vlgmr.msra.gmra.mxu0 %vm633_vm0, %v7055_v61  ;;  %5752 = vmatmul.msk.bf16.vlgmr.msra.gmra.mxu1 %vm633_vm0, %v7056_v14  ;;  %v6854_v14 = vld [vmem:[%s9719_s6 + $0x108] sm:$0xff] }
 0x373   : > { %2177 = vmatpush.bf16.msrb.mxu0 %v2032_v23  ;;  %2214 = vmatpush.bf16.msrb.mxu1 %v2032_v23 }
 0x374   : > { %2251 = vmatpush.bf16.msra.mxu2 %v2032_v23  ;;  %2288 = vmatpush.bf16.msra.mxu3 %v2032_v23 }
 0x375   : > { %5756 = vmatmul.msk.bf16.vlgmr.msrb.gmra.mxu2 %vm633_vm0, %v7057_v9  ;;  %5760 = vmatmul.msk.bf16.vlgmr.msrb.gmra.mxu3 %vm633_vm0, %v7058_v57  ;;  %v6853_v9 = vld [vmem:[%s9719_s6 + $0x100] sm:$0xff] }
 0x377   : > { %2178 = vmatpush.bf16.msrb.mxu0 %v2031_v1  ;;  %2215 = vmatpush.bf16.msrb.mxu1 %v2031_v1 }
 0x378   : > { %2252 = vmatpush.bf16.msra.mxu2 %v2031_v1  ;;  %2289 = vmatpush.bf16.msra.mxu3 %v2031_v1 }
 0x37b   : > { %2179 = vmatpush.bf16.msrb.mxu0 %v2030_v55  ;;  %2216 = vmatpush.bf16.msrb.mxu1 %v2030_v55 }
 0x37c   : > { %2253 = vmatpush.bf16.msra.mxu2 %v2030_v55  ;;  %2290 = vmatpush.bf16.msra.mxu3 %v2030_v55 }
 0x37f   : > { %2180 = vmatpush.bf16.msrb.mxu0 %v2029_v3  ;;  %2217 = vmatpush.bf16.msrb.mxu1 %v2029_v3 }
 0x380   : > { %2254 = vmatpush.bf16.msra.mxu2 %v2029_v3  ;;  %2291 = vmatpush.bf16.msra.mxu3 %v2029_v3 }
 0x382   : > { %5749 = vmatmul.msk.bf16.gmra.mxu0 %vm633_vm0, %v7059_v6  ;;  %5753 = vmatmul.msk.bf16.gmra.mxu1 %vm633_vm0, %v7060_v10  ;;  %v7079_v6 = vld [vmem:[%s7537_s14 + $0x90] sm:$0xff] }
 0x383   : > { %2333 = vmatpush.bf16.msra.mxu0 %v2032_v23  ;;  %2382 = vmatpush.msra.mxu1 %v1997_v59  ;;  %v7076_v59 = vld [vmem:[%s7537_s14 + $0xa8] sm:$0xff]  ;;  %v6856_v23 = vld [vmem:[%s9719_s6 + $0x118] sm:$0xff]  ;;  %v7080_v10 = vld [vmem:[%s7537_s14 + $0xb0] sm:$0xff] }
 0x384   : > { %2586 = vmatpush.bf16.msrb.mxu3 %v6860_v45  ;;  %v7085_v45 = vld [vmem:[%s7614_s23] sm:$0xff]  ;;  %2509 = vmatpush.bf16.msrb.mxu2 %v6868_v41  ;;  %v6883_v41 = vld [vmem:[%s9719_s6 + $0x1f0] sm:$0xff] }
 0x385   : > { %2383 = vmatpush.msra.mxu1 %v1995_v17  ;;  %5757 = vmatmul.msk.bf16.gmra.mxu2 %vm633_vm0, %v7061_v20  ;;  %v7075_v17 = vld [vmem:[%s7537_s14 + $0x88] sm:$0xff]  ;;  %v7081_v20 = vld [vmem:[%s7537_s14 + $0xd0] sm:$0xff] }
 0x386   : > { %5761 = vmatmul.msk.bf16.gmra.mxu3 %vm633_vm0, %v7062_v15  ;;  %v7082_v15 = vld [vmem:[%s7537_s14 + $0xf0] sm:$0xff] }
 0x387   : > { %2334 = vmatpush.bf16.msra.mxu0 %v2031_v1  ;;  %2384 = vmatpush.msra.mxu1 %v1992_v43  ;;  %v6857_v43 = vld [vmem:[%s9719_s6 + $0x120] sm:$0xff]  ;;  %v7077_v1 = vld [vmem:[%s7537_s14 + $0xc8] sm:$0xff] }
 0x389   : > { %2385 = vmatpush.msra.mxu1 %v1990_v26  ;;  %v8285_v26 = vpop.f32.mrf.mxu3 }
 0x38b   : > { %2335 = vmatpush.bf16.msra.mxu0 %v2030_v55  ;;  %2386 = vmatpush.msra.mxu1 %v8222_v56  ;;  %v6858_v56 = vld [vmem:[%s9719_s6 + $0x128] sm:$0xff] }
 0x38c   : > { %v7078_v55 = vld [vmem:[%s7537_s14 + $0xe8] sm:$0xff] }
 0x38d   : > { %2387 = vmatpush.msra.mxu1 %v8220_v25  ;;  %v6859_v25 = vld [vmem:[%s9719_s6 + $0x130] sm:$0xff] }
 0x38e   : > { %2587 = vmatpush.bf16.msrb.mxu3 %v6859_v25 }
 0x38f   : > { %2336 = vmatpush.bf16.msra.mxu0 %v2029_v3  ;;  %2388 = vmatpush.msra.mxu1 %v8218_v42  ;;  %v7074_v42 = vld [vmem:[%s7537_s14 + $0xe0] sm:$0xff]  ;;  %v6855_v3 = vld [vmem:[%s9719_s6 + $0x110] sm:$0xff] }
 0x391   : > { %2389 = vmatpush.msra.mxu1 %v8216_v37  ;;  %v7073_v37 = vld [vmem:[%s7537_s14 + $0xc0] sm:$0xff]  ;;  %v8304_v61 = vpop.f32.mrf.mxu3 }
 0x392   : > { %5750 = vmatmul.msk.bf16.gmra.mxu0 %vm633_vm0, %v7063_v31  ;;  %5754 = vmatmul.msk.bf16.gmra.mxu1 %vm633_vm0, %v7064_v16  ;;  %v7083_v16 = vld [vmem:[%s7537_s14 + $0x98] sm:$0xff] }
 0x393   : > { %2588 = vmatpush.bf16.msrb.mxu3 %v6858_v56 }
 0x395   : > { %5758 = vmatmul.msk.bf16.gmra.mxu2 %vm633_vm0, %v7065_v58  ;;  %v7084_v58 = vld [vmem:[%s7537_s14 + $0xb8] sm:$0xff] }
 0x396   : > { %5762 = vmatmul.msk.bf16.gmra.mxu3 %vm633_vm0, %v7066_v5 }
 0x397   : > { %2589 = vmatpush.bf16.msrb.mxu3 %v6857_v43 }
 0x399   : > { %v8312_v57 = vpop.f32.mrf.mxu3 }
 0x39b   : > { %2590 = vmatpush.bf16.msrb.mxu3 %v6856_v23  ;;  %v7087_v23 = vld [vmem:[%s7621_s27 + $0x8] sm:$0xff] }
 0x39f   : > { %2591 = vmatpush.bf16.msrb.mxu3 %v6855_v3 }
 0x3a1   : > { %v8322_v31 = vpop.f32.mrf.mxu3 }
 0x3a2   : > { %5751 = vmatmul.msk.bf16.gmra.mxu0 %vm633_vm0, %v7067_v39  ;;  %5755 = vmatmul.msk.bf16.gmra.mxu1 %vm633_vm0, %v7068_v40  ;;  %v9836_v39 = vld [vmem:[#allocation13_spill] sm:$0xff]  ;;  %v9837_v40 = vld [vmem:[#allocation12_spill] sm:$0xff] }
 0x3a3   : > { %2592 = vmatpush.bf16.msrb.mxu3 %v6854_v14 }
 0x3a5   : > { %5759 = vmatmul.msk.bf16.gmra.mxu2 %vm633_vm0, %v7069_v12 }
 0x3a6   : > { %5763 = vmatmul.msk.bf16.gmra.mxu3 %vm633_vm0, %v7070_v27 }
 0x3a7   : > { %2593 = vmatpush.bf16.msrb.mxu3 %v6853_v9  ;;  %v7088_v9 = vld [vmem:[%s7614_s23 + $0x8] sm:$0xff] }
 0x3a9   : > { %v8328_v5 = vpop.f32.mrf.mxu3 }
 0x3b1   : > { %v8334_v12 = vpop.f32.mrf.mxu3 }
 0x3b2   : > { %5764 = vmatmul.msk.bf16.vlgmr.msrb.gmra.mxu0 %vm633_vm0, %v7071_v24  ;;  %5768 = vmatmul.msk.bf16.vlgmr.msrb.gmra.mxu1 %vm633_vm0, %v7072_v47 }
 0x3b5   : > { %5772 = vmatmul.msk.bf16.vlgmr.msra.gmra.mxu2 %vm633_vm0, %v7073_v37  ;;  %v7086_v37 = vld [vmem:[%s7621_s27] sm:$0xff] }
 0x3b6   : > { %5776 = vmatmul.msk.bf16.vlgmr.msra.gmra.mxu3 %vm633_vm0, %v7074_v42 }
 0x3c2   : > { %5765 = vmatmul.msk.bf16.gmra.mxu0 %vm633_vm0, %v7075_v17  ;;  %5769 = vmatmul.msk.bf16.gmra.mxu1 %vm633_vm0, %v7076_v59 }
 0x3c5   : > { %5773 = vmatmul.msk.bf16.gmra.mxu2 %vm633_vm0, %v7077_v1 }
 0x3c6   : > { %5777 = vmatmul.msk.bf16.gmra.mxu3 %vm633_vm0, %v7078_v55 }
 0x3d2   : > { %5766 = vmatmul.msk.bf16.gmra.mxu0 %vm633_vm0, %v7079_v6  ;;  %5770 = vmatmul.msk.bf16.gmra.mxu1 %vm633_vm0, %v7080_v10  ;;  %v7089_v6 = vld [vmem:[%s7621_s27 + $0x10] sm:$0xff] }
 0x3d5   : > { %5774 = vmatmul.msk.bf16.gmra.mxu2 %vm633_vm0, %v7081_v20 }
 0x3d6   : > { %5778 = vmatmul.msk.bf16.gmra.mxu3 %vm633_vm0, %v7082_v15  ;;  %v6876_v15 = vld [vmem:[%s9719_s6 + $0x1b8] sm:$0xff] }
 0x3d7   : > { %2684 = vmatpush.bf16.msrb.mxu0 %v6876_v15 }
 0x3e2   : > { %5767 = vmatmul.msk.bf16.gmra.mxu0 %vm633_vm0, %v7083_v16  ;;  %5771 = vmatmul.msk.bf16.gmra.mxu1 %vm633_vm0, %v7084_v58 }
 0x3e5   : > { %5775 = vmatmul.msk.bf16.gmra.mxu2 %vm633_vm0, %v9836_v39 }
 0x3e6   : > { %5779 = vmatmul.msk.bf16.gmra.mxu3 %vm633_vm0, %v9837_v40 }
 0x3ef   : > { %v2042_v27 = vpop.f32.mrf.mxu0  ;;  %v2071_v24 = vpop.f32.mrf.mxu1 }
 0x3f0   : > { %v2091_v47 = vmax.f32 %v2042_v27, %v2071_v24  ;;  %v6875_v27 = vld [vmem:[%s9719_s6 + $0x1b0] sm:$0xff] }
 0x3f1   : > { %2685 = vmatpush.bf16.msrb.mxu0 %v6875_v27 }
 0x3f2   : > { %5780 = vmatmul.msk.bf16.vlgmr.msra.gmra.mxu0 %vm633_vm0, %v7085_v45  ;;  %5784 = vmatmul.msk.f32.vlgmr.msra.gmra.mxu1 %vm633_vm0, %v7086_v37  ;;  %v6874_v45 = vld [vmem:[%s9719_s6 + $0x1a8] sm:$0xff] }
 0x3f5   : > { %2686 = vmatpush.bf16.msrb.mxu0 %v6874_v45  ;;  %v7093_v45 = vld [vmem:[%s7621_s27 + $0x28] sm:$0xff] }
 0x3f6   : > { %2594 = vmatmul.bf16.vlgmr.msrb.gmra.mxu3 %v8152_v34 }
 0x3f7   : > { %v8345_v43 = vpop.f32.mrf.mxu0  ;;  %v8347_v17 = vpop.f32.mrf.mxu1 }
 0x3f8   : > { %v2108_v42 = vpop.f32.mrf.mxu2  ;;  %v8341_v25 = vpop.f32.mrf.mxu3 }
 0x3f9   : > { %v8343_v56 = vmax.f32 %v2091_v47, %v2108_v42 }
 0x3fa   : > { %5785 = vmatmul.msk.f32.gmra.mxu1 %vm633_vm0, %v7087_v23 }
 0x3fb   : > { %v2165_v59 = vmax.f32 %v8343_v56, %v8341_v25  ;;  %v6884_v25 = vld [vmem:[%s9719_s6 + $0x1f8] sm:$0xff] }
 0x3fc   : > { %2790 = vmatpush.bf16.msrb.mxu1 %v6884_v25 }
 0x3ff   : > { %v2047_v34 = vpop.f32.mrf.mxu0  ;;  %v2076_v3 = vpop.f32.mrf.mxu1 }
 0x400   : > { %v8353_v1 = vpop.f32.mrf.mxu2  ;;  %v8355_v55 = vpop.f32.mrf.mxu3  ;;  %v2093_v14 = vmax.f32 %v2047_v34, %v2076_v3  ;;  %v7091_v34 = vld [vmem:[%s7614_s23 + $0x10] sm:$0xff]  ;;  %v7092_v3 = vld [vmem:[%s7621_s27 + $0x20] sm:$0xff]  ;;  %2791 = vmatpush.bf16.msrb.mxu1 %v6883_v41 }
 0x402   : > { %5781 = vmatmul.msk.bf16.gmra.mxu0 %vm633_vm0, %v7088_v9  ;;  %5786 = vmatmul.msk.f32.gmra.mxu1 %vm633_vm0, %v7089_v6 }
 0x406   : > { %2599 = vmatmul.bf16.gmra.mxu3 %v8172_v60  ;;  %v7090_v60 = vld [vmem:[%s7621_s27 + $0x18] sm:$0xff] }
 0x407   : > { %v8369_v58 = vpop.f32.mrf.mxu0  ;;  %v8371_v39 = vpop.f32.mrf.mxu1 }
 0x408   : > { %v2113_v10 = vpop.f32.mrf.mxu2 }
 0x409   : > { %v8362_v20 = vpop.f32.mrf.mxu3  ;;  %v8367_v16 = vmax.f32 %v2093_v14, %v2113_v10  ;;  %v6873_v14 = vld [vmem:[%s9719_s6 + $0x1a0] sm:$0xff]  ;;  %v6872_v10 = vld [vmem:[%s9719_s6 + $0x198] sm:$0xff] }
 0x40a   : > { %5787 = vmatmul.msk.f32.gmra.mxu1 %vm633_vm0, %v7090_v60  ;;  %2687 = vmatpush.bf16.msrb.mxu0 %v6873_v14 }
 0x40e   : > { %2688 = vmatpush.bf16.msrb.mxu0 %v6872_v10  ;;  %v7094_v10 = vld [vmem:[%s7614_s23 + $0x18] sm:$0xff] }
 0x40f   : > { %v2052_v37 = vpop.f32.mrf.mxu0  ;;  %v2081_v42 = vpop.f32.mrf.mxu1 }
 0x410   : > { %v8380_v24 = vpop.f32.mrf.mxu2  ;;  %v2095_v23 = vmax.f32 %v2052_v37, %v2081_v42  ;;  %v6871_v37 = vld [vmem:[%s9719_s6 + $0x190] sm:$0xff] }
 0x411   : > { %v8382_v47 = vpop.f32.mrf.mxu3 }
 0x412   : > { %5782 = vmatmul.msk.bf16.gmra.mxu0 %vm633_vm0, %v7091_v34  ;;  %5788 = vmatmul.msk.f32.gmra.mxu1 %vm633_vm0, %v7092_v3  ;;  %v6870_v34 = vld [vmem:[%s9719_s6 + $0x188] sm:$0xff] }
 0x413   : > { %2689 = vmatpush.bf16.msrb.mxu0 %v6871_v37  ;;  %v6869_v37 = vld [vmem:[%s9719_s6 + $0x180] sm:$0xff] }
 0x416   : > { %2604 = vmatmul.bf16.gmra.mxu3 %v8192_v0 }
 0x417   : > { %v8402_v60 = vpop.f32.mrf.mxu0  ;;  %v8404_v27 = vpop.f32.mrf.mxu1  ;;  %2690 = vmatpush.bf16.msrb.mxu0 %v6870_v34 }
 0x418   : > { %v2118_v9 = vpop.f32.mrf.mxu2 }
 0x419   : > { %v8395_v6 = vpop.f32.mrf.mxu3  ;;  %v8400_v15 = vmax.f32 %v2095_v23, %v2118_v9 }
 0x41a   : > { %5789 = vmatmul.msk.f32.gmra.mxu1 %vm633_vm0, %v7093_v45  ;;  %v7095_v45 = vld [vmem:[%s7621_s27 + $0x30] sm:$0xff] }
 0x41b   : > { %2691 = vmatpush.bf16.msrb.mxu0 %v6869_v37 }
 0x41f   : > { %v2057_v3 = vpop.f32.mrf.mxu0  ;;  %v2086_v14 = vpop.f32.mrf.mxu1 }
 0x420   : > { %v8413_v42 = vpop.f32.mrf.mxu2  ;;  %v2097_v9 = vmax.f32 %v2057_v3, %v2086_v14 }
 0x421   : > { %v8415_v23 = vpop.f32.mrf.mxu3 }
 0x422   : > { %5783 = vmatmul.msk.bf16.gmra.mxu0 %vm633_vm0, %v7094_v10  ;;  %5790 = vmatmul.msk.f32.gmra.mxu1 %vm633_vm0, %v7095_v45  ;;  %v7096_v10 = vld [vmem:[%s7621_s27 + $0x38] sm:$0xff] }
 0x426   : > { %2609 = vmatmul.bf16.gmra.mxu3 %v8212_v46 }
 0x427   : > { %v8432_v3 = vpop.f32.mrf.mxu0  ;;  %v8434_v34 = vpop.f32.mrf.mxu1 }
 0x428   : > { %v2123_v62 = vpop.f32.mrf.mxu2 }
 0x429   : > { %v8428_v7 = vpop.f32.mrf.mxu3  ;;  %v8430_v50 = vmax.f32 %v2097_v9, %v2123_v62  ;;  %v2092_v62 = vmax.f32 %v8345_v43, %v8347_v17 }
 0x42a   : > { %5791 = vmatmul.msk.f32.gmra.mxu1 %vm633_vm0, %v7096_v10 }
 0x42b   : > { %v2129_v9 = vmax.f32 %v2092_v62, %v8353_v1 }
 0x42d   : > { %v2166_v35 = vmax.f32 %v2129_v9, %v8355_v55 }
 0x42f   : > { %v2182_v46 = vpop.f32.mrf.mxu0  ;;  %v2219_v37 = vpop.f32.mrf.mxu1 }
 0x430   : > { %v8440_v45 = vpop.f32.mrf.mxu2  ;;  %v2202_v30 = vmax.f32 %v2165_v59, %v2182_v46 }
 0x431   : > { %v8442_v13 = vpop.f32.mrf.mxu3 }
 0x432   : > { %v2239_v0 = vmax.f32 %v2202_v30, %v2219_v37 }
 0x437   : > { %v2184_v10 = vpop.f32.mrf.mxu0  ;;  %v2221_v14 = vpop.f32.mrf.mxu1 }
 0x438   : > { %v2256_v54 = vpop.f32.mrf.mxu2  ;;  %v2203_v40 = vmax.f32 %v2166_v35, %v2184_v10  ;;  %v6867_v35 = vld [vmem:[%s9719_s6 + $0x170] sm:$0xff] }
 0x439   : > { %v2293_v32 = vpop.f32.mrf.mxu3  ;;  %v2276_v49 = vmax.f32 %v2239_v0, %v2256_v54  ;;  %v2094_v54 = vmax.f32 %v8369_v58, %v8371_v39  ;;  %2510 = vmatpush.bf16.msrb.mxu2 %v6867_v35  ;;  %v6866_v0 = vld [vmem:[%s9719_s6 + $0x168] sm:$0xff]  ;;  %v9838_v58 = vmax.f32 %v8367_v16, %v8362_v20  ;;  %v6881_v16 = vld [vmem:[%s9719_s6 + $0x1e0] sm:$0xff] }
 0x43a   : > { %v2240_v43 = vmax.f32 %v2203_v40, %v2221_v14 }
 0x43b   : > { %v2313_v56 = vmax.f32 %v2276_v49, %v2293_v32  ;;  %v2131_v40 = vmax.f32 %v2094_v54, %v8380_v24  ;;  %v6882_v24 = vld [vmem:[%s9719_s6 + $0x1e8] sm:$0xff] }
 0x43c   : > { %2792 = vmatpush.bf16.msrb.mxu1 %v6882_v24 }
 0x43d   : > { %v2321_v32 = vadd.f32 %v2313_v56, %v8264_v19  ;;  %2511 = vmatpush.bf16.msrb.mxu2 %v6866_v0  ;;  %v2168_v9 = vmax.f32 %v2131_v40, %v8382_v47  ;;  %v6864_v47 = vld [vmem:[%s9719_s6 + $0x158] sm:$0xff]  ;;  %v6863_v40 = vld [vmem:[%s9719_s6 + $0x150] sm:$0xff] }
 0x43e   : > { %v6879_v0 = vld [vmem:[%s9719_s6 + $0x1d0] sm:$0xff] }
 0x43f   : > { %v2187_v55 = vpop.f32.mrf.mxu0  ;;  %v2224_v46 = vpop.f32.mrf.mxu1 }
 0x440   : > { %v2258_v17 = vpop.f32.mrf.mxu2  ;;  %v2204_v39 = vmax.f32 %v9838_v58, %v2187_v55  ;;  %2793 = vmatpush.bf16.msrb.mxu1 %v6881_v16 }
 0x441   : > { %v2295_v1 = vpop.f32.mrf.mxu3  ;;  %v2277_v59 = vmax.f32 %v2240_v43, %v2258_v17  ;;  %v6865_v17 = vld [vmem:[%s9719_s6 + $0x160] sm:$0xff] }
 0x442   : > { %2512 = vmatpush.bf16.msrb.mxu2 %v6865_v17 }
 0x443   : > { %v2314_v30 = vmax.f32 %v2277_v59, %v2295_v1  ;;  %v2241_v1 = vmax.f32 %v2204_v39, %v2224_v46  ;;  %v6880_v46 = vld [vmem:[%s9719_s6 + $0x1d8] sm:$0xff] }
 0x444   : > { %2794 = vmatpush.bf16.msrb.mxu1 %v6880_v46 }
 0x445   : > { %v2322_v49 = vadd.f32 %v2314_v30, %v8266_v53 }
 0x446   : > { %2513 = vmatpush.bf16.msrb.mxu2 %v6864_v47 }
 0x447   : > { %v2615_v14 = vpack.c.bf16 %v2322_v49, %v2321_v32  ;;  %v2189_v10 = vpop.f32.mrf.mxu0  ;;  %v2226_v43 = vpop.f32.mrf.mxu1  ;;  %v2096_v32 = vmax.f32 %v8402_v60, %v8404_v27  ;;  %v9839_v60 = vmax.f32 %v8400_v15, %v8395_v6 }
 0x448   : > { %v2261_v37 = vpop.f32.mrf.mxu2  ;;  %v2205_v20 = vmax.f32 %v2168_v9, %v2189_v10  ;;  %2795 = vmatpush.bf16.msrb.mxu1 %v6879_v0 }
 0x449   : > { %v2298_v62 = vpop.f32.mrf.mxu3  ;;  %2692 = vmatmul.bf16.vlgmr.msrb.gmra.mxu0 %v2615_v14  ;;  %v2278_v25 = vmax.f32 %v2241_v1, %v2261_v37  ;;  %v2133_v14 = vmax.f32 %v2096_v32, %v8413_v42  ;;  %v6862_v37 = vld [vmem:[%s9719_s6 + $0x148] sm:$0xff]  ;;  %v6861_v1 = vld [vmem:[%s9719_s6 + $0x140] sm:$0xff]  ;;  %v9840_v32 = vmax.f32 %v8430_v50, %v8428_v7  ;;  %v9841_v50 = vmax.f32 %v8139_v8, 0.0 }
 0x44a   : > { %v2242_v56 = vmax.f32 %v2205_v20, %v2226_v43  ;;  %2514 = vmatpush.bf16.msrb.mxu2 %v6863_v40  ;;  %v6878_v42 = vld [vmem:[%s9719_s6 + $0x1c8] sm:$0xff]  ;;  %v6877_v20 = vld [vmem:[%s9719_s6 + $0x1c0] sm:$0xff] }
 0x44b   : > { %v2315_v35 = vmax.f32 %v2278_v25, %v2298_v62  ;;  %v2170_v10 = vmax.f32 %v2133_v14, %v8415_v23  ;;  %v2358_v7 = vsub.f32 %v8264_v19, %v9841_v50  ;;  %v9848_v50 = vmax.f32 %v8184_v51, 0.0 }
 0x44c   : > { %2796 = vmatpush.bf16.msrb.mxu1 %v6878_v42 }
 0x44d   : > { %v2323_v58 = vadd.f32 %v2315_v35, %v8285_v26  ;;  %v2098_v35 = vmax.f32 %v8432_v3, %v8434_v34 }
 0x44e   : > { %2515 = vmatpush.bf16.msrb.mxu2 %v6862_v37 }
 0x44f   : > { %v2192_v30 = vpop.f32.mrf.mxu0  ;;  %v2229_v41 = vpop.f32.mrf.mxu1 }
 0x450   : > { %v2263_v59 = vpop.f32.mrf.mxu2  ;;  %v2206_v27 = vmax.f32 %v9839_v60, %v2192_v30  ;;  %2797 = vmatpush.bf16.msrb.mxu1 %v6877_v20  ;;  %v2135_v30 = vmax.f32 %v2098_v35, %v8440_v45  ;;  %v9843_v20 = vld [vmem:[#allocation18_spill] sm:$0xff] }
 0x451   : > { %v2300_v55 = vpop.f32.mrf.mxu3  ;;  %v2279_v54 = vmax.f32 %v2242_v56, %v2263_v59 }
 0x452   : > { %v2243_v6 = vmax.f32 %v2206_v27, %v2229_v41  ;;  %2516 = vmatpush.bf16.msrb.mxu2 %v6861_v1 }
 0x453   : > { %v2316_v49 = vmax.f32 %v2279_v54, %v2300_v55 }
 0x455   : > { %v2324_v39 = vadd.f32 %v2316_v49, %v8304_v61 }
 0x457   : > { %v2616_v62 = vpack.c.bf16 %v2324_v39, %v2323_v58  ;;  %v2194_v43 = vpop.f32.mrf.mxu0  ;;  %v2231_v17 = vpop.f32.mrf.mxu1  ;;  %v2172_v39 = vmax.f32 %v2135_v30, %v8442_v13  ;;  %v9842_v13 = vmax.f32 %v8144_v52, 0.0 }
 0x458   : > { %v2266_v24 = vpop.f32.mrf.mxu2  ;;  %v2207_v15 = vmax.f32 %v2170_v10, %v2194_v43 }
 0x459   : > { %v2303_v9 = vpop.f32.mrf.mxu3  ;;  %2697 = vmatmul.bf16.gmra.mxu0 %v2616_v62  ;;  %v2280_v16 = vmax.f32 %v2243_v6, %v2266_v24  ;;  %v2359_v1 = vsub.f32 %v8266_v53, %v9842_v13 }
 0x45a   : > { %v2244_v25 = vmax.f32 %v2207_v15, %v2231_v17 }
 0x45b   : > { %v2317_v56 = vmax.f32 %v2280_v16, %v2303_v9  ;;  %v2366_v16 = vmul.f32 %v2358_v7, %v9843_v20  ;;  %v2363_v7 = vsub.f32 %v8322_v31, %v9848_v50  ;;  %v6034_v50 = vld [vmem:[%s9718_s5 + $0x140] sm:$0xf] }
 0x45d   : > { %v2325_v41 = vadd.f32 %v2317_v56, %v8312_v57 }
 0x45f   : > { %v2197_v55 = vpop.f32.mrf.mxu0  ;;  %v2234_v46 = vpop.f32.mrf.mxu1 }
 0x460   : > { %v2268_v47 = vpop.f32.mrf.mxu2  ;;  %v2208_v49 = vmax.f32 %v9840_v32, %v2197_v55  ;;  %v9844_v32 = vmax.f32 %v8159_v28, 0.0 }
 0x461   : > { %v2305_v23 = vpop.f32.mrf.mxu3  ;;  %v2281_v59 = vmax.f32 %v2244_v25, %v2268_v47 }
 0x462   : > { %v2245_v3 = vmax.f32 %v2208_v49, %v2234_v46  ;;  %v2360_v49 = vsub.f32 %v8285_v26, %v9844_v32 }
 0x463   : > { %v2318_v54 = vmax.f32 %v2281_v59, %v2305_v23  ;;  %v2367_v23 = vmul.f32 %v2359_v1, %v7855_v36 }
 0x465   : > { %v2326_v40 = vadd.f32 %v2318_v54, %v8322_v31 }
 0x467   : > { %v2617_v0 = vpack.c.bf16 %v2326_v40, %v2325_v41  ;;  %v2199_v37 = vpop.f32.mrf.mxu0  ;;  %v2236_v60 = vpop.f32.mrf.mxu1 }
 0x468   : > { %v2271_v14 = vpop.f32.mrf.mxu2  ;;  %v2209_v34 = vmax.f32 %v2172_v39, %v2199_v37 }
 0x469   : > { %v2308_v58 = vpop.f32.mrf.mxu3  ;;  %2702 = vmatmul.bf16.gmra.mxu0 %v2617_v0  ;;  %v2282_v27 = vmax.f32 %v2245_v3, %v2271_v14  ;;  %v9845_v0 = vmax.f32 %v8164_v48, 0.0 }
 0x46a   : > { %v2246_v45 = vmax.f32 %v2209_v34, %v2236_v60 }
 0x46b   : > { %v2319_v24 = vmax.f32 %v2282_v27, %v2308_v58  ;;  %v2361_v14 = vsub.f32 %v8304_v61, %v9845_v0  ;;  %v9846_v58 = vld [vmem:[#allocation21_spill] sm:$0xff] }
 0x46d   : > { %v2327_v6 = vadd.f32 %v2319_v24, %v8328_v5  ;;  %v2369_v39 = vmul.f32 %v2361_v14, %v9846_v58 }
 0x46f   : > { %v2338_v42 = vpop.f32.mrf.mxu0  ;;  %v2391_v10 = vpop.f32.mrf.mxu1 }
 0x470   : > { %v2273_v62 = vpop.f32.mrf.mxu2  ;;  %v2392_v47 = vadd.f32 %v2391_v10, %v2366_v16  ;;  %v2339_v59 = vadd.f32 %v2338_v42, %v8264_v19  ;;  %v2368_v19 = vmul.f32 %v2360_v49, %v7870_v4  ;;  %v9847_v42 = vmax.f32 %v8179_v33, 0.0 }
 0x471   : > { %v2283_v9 = vmax.f32 %v2246_v45, %v2273_v62  ;;  %v2310_v43 = vpop.f32.mrf.mxu3 }
 0x472   : > { %v2415_v46 = vand.u32 2147483647, %v2392_v47  ;;  %v2362_v10 = vsub.f32 %v8312_v57, %v9847_v42  ;;  %v6044_v42 = vld [vmem:[%s9718_s5 + $0x158] sm:$0xf0] }
 0x473   : > { %v2320_v17 = vmax.f32 %v2283_v9, %v2310_v43 }
 0x475   : > { %v2328_v15 = vadd.f32 %v2320_v17, %v8334_v12  ;;  %v9850_v17 = vld [vmem:[#allocation23_spill] sm:$0xff] }
 0x476   : > { %v2371_v13 = vmul.f32 %v2363_v7, %v9850_v17  ;;  %v6894_v7 = vld [vmem:[%s9718_s5 + $0x144] sm:$0xf0] }
 0x477   : > { %v2618_v25 = vpack.c.bf16 %v2328_v15, %v2327_v6  ;;  %v2340_v8 = vpop.f32.mrf.mxu0  ;;  %v2394_v56 = vpop.f32.mrf.mxu1 }
 0x478   : > { %v2341_v55 = vadd.f32 %v2340_v8, %v8266_v53  ;;  %v2395_v52 = vadd.f32 %v2394_v56, %v2367_v23 }
 0x479   : > { %2707 = vmatmul.bf16.gmra.mxu0 %v2618_v25 }
 0x47a   : > { %v2440_v35 = vpack.c.bf16 %v2341_v55, %v2339_v59  ;;  %v2416_v54 = vand.u32 2147483647, %v2395_v52  ;;  %v9851_v59 = vmax.f32 %v8199_v2, 0.0  ;;  %v9852_v52 = vmax.f32 %v8204_v11, 0.0  ;;  %v6058_v11 = vld [vmem:[%s9718_s5 + $0x170] sm:$0xf] }
 0x47c   : > { %v2721_v30 = vpack.c.bf16 %v2416_v54, %v2415_v46  ;;  %2517 = vmatmul.bf16.vlgmr.msrb.gmra.mxu2 %v2440_v35  ;;  %v2364_v55 = vsub.f32 %v8328_v5, %v9851_v59  ;;  %v2365_v46 = vsub.f32 %v8334_v12, %v9852_v52  ;;  %v6020_v59 = vld [vmem:[%s9718_s5 + $0x128] sm:$0xf0]  ;;  %v6010_v52 = vld [vmem:[%s9718_s5 + $0x110] sm:$0xf] }
 0x47e   : > { %2798 = vmatmul.bf16.vlgmr.msrb.gmra.mxu1 %v2721_v30  ;;  %v2373_v54 = vmul.f32 %v2365_v46, %v7957_v29  ;;  %v6888_v46 = vld [vmem:[%s9718_s5 + $0x114] sm:$0xf0] }
 0x47f   : > { %v2343_v41 = vpop.f32.mrf.mxu0  ;;  %v2397_v40 = vpop.f32.mrf.mxu1 }
 0x480   : > { %v2398_v53 = vadd.f32 %v2397_v40, %v2368_v19  ;;  %v2344_v3 = vadd.f32 %v2343_v41, %v8285_v26  ;;  %v9849_v26 = vld [vmem:[#allocation22_spill] sm:$0xff] }
 0x481   : > { %v2370_v43 = vmul.f32 %v2362_v10, %v9849_v26 }
 0x482   : > { %v2417_v45 = vand.u32 2147483647, %v2398_v53  ;;  %v6900_v53 = vld [vmem:[%s9718_s5 + $0x174] sm:$0xf0] }
 0x487   : > { %v2345_v37 = vpop.f32.mrf.mxu0  ;;  %v2400_v60 = vpop.f32.mrf.mxu1 }
 0x488   : > { %v2346_v34 = vadd.f32 %v2345_v37, %v8304_v61  ;;  %v2401_v27 = vadd.f32 %v2400_v60, %v2369_v39  ;;  %v6060_v39 = vld [vmem:[%s9718_s5 + $0x178] sm:$0xf0]  ;;  %v6050_v37 = vld [vmem:[%s9718_s5 + $0x160] sm:$0xf]  ;;  %v6898_v60 = vld [vmem:[%s9718_s5 + $0x164] sm:$0xf0] }
 0x48a   : > { %v2441_v28 = vpack.c.bf16 %v2346_v34, %v2344_v3  ;;  %v2418_v62 = vand.u32 2147483647, %v2401_v27  ;;  %v6897_v34 = vld [vmem:[%s9718_s5 + $0x164] sm:$0xf]  ;;  %v6052_v27 = vld [vmem:[%s9718_s5 + $0x168] sm:$0xf0] }
 0x48c   : > { %2522 = vmatmul.bf16.gmra.mxu2 %v2441_v28  ;;  %v2722_v24 = vpack.c.bf16 %v2418_v62, %v2417_v45  ;;  %v6051_v45 = vor.u32 %v6898_v60, %v6050_v37  ;;  %v6055_v28 = vor.u32 %v6897_v34, %v6052_v27  ;;  %v6042_v62 = vld [vmem:[%s9718_s5 + $0x150] sm:$0xf] }
 0x48e   : > { %2803 = vmatmul.bf16.gmra.mxu1 %v2722_v24  ;;  %v6896_v24 = vld [vmem:[%s9718_s5 + $0x154] sm:$0xf0] }
 0x48f   : > { %v2348_v48 = vpop.f32.mrf.mxu0  ;;  %v2403_v9 = vpop.f32.mrf.mxu1 }
 0x490   : > { %v2404_v61 = vadd.f32 %v2403_v9, %v2370_v43  ;;  %v2349_v15 = vadd.f32 %v2348_v48, %v8312_v57  ;;  %v9853_v57 = vld [vmem:[#allocation24_spill] sm:$0xff]  ;;  %v6895_v48 = vld [vmem:[%s9718_s5 + $0x154] sm:$0xf]  ;;  %v6043_v9 = vor.u32 %v6896_v24, %v6042_v62  ;;  %v6893_v43 = vld [vmem:[%s9718_s5 + $0x144] sm:$0xf] }
 0x491   : > { %v2372_v35 = vmul.f32 %v2364_v55, %v9853_v57  ;;  %v6047_v10 = vor.u32 %v6895_v48, %v6044_v42 }
 0x492   : > { %v2419_v47 = vand.u32 2147483647, %v2404_v61  ;;  %v6035_v61 = vor.u32 %v6894_v7, %v6034_v50 }
 0x497   : > { %v2350_v1 = vpop.f32.mrf.mxu0  ;;  %v2406_v6 = vpop.f32.mrf.mxu1 }
 0x498   : > { %v2351_v16 = vadd.f32 %v2350_v1, %v8322_v31  ;;  %v2407_v25 = vadd.f32 %v2406_v6, %v2371_v13  ;;  %v6036_v13 = vld [vmem:[%s9718_s5 + $0x148] sm:$0xf0]  ;;  %v6026_v6 = vld [vmem:[%s9718_s5 + $0x130] sm:$0xf] }
 0x499   : > { %v6039_v1 = vor.u32 %v6893_v43, %v6036_v13 }
 0x49a   : > { %v2442_v33 = vpack.c.bf16 %v2351_v16, %v2349_v15  ;;  %v2420_v23 = vand.u32 2147483647, %v2407_v25  ;;  %v6892_v15 = vld [vmem:[%s9718_s5 + $0x134] sm:$0xf0]  ;;  %v6891_v16 = vld [vmem:[%s9718_s5 + $0x134] sm:$0xf] }
 0x49b   : > { %v6027_v25 = vor.u32 %v6892_v15, %v6026_v6 }
 0x49c   : > { %2527 = vmatmul.bf16.gmra.mxu2 %v2442_v33  ;;  %v2723_v8 = vpack.c.bf16 %v2420_v23, %v2419_v47  ;;  %v6028_v47 = vld [vmem:[%s9718_s5 + $0x138] sm:$0xf0]  ;;  %v6018_v23 = vld [vmem:[%s9718_s5 + $0x120] sm:$0xf] }
 0x49d   : > { %v6031_v33 = vor.u32 %v6891_v16, %v6028_v47 }
 0x49e   : > { %2808 = vmatmul.bf16.gmra.mxu1 %v2723_v8  ;;  %v6890_v8 = vld [vmem:[%s9718_s5 + $0x124] sm:$0xf0] }
 0x49f   : > { %v2353_v51 = vpop.f32.mrf.mxu0  ;;  %v2409_v56 = vpop.f32.mrf.mxu1 }
 0x4a0   : > { %v2410_v31 = vadd.f32 %v2409_v56, %v2372_v35  ;;  %v2354_v40 = vadd.f32 %v2353_v51, %v8328_v5  ;;  %v6899_v5 = vld [vmem:[%s9718_s5 + $0x174] sm:$0xf]  ;;  %v6889_v51 = vld [vmem:[%s9718_s5 + $0x124] sm:$0xf]  ;;  %v6019_v56 = vor.u32 %v6890_v8, %v6018_v23 }
 0x4a1   : > { %v6063_v3 = vor.u32 %v6899_v5, %v6060_v39  ;;  %v6023_v55 = vor.u32 %v6889_v51, %v6020_v59  ;;  %v6887_v35 = vld [vmem:[%s9718_s5 + $0x114] sm:$0xf] }
 0x4a2   : > { %v2421_v0 = vand.u32 2147483647, %v2410_v31  ;;  %v6011_v31 = vor.u32 %v6888_v46, %v6010_v52 }
 0x4a3   : > { %2973 = vmatpush.bf16.msra.mxu3 %v6063_v3 }
 0x4a7   : > { %v2355_v30 = vpop.f32.mrf.mxu0  ;;  %v2412_v41 = vpop.f32.mrf.mxu1  ;;  %2974 = vmatpush.bf16.msra.mxu3 %v6055_v28 }
 0x4a8   : > { %v2356_v32 = vadd.f32 %v2355_v30, %v8334_v12  ;;  %v2413_v49 = vadd.f32 %v2412_v41, %v2373_v54  ;;  %v6059_v12 = vor.u32 %v6900_v53, %v6058_v11  ;;  %v6012_v54 = vld [vmem:[%s9718_s5 + $0x118] sm:$0xf0]  ;;  %v6002_v41 = vld [vmem:[%s9718_s5 + $0x100] sm:$0xf] }
 0x4a9   : > { %v6015_v30 = vor.u32 %v6887_v35, %v6012_v54 }
 0x4aa   : > { %v2443_v2 = vpack.c.bf16 %v2356_v32, %v2354_v40  ;;  %v2422_v14 = vand.u32 2147483647, %v2413_v49  ;;  %2944 = vmatpush.bf16.msra.mxu2 %v6059_v12  ;;  %v6886_v40 = vld [vmem:[%s9718_s5 + $0x104] sm:$0xf0]  ;;  %v6885_v32 = vld [vmem:[%s9718_s5 + $0x104] sm:$0xf] }
 0x4ab   : > { %2975 = vmatpush.bf16.msra.mxu3 %v6047_v10  ;;  %v6003_v49 = vor.u32 %v6886_v40, %v6002_v41 }
 0x4ac   : > { %2532 = vmatmul.bf16.gmra.mxu2 %v2443_v2  ;;  %v2724_v19 = vpack.c.bf16 %v2422_v14, %v2421_v0  ;;  %v6004_v0 = vld [vmem:[%s9718_s5 + $0x108] sm:$0xf0]  ;;  %v2595_v2 = vpop.f32.mrf.mxu3 }
 0x4ad   : > { %v6007_v14 = vor.u32 %v6885_v32, %v6004_v0 }
 0x4ae   : > { %2813 = vmatmul.bf16.gmra.mxu1 %v2724_v19  ;;  %2945 = vmatpush.bf16.msra.mxu2 %v6051_v45 }
 0x4af   : > { %2976 = vmatpush.bf16.msra.mxu3 %v6039_v1 }
 0x4b2   : > { %2946 = vmatpush.bf16.msra.mxu2 %v6043_v9 }
 0x4b3   : > { %2977 = vmatpush.bf16.msra.mxu3 %v6031_v33 }
 0x4b4   : > { %v2597_v11 = vpop.f32.mrf.mxu3 }
 0x4b6   : > { %2947 = vmatpush.bf16.msra.mxu2 %v6035_v61 }
 0x4b7   : > { %2978 = vmatpush.bf16.msra.mxu3 %v6023_v55 }
 0x4ba   : > { %2948 = vmatpush.bf16.msra.mxu2 %v6027_v25 }
 0x4bb   : > { %2979 = vmatpush.bf16.msra.mxu3 %v6015_v30 }
 0x4bc   : > { %v2600_v3 = vpop.f32.mrf.mxu3 }
 0x4be   : > { %2949 = vmatpush.bf16.msra.mxu2 %v6019_v56 }
 0x4bf   : > { %2980 = vmatpush.bf16.msra.mxu3 %v6007_v14 }
 0x4c2   : > { %2950 = vmatpush.bf16.msra.mxu2 %v6011_v31 }
 0x4c4   : > { %v2602_v10 = vpop.f32.mrf.mxu3 }
 0x4c6   : > { %2951 = vmatpush.bf16.msra.mxu2 %v6003_v49  ;;  %v2693_v19 = vpop.f32.mrf.mxu0 }
 0x4cc   : > { %v2605_v33 = vpop.f32.mrf.mxu3 }
 0x4ce   : > { %v2695_v5 = vpop.f32.mrf.mxu0 }
 0x4d4   : > { %v2607_v30 = vpop.f32.mrf.mxu3 }
 0x4d6   : > { %v2698_v34 = vpop.f32.mrf.mxu0 }
 0x4de   : > { %v2700_v13 = vpop.f32.mrf.mxu0 }
 0x4e6   : > { %v2703_v8 = vpop.f32.mrf.mxu0 }
 0x4ee   : > { %v2705_v40 = vpop.f32.mrf.mxu0 }
 0x4fb   : > { %v2799_v53 = vpop.f32.mrf.mxu1 }
 0x4ff   : > { %v2518_v12 = vpop.f32.mrf.mxu2 }
 0x500   : > { %v2596_v39 = vadd.f32 %v2595_v2, %v2518_v12  ;;  %v2708_v12 = vpop.f32.mrf.mxu0 }
 0x502   : > { %v2713_v60 = vadd.f32 %v2693_v19, %v2596_v39 }
 0x503   : > { %v2801_v37 = vpop.f32.mrf.mxu1 }
 0x504   : > { %v2819_v45 = vadd.f32 %v2799_v53, %v2713_v60  ;;  %v2610_v53 = vpop.f32.mrf.mxu3 }
 0x506   : > { %v8665_v48 = vmul.f32 %v2819_v45, %v8136_v38 }
 0x507   : > { %v2520_v27 = vpop.f32.mrf.mxu2 }
 0x508   : > { %v2598_v28 = vadd.f32 %v2597_v11, %v2520_v27  ;;  %v9758_v7 = vmax.f32 %v8665_v48, 0.0 }
 0x50a   : > { %v2714_v62 = vadd.f32 %v2695_v5, %v2598_v28 }
 0x50b   : > { %v2804_v24 = vpop.f32.mrf.mxu1 }
 0x50c   : > { %v2820_v9 = vadd.f32 %v2801_v37, %v2714_v62  ;;  %v2612_v28 = vpop.f32.mrf.mxu3 }
 0x50e   : > { %v8668_v42 = vmul.f32 %v2820_v9, %v8141_v63  ;;  %v6916_v63 = vld [vmem:[%s9719_s6 + $0x278] sm:$0xff] }
 0x50f   : > { %v2523_v50 = vpop.f32.mrf.mxu2 }
 0x510   : > { %v9757_v43 = vmax.f32 %v8668_v42, 0.0  ;;  %v2601_v61 = vadd.f32 %v2600_v3, %v2523_v50 }
 0x512   : > { %v8676_v1 = vpack.c.bf16 %v9757_v43, %v9758_v7  ;;  %v2715_v15 = vadd.f32 %v2698_v34, %v2601_v61 }
 0x513   : > { %v2806_v6 = vpop.f32.mrf.mxu1 }
 0x514   : > { %2952 = vmatmul.bf16.vlgmr.msra.gmra.mxu2 %v8676_v1  ;;  %2981 = vmatmul.bf16.vlgmr.msra.gmra.mxu3 %v8676_v1  ;;  %v2821_v25 = vadd.f32 %v2804_v24, %v2715_v15 }
 0x516   : > { %v8681_v56 = vmul.f32 %v2821_v25, %v8156_v44 }
 0x517   : > { %v2525_v16 = vpop.f32.mrf.mxu2 }
 0x518   : > { %v2603_v47 = vadd.f32 %v2602_v10, %v2525_v16  ;;  %v9756_v35 = vmax.f32 %v8681_v56, 0.0  ;;  %v2710_v10 = vpop.f32.mrf.mxu0  ;;  %v9855_v16 = vld [vmem:[#allocation20_spill] sm:$0xff] }
 0x51a   : > { %v2716_v23 = vadd.f32 %v2700_v13, %v2603_v47 }
 0x51b   : > { %v2809_v59 = vpop.f32.mrf.mxu1 }
 0x51c   : > { %v2822_v51 = vadd.f32 %v2806_v6, %v2716_v23  ;;  %v9854_v6 = vld [vmem:[#allocation9_spill] sm:$0xff] }
 0x51e   : > { %v8684_v55 = vmul.f32 %v2822_v51, %v8161_v22 }
 0x51f   : > { %v2528_v52 = vpop.f32.mrf.mxu2 }
 0x520   : > { %v2606_v46 = vadd.f32 %v2605_v33, %v2528_v52  ;;  %v9755_v31 = vmax.f32 %v8684_v55, 0.0 }
 0x522   : > { %v8692_v54 = vpack.c.bf16 %v9755_v31, %v9756_v35  ;;  %v2717_v41 = vadd.f32 %v2703_v8, %v2606_v46  ;;  %v7138_v31 = vld [vmem:[%s7614_s23 + $0x18] sm:$0xff] }
 0x523   : > { %v2811_v32 = vpop.f32.mrf.mxu1 }
 0x524   : > { %2957 = vmatmul.bf16.gmra.mxu2 %v8692_v54  ;;  %2986 = vmatmul.bf16.gmra.mxu3 %v8692_v54  ;;  %v2823_v0 = vadd.f32 %v2809_v59, %v2717_v41 }
 0x526   : > { %v8697_v11 = vmul.f32 %v2823_v0, %v8176_v21 }
 0x527   : > { %v2530_v49 = vpop.f32.mrf.mxu2 }
 0x528   : > { %v2608_v2 = vadd.f32 %v2607_v30, %v2530_v49  ;;  %v9754_v60 = vmax.f32 %v8697_v11, 0.0 }
 0x52a   : > { %v2718_v14 = vadd.f32 %v2705_v40, %v2608_v2 }
 0x52b   : > { %v2814_v34 = vpop.f32.mrf.mxu1 }
 0x52c   : > { %v2824_v19 = vadd.f32 %v2811_v32, %v2718_v14  ;;  %v7097_v14 = vld [vmem:[%s7537_s14] sm:$0xff] }
 0x52e   : > { %v8700_v5 = vmul.f32 %v2824_v19, %v8181_v18  ;;  %v7098_v19 = vld [vmem:[%s7537_s14 + $0x20] sm:$0xff] }
 0x52f   : > { %v2533_v39 = vpop.f32.mrf.mxu2 }
 0x530   : > { %v2611_v37 = vadd.f32 %v2610_v53, %v2533_v39  ;;  %v9753_v3 = vmax.f32 %v8700_v5, 0.0  ;;  %v7099_v53 = vld [vmem:[%s7537_s14 + $0x40] sm:$0xff]  ;;  %v7101_v39 = vld [vmem:[%s7537_s14 + $0x8] sm:$0xff] }
 0x532   : > { %v8708_v27 = vpack.c.bf16 %v9753_v3, %v9754_v60  ;;  %v2719_v45 = vadd.f32 %v2708_v12, %v2611_v37  ;;  %v7100_v12 = vld [vmem:[%s7537_s14 + $0x60] sm:$0xff]  ;;  %v7102_v37 = vld [vmem:[%s7537_s14 + $0x28] sm:$0xff] }
 0x533   : > { %v2816_v61 = vpop.f32.mrf.mxu1 }
 0x534   : > { %2962 = vmatmul.bf16.gmra.mxu2 %v8708_v27  ;;  %2991 = vmatmul.bf16.gmra.mxu3 %v8708_v27  ;;  %v2825_v24 = vadd.f32 %v2814_v34, %v2719_v45  ;;  %v7103_v34 = vld [vmem:[%s7537_s14 + $0x48] sm:$0xff] }
 0x535   : > { %v7104_v45 = vld [vmem:[%s7537_s14 + $0x68] sm:$0xff] }
 0x536   : > { %v8713_v15 = vmul.f32 %v2825_v24, %v9854_v6  ;;  %v7107_v24 = vld [vmem:[%s7537_s14 + $0x50] sm:$0xff] }
 0x537   : > { %v2535_v62 = vpop.f32.mrf.mxu2 }
 0x538   : > { %v2613_v9 = vadd.f32 %v2612_v28, %v2535_v62  ;;  %v9752_v47 = vmax.f32 %v8713_v15, 0.0  ;;  %v7105_v28 = vld [vmem:[%s7537_s14 + $0x10] sm:$0xff] }
 0x539   : > { %v7106_v62 = vld [vmem:[%s7537_s14 + $0x30] sm:$0xff] }
 0x53a   : > { %v2720_v50 = vadd.f32 %v2710_v10, %v2613_v9  ;;  %v7108_v9 = vld [vmem:[%s7537_s14 + $0x70] sm:$0xff]  ;;  %v7109_v10 = vld [vmem:[%s7537_s14 + $0x18] sm:$0xff] }
 0x53c   : > { %v2826_v13 = vadd.f32 %v2816_v61, %v2720_v50  ;;  %v7110_v50 = vld [vmem:[%s7537_s14 + $0x38] sm:$0xff] }
 0x53d   : > { %v7111_v61 = vld [vmem:[%s7537_s14 + $0x58] sm:$0xff] }
 0x53e   : > { %v8716_v25 = vmul.f32 %v2826_v13, %v9855_v16  ;;  %v7112_v13 = vld [vmem:[%s7537_s14 + $0x78] sm:$0xff] }
 0x540   : > { %v9751_v33 = vmax.f32 %v8716_v25, 0.0 }
 0x542   : > { %v8724_v23 = vpack.c.bf16 %v9751_v33, %v9752_v47  ;;  %v6918_v47 = vld [vmem:[%s9719_s6 + $0x288] sm:$0xff] }
 0x544   : > { %2967 = vmatmul.bf16.gmra.mxu2 %v8724_v23  ;;  %2996 = vmatmul.bf16.gmra.mxu3 %v8724_v23 }
 0x597   : > { %v8728_v8 = vpop.f32.mrf.mxu2 }
 0x59f   : > { %v8730_v51 = vpop.f32.mrf.mxu2 }
 0x5a0   : > { %v3002_v2 = vpack.c.bf16 %v8730_v51, %v8728_v8 }
 0x5a7   : > { %v8732_v59 = vpop.f32.mrf.mxu2 }
 0x5af   : > { %v8734_v52 = vpop.f32.mrf.mxu2 }
 0x5b0   : > { %v3003_v0 = vpack.c.bf16 %v8734_v52, %v8732_v59 }
 0x5b7   : > { %v2963_v46 = vpop.f32.mrf.mxu2 }
 0x5bf   : > { %v2965_v30 = vpop.f32.mrf.mxu2 }
 0x5c0   : > { %v3004_v49 = vpack.c.bf16 %v2965_v30, %v2963_v46 }
 0x5c7   : > { %v2968_v41 = vpop.f32.mrf.mxu2 }
 0x5cf   : > { %v2970_v40 = vpop.f32.mrf.mxu2 }
 0x5d0   : > { %v3005_v32 = vpack.c.bf16 %v2970_v40, %v2968_v41 }
 0x5d2   : > { %3010 = vmatpush.bf16.msra.mxu0 %v3005_v32  ;;  %3039 = vmatpush.bf16.msra.mxu1 %v3005_v32 }
 0x5d3   : > { %3076 = vmatpush.bf16.msrb.mxu2 %v3005_v32  ;;  %3113 = vmatpush.bf16.msrb.mxu3 %v3005_v32 }
 0x5d6   : > { %3011 = vmatpush.bf16.msra.mxu0 %v3004_v49  ;;  %3040 = vmatpush.bf16.msra.mxu1 %v3004_v49 }
 0x5d7   : > { %3077 = vmatpush.bf16.msrb.mxu2 %v3004_v49  ;;  %3114 = vmatpush.bf16.msrb.mxu3 %v3004_v49 }
 0x5da   : > { %3012 = vmatpush.bf16.msra.mxu0 %v3003_v0  ;;  %3041 = vmatpush.bf16.msra.mxu1 %v3003_v0 }
 0x5db   : > { %3078 = vmatpush.bf16.msrb.mxu2 %v3003_v0  ;;  %3115 = vmatpush.bf16.msrb.mxu3 %v3003_v0 }
 0x5de   : > { %3013 = vmatpush.bf16.msra.mxu0 %v3002_v2  ;;  %3042 = vmatpush.bf16.msra.mxu1 %v3002_v2 }
 0x5df   : > { %3079 = vmatpush.bf16.msrb.mxu2 %v3002_v2  ;;  %3116 = vmatpush.bf16.msrb.mxu3 %v3002_v2 }
 0x5e1   : > { %6064 = vmatmul.msk.bf16.vlgmr.msra.gmra.mxu0 %vm633_vm0, %v7097_v14  ;;  %6068 = vmatmul.msk.bf16.vlgmr.msra.gmra.mxu1 %vm633_vm0, %v7098_v19  ;;  %v7118_v14 = vld [vmem:[%s7537_s14 + $0xa8] sm:$0xff]  ;;  %v6904_v19 = vld [vmem:[%s9719_s6 + $0x218] sm:$0xff] }
 0x5e2   : > { %3150 = vmatpush.bf16.msrb.mxu0 %v3005_v32  ;;  %3187 = vmatpush.bf16.msrb.mxu1 %v3005_v32 }
 0x5e3   : > { %3224 = vmatpush.bf16.msra.mxu2 %v3005_v32  ;;  %3261 = vmatpush.bf16.msra.mxu3 %v3005_v32 }
 0x5e4   : > { %6072 = vmatmul.msk.bf16.vlgmr.msrb.gmra.mxu2 %vm633_vm0, %v7099_v53  ;;  %6076 = vmatmul.msk.bf16.vlgmr.msrb.gmra.mxu3 %vm633_vm0, %v7100_v12  ;;  %v7119_v53 = vld [vmem:[%s7537_s14 + $0xc8] sm:$0xff] }
 0x5e5   : > { %v7120_v12 = vld [vmem:[%s7537_s14 + $0xe8] sm:$0xff] }
 0x5e6   : > { %3151 = vmatpush.bf16.msrb.mxu0 %v3004_v49  ;;  %3188 = vmatpush.bf16.msrb.mxu1 %v3004_v49 }
 0x5e7   : > { %3225 = vmatpush.bf16.msra.mxu2 %v3004_v49  ;;  %3262 = vmatpush.bf16.msra.mxu3 %v3004_v49 }
 0x5ea   : > { %3152 = vmatpush.bf16.msrb.mxu0 %v3003_v0  ;;  %3189 = vmatpush.bf16.msrb.mxu1 %v3003_v0 }
 0x5eb   : > { %3226 = vmatpush.bf16.msra.mxu2 %v3003_v0  ;;  %3263 = vmatpush.bf16.msra.mxu3 %v3003_v0 }
 0x5ee   : > { %3153 = vmatpush.bf16.msrb.mxu0 %v3002_v2  ;;  %3190 = vmatpush.bf16.msrb.mxu1 %v3002_v2 }
 0x5ef   : > { %3227 = vmatpush.bf16.msra.mxu2 %v3002_v2  ;;  %3264 = vmatpush.bf16.msra.mxu3 %v3002_v2 }
 0x5f1   : > { %6065 = vmatmul.msk.bf16.gmra.mxu0 %vm633_vm0, %v7101_v39  ;;  %6069 = vmatmul.msk.bf16.gmra.mxu1 %vm633_vm0, %v7102_v37  ;;  %v6903_v39 = vld [vmem:[%s9719_s6 + $0x210] sm:$0xff] }
 0x5f2   : > { %3306 = vmatpush.bf16.msra.mxu0 %v3005_v32  ;;  %3355 = vmatpush.msra.mxu1 %v2970_v40  ;;  %v6907_v40 = vld [vmem:[%s9719_s6 + $0x230] sm:$0xff]  ;;  %v6906_v32 = vld [vmem:[%s9719_s6 + $0x228] sm:$0xff] }
 0x5f3   : > { %3482 = vmatpush.bf16.msrb.mxu2 %v6916_v63  ;;  %v6931_v63 = vld [vmem:[%s9719_s6 + $0x2f0] sm:$0xff] }
 0x5f4   : > { %3356 = vmatpush.msra.mxu1 %v2968_v41  ;;  %6073 = vmatmul.msk.bf16.gmra.mxu2 %vm633_vm0, %v7103_v34  ;;  %v7116_v41 = vld [vmem:[%s7537_s14 + $0xe0] sm:$0xff]  ;;  %v6902_v34 = vld [vmem:[%s9719_s6 + $0x208] sm:$0xff] }
 0x5f5   : > { %6077 = vmatmul.msk.bf16.gmra.mxu3 %vm633_vm0, %v7104_v45  ;;  %v6901_v45 = vld [vmem:[%s9719_s6 + $0x200] sm:$0xff] }
 0x5f6   : > { %3307 = vmatpush.bf16.msra.mxu0 %v3004_v49  ;;  %3357 = vmatpush.msra.mxu1 %v2965_v30  ;;  %v7115_v30 = vld [vmem:[%s7537_s14 + $0xc0] sm:$0xff] }
 0x5f8   : > { %3358 = vmatpush.msra.mxu1 %v2963_v46  ;;  %v6908_v46 = vld [vmem:[%s9719_s6 + $0x238] sm:$0xff] }
 0x5f9   : > { %3559 = vmatpush.bf16.msrb.mxu3 %v6908_v46  ;;  %v7128_v46 = vld [vmem:[%s7537_s14 + $0xf8] sm:$0xff] }
 0x5fa   : > { %3308 = vmatpush.bf16.msra.mxu0 %v3003_v0  ;;  %3359 = vmatpush.msra.mxu1 %v8734_v52  ;;  %v7114_v52 = vld [vmem:[%s7537_s14 + $0xa0] sm:$0xff] }
 0x5fb   : > { %v6905_v0 = vld [vmem:[%s9719_s6 + $0x220] sm:$0xff] }
 0x5fc   : > { %3360 = vmatpush.msra.mxu1 %v8732_v59  ;;  %v7113_v59 = vld [vmem:[%s7537_s14 + $0x80] sm:$0xff] }
 0x5fd   : > { %3560 = vmatpush.bf16.msrb.mxu3 %v6907_v40 }
 0x5fe   : > { %3309 = vmatpush.bf16.msra.mxu0 %v3002_v2  ;;  %3361 = vmatpush.msra.mxu1 %v8730_v51  ;;  %v7117_v2 = vld [vmem:[%s7537_s14 + $0x88] sm:$0xff] }
 0x600   : > { %3362 = vmatpush.msra.mxu1 %v8728_v8  ;;  %v8776_v8 = vpop.f32.mrf.mxu3 }
 0x601   : > { %6066 = vmatmul.msk.bf16.gmra.mxu0 %vm633_vm0, %v7105_v28  ;;  %6070 = vmatmul.msk.bf16.gmra.mxu1 %vm633_vm0, %v7106_v62  ;;  %v7121_v62 = vld [vmem:[%s7537_s14 + $0x90] sm:$0xff] }
 0x602   : > { %3561 = vmatpush.bf16.msrb.mxu3 %v6906_v32 }
 0x604   : > { %6074 = vmatmul.msk.bf16.gmra.mxu2 %vm633_vm0, %v7107_v24  ;;  %v7122_v24 = vld [vmem:[%s7537_s14 + $0xb0] sm:$0xff] }
 0x605   : > { %6078 = vmatmul.msk.bf16.gmra.mxu3 %vm633_vm0, %v7108_v9  ;;  %v7123_v9 = vld [vmem:[%s7537_s14 + $0xd0] sm:$0xff] }
 0x606   : > { %3562 = vmatpush.bf16.msrb.mxu3 %v6905_v0  ;;  %v7129_v0 = vld [vmem:[%s7614_s23] sm:$0xff] }
 0x608   : > { %v8778_v51 = vpop.f32.mrf.mxu3 }
 0x60a   : > { %3563 = vmatpush.bf16.msrb.mxu3 %v6904_v19 }
 0x60e   : > { %3564 = vmatpush.bf16.msrb.mxu3 %v6903_v39 }
 0x610   : > { %v8797_v49 = vpop.f32.mrf.mxu3 }
 0x611   : > { %6067 = vmatmul.msk.bf16.gmra.mxu0 %vm633_vm0, %v7109_v10  ;;  %6071 = vmatmul.msk.bf16.gmra.mxu1 %vm633_vm0, %v7110_v50  ;;  %v7124_v10 = vld [vmem:[%s7537_s14 + $0xf0] sm:$0xff] }
 0x612   : > { %3565 = vmatpush.bf16.msrb.mxu3 %v6902_v34 }
 0x614   : > { %6075 = vmatmul.msk.bf16.gmra.mxu2 %vm633_vm0, %v7111_v61  ;;  %v7125_v61 = vld [vmem:[%s7537_s14 + $0x98] sm:$0xff] }
 0x615   : > { %6079 = vmatmul.msk.bf16.gmra.mxu3 %vm633_vm0, %v7112_v13  ;;  %v7126_v13 = vld [vmem:[%s7537_s14 + $0xb8] sm:$0xff] }
 0x616   : > { %3566 = vmatpush.bf16.msrb.mxu3 %v6901_v45  ;;  %v7131_v45 = vld [vmem:[%s7621_s27 + $0x8] sm:$0xff] }
 0x618   : > { %v8816_v37 = vpop.f32.mrf.mxu3 }
 0x620   : > { %v8824_v28 = vpop.f32.mrf.mxu3 }
 0x621   : > { %6080 = vmatmul.msk.bf16.vlgmr.msrb.gmra.mxu0 %vm633_vm0, %v7113_v59  ;;  %6084 = vmatmul.msk.bf16.vlgmr.msrb.gmra.mxu1 %vm633_vm0, %v7114_v52  ;;  %v7127_v52 = vld [vmem:[%s7537_s14 + $0xd8] sm:$0xff] }
 0x624   : > { %6088 = vmatmul.msk.bf16.vlgmr.msra.gmra.mxu2 %vm633_vm0, %v7115_v30 }
 0x625   : > { %6092 = vmatmul.msk.bf16.vlgmr.msra.gmra.mxu3 %vm633_vm0, %v7116_v41 }
 0x628   : > { %v8834_v50 = vpop.f32.mrf.mxu3 }
 0x630   : > { %v8840_v59 = vpop.f32.mrf.mxu3 }
 0x631   : > { %6081 = vmatmul.msk.bf16.gmra.mxu0 %vm633_vm0, %v7117_v2  ;;  %6085 = vmatmul.msk.bf16.gmra.mxu1 %vm633_vm0, %v7118_v14  ;;  %v7130_v2 = vld [vmem:[%s7621_s27] sm:$0xff] }
 0x634   : > { %6089 = vmatmul.msk.bf16.gmra.mxu2 %vm633_vm0, %v7119_v53 }
 0x635   : > { %6093 = vmatmul.msk.bf16.gmra.mxu3 %vm633_vm0, %v7120_v12 }
 0x638   : > { %v8846_v30 = vpop.f32.mrf.mxu3 }
 0x641   : > { %6082 = vmatmul.msk.bf16.gmra.mxu0 %vm633_vm0, %v7121_v62  ;;  %6086 = vmatmul.msk.bf16.gmra.mxu1 %vm633_vm0, %v7122_v24 }
 0x644   : > { %6090 = vmatmul.msk.bf16.gmra.mxu2 %vm633_vm0, %v7123_v9 }
 0x645   : > { %6094 = vmatmul.msk.bf16.gmra.mxu3 %vm633_vm0, %v7124_v10 }
 0x651   : > { %6083 = vmatmul.msk.bf16.gmra.mxu0 %vm633_vm0, %v7125_v61  ;;  %6087 = vmatmul.msk.bf16.gmra.mxu1 %vm633_vm0, %v7126_v13  ;;  %v7132_v61 = vld [vmem:[%s7614_s23 + $0x8] sm:$0xff]  ;;  %v7133_v13 = vld [vmem:[%s7621_s27 + $0x10] sm:$0xff] }
 0x654   : > { %6091 = vmatmul.msk.bf16.gmra.mxu2 %vm633_vm0, %v7127_v52 }
 0x655   : > { %6095 = vmatmul.msk.bf16.gmra.mxu3 %vm633_vm0, %v7128_v46 }
 0x65e   : > { %v3015_v41 = vpop.f32.mrf.mxu0  ;;  %v3044_v40 = vpop.f32.mrf.mxu1 }
 0x65f   : > { %v3064_v32 = vmax.f32 %v3015_v41, %v3044_v40  ;;  %v6924_v41 = vld [vmem:[%s9719_s6 + $0x2b8] sm:$0xff] }
 0x660   : > { %3657 = vmatpush.bf16.msrb.mxu0 %v6924_v41  ;;  %v7136_v41 = vld [vmem:[%s7621_s27 + $0x20] sm:$0xff] }
 0x661   : > { %6096 = vmatmul.msk.bf16.vlgmr.msra.gmra.mxu0 %vm633_vm0, %v7129_v0  ;;  %6100 = vmatmul.msk.f32.vlgmr.msra.gmra.mxu1 %vm633_vm0, %v7130_v2 }
 0x665   : > { %3567 = vmatmul.bf16.vlgmr.msrb.gmra.mxu3 %v8676_v1 }
 0x666   : > { %v8857_v12 = vpop.f32.mrf.mxu0  ;;  %v8859_v39 = vpop.f32.mrf.mxu1 }
 0x667   : > { %v3081_v14 = vpop.f32.mrf.mxu2  ;;  %v8853_v19 = vpop.f32.mrf.mxu3 }
 0x668   : > { %v8855_v53 = vmax.f32 %v3064_v32, %v3081_v14  ;;  %v6923_v14 = vld [vmem:[%s9719_s6 + $0x2b0] sm:$0xff] }
 0x669   : > { %6101 = vmatmul.msk.f32.gmra.mxu1 %vm633_vm0, %v7131_v45  ;;  %3658 = vmatpush.bf16.msrb.mxu0 %v6923_v14 }
 0x66a   : > { %v3138_v34 = vmax.f32 %v8855_v53, %v8853_v19  ;;  %v6932_v19 = vld [vmem:[%s9719_s6 + $0x2f8] sm:$0xff] }
 0x66b   : > { %3763 = vmatpush.bf16.msrb.mxu1 %v6932_v19 }
 0x66e   : > { %v3020_v1 = vpop.f32.mrf.mxu0  ;;  %v3049_v9 = vpop.f32.mrf.mxu1 }
 0x66f   : > { %v8865_v62 = vpop.f32.mrf.mxu2  ;;  %v8867_v24 = vpop.f32.mrf.mxu3  ;;  %v3066_v10 = vmax.f32 %v3020_v1, %v3049_v9  ;;  %v6922_v9 = vld [vmem:[%s9719_s6 + $0x2a8] sm:$0xff]  ;;  %3764 = vmatpush.bf16.msrb.mxu1 %v6931_v63 }
 0x670   : > { %3659 = vmatpush.bf16.msrb.mxu0 %v6922_v9  ;;  %v6920_v9 = vld [vmem:[%s9719_s6 + $0x298] sm:$0xff] }
 0x671   : > { %6097 = vmatmul.msk.bf16.gmra.mxu0 %vm633_vm0, %v7132_v61  ;;  %6102 = vmatmul.msk.f32.gmra.mxu1 %vm633_vm0, %v7133_v13 }
 0x675   : > { %3572 = vmatmul.bf16.gmra.mxu3 %v8692_v54  ;;  %v7134_v54 = vld [vmem:[%s7621_s27 + $0x18] sm:$0xff] }
 0x676   : > { %v8881_v32 = vpop.f32.mrf.mxu0  ;;  %v8883_v0 = vpop.f32.mrf.mxu1 }
 0x677   : > { %v3086_v52 = vpop.f32.mrf.mxu2 }
 0x678   : > { %v8874_v46 = vpop.f32.mrf.mxu3  ;;  %v8879_v40 = vmax.f32 %v3066_v10, %v3086_v52  ;;  %v7135_v52 = vld [vmem:[%s7614_s23 + $0x10] sm:$0xff] }
 0x679   : > { %6103 = vmatmul.msk.f32.gmra.mxu1 %vm633_vm0, %v7134_v54  ;;  %v6921_v54 = vld [vmem:[%s9719_s6 + $0x2a0] sm:$0xff] }
 0x67a   : > { %3660 = vmatpush.bf16.msrb.mxu0 %v6921_v54  ;;  %v6919_v54 = vld [vmem:[%s9719_s6 + $0x290] sm:$0xff] }
 0x67e   : > { %v3025_v10 = vpop.f32.mrf.mxu0  ;;  %v3054_v61 = vpop.f32.mrf.mxu1  ;;  %3661 = vmatpush.bf16.msrb.mxu0 %v6920_v9 }
 0x67f   : > { %v8892_v45 = vpop.f32.mrf.mxu2  ;;  %v3068_v13 = vmax.f32 %v3025_v10, %v3054_v61 }
 0x680   : > { %v8894_v1 = vpop.f32.mrf.mxu3 }
 0x681   : > { %6098 = vmatmul.msk.bf16.gmra.mxu0 %vm633_vm0, %v7135_v52  ;;  %6104 = vmatmul.msk.f32.gmra.mxu1 %vm633_vm0, %v7136_v41  ;;  %v7137_v41 = vld [vmem:[%s7621_s27 + $0x28] sm:$0xff] }
 0x682   : > { %3662 = vmatpush.bf16.msrb.mxu0 %v6919_v54  ;;  %v6917_v54 = vld [vmem:[%s9719_s6 + $0x280] sm:$0xff] }
 0x685   : > { %3577 = vmatmul.bf16.gmra.mxu3 %v8708_v27 }
 0x686   : > { %v8914_v61 = vpop.f32.mrf.mxu0  ;;  %v8916_v52 = vpop.f32.mrf.mxu1  ;;  %3663 = vmatpush.bf16.msrb.mxu0 %v6918_v47 }
 0x687   : > { %v3091_v14 = vpop.f32.mrf.mxu2 }
 0x688   : > { %v8907_v33 = vpop.f32.mrf.mxu3  ;;  %v8912_v10 = vmax.f32 %v3068_v13, %v3091_v14 }
 0x689   : > { %6105 = vmatmul.msk.f32.gmra.mxu1 %vm633_vm0, %v7137_v41  ;;  %v7139_v41 = vld [vmem:[%s7621_s27 + $0x30] sm:$0xff] }
 0x68a   : > { %3664 = vmatpush.bf16.msrb.mxu0 %v6917_v54 }
 0x68e   : > { %v3030_v9 = vpop.f32.mrf.mxu0  ;;  %v3059_v3 = vpop.f32.mrf.mxu1 }
 0x68f   : > { %v8925_v13 = vpop.f32.mrf.mxu2  ;;  %v3070_v60 = vmax.f32 %v3030_v9, %v3059_v3  ;;  %v7140_v9 = vld [vmem:[%s7621_s27 + $0x38] sm:$0xff] }
 0x690   : > { %v8927_v14 = vpop.f32.mrf.mxu3 }
 0x691   : > { %6099 = vmatmul.msk.bf16.gmra.mxu0 %vm633_vm0, %v7138_v31  ;;  %6106 = vmatmul.msk.f32.gmra.mxu1 %vm633_vm0, %v7139_v41 }
 0x695   : > { %3582 = vmatmul.bf16.gmra.mxu3 %v8724_v23 }
 0x696   : > { %v8944_v3 = vpop.f32.mrf.mxu0  ;;  %v8946_v47 = vpop.f32.mrf.mxu1 }
 0x697   : > { %v3096_v35 = vpop.f32.mrf.mxu2 }
 0x698   : > { %v8940_v43 = vpop.f32.mrf.mxu3  ;;  %v8942_v7 = vmax.f32 %v3070_v60, %v3096_v35  ;;  %v3065_v35 = vmax.f32 %v8857_v12, %v8859_v39 }
 0x699   : > { %6107 = vmatmul.msk.f32.gmra.mxu1 %vm633_vm0, %v7140_v9 }
 0x69a   : > { %v3102_v60 = vmax.f32 %v3065_v35, %v8865_v62 }
 0x69c   : > { %v3139_v6 = vmax.f32 %v3102_v60, %v8867_v24 }
 0x69e   : > { %v3155_v23 = vpop.f32.mrf.mxu0  ;;  %v3192_v54 = vpop.f32.mrf.mxu1 }
 0x69f   : > { %v8952_v41 = vpop.f32.mrf.mxu2  ;;  %v3175_v2 = vmax.f32 %v3138_v34, %v3155_v23 }
 0x6a0   : > { %v8954_v27 = vpop.f32.mrf.mxu3 }
 0x6a1   : > { %v3212_v21 = vmax.f32 %v3175_v2, %v3192_v54  ;;  %v6914_v2 = vld [vmem:[%s9719_s6 + $0x268] sm:$0xff] }
 0x6a6   : > { %v3157_v9 = vpop.f32.mrf.mxu0  ;;  %v3194_v18 = vpop.f32.mrf.mxu1 }
 0x6a7   : > { %v3229_v16 = vpop.f32.mrf.mxu2  ;;  %v3176_v22 = vmax.f32 %v3139_v6, %v3157_v9  ;;  %v3067_v6 = vmax.f32 %v8881_v32, %v8883_v0  ;;  %v9856_v32 = vmax.f32 %v8879_v40, %v8874_v46  ;;  %v6929_v40 = vld [vmem:[%s9719_s6 + $0x2e0] sm:$0xff] }
 0x6a8   : > { %v3266_v31 = vpop.f32.mrf.mxu3  ;;  %v3249_v44 = vmax.f32 %v3212_v21, %v3229_v16  ;;  %v6915_v21 = vld [vmem:[%s9719_s6 + $0x270] sm:$0xff] }
 0x6a9   : > { %v3213_v12 = vmax.f32 %v3176_v22, %v3194_v18  ;;  %3483 = vmatpush.bf16.msrb.mxu2 %v6915_v21  ;;  %v3104_v18 = vmax.f32 %v3067_v6, %v8892_v45  ;;  %v6930_v45 = vld [vmem:[%s9719_s6 + $0x2e8] sm:$0xff] }
 0x6aa   : > { %v3286_v53 = vmax.f32 %v3249_v44, %v3266_v31  ;;  %3765 = vmatpush.bf16.msrb.mxu1 %v6930_v45 }
 0x6ab   : > { %v3141_v60 = vmax.f32 %v3104_v18, %v8894_v1  ;;  %v6912_v1 = vld [vmem:[%s9719_s6 + $0x258] sm:$0xff]  ;;  %v6911_v18 = vld [vmem:[%s9719_s6 + $0x250] sm:$0xff] }
 0x6ac   : > { %v3294_v44 = vadd.f32 %v3286_v53, %v8776_v8 }
 0x6ad   : > { %3484 = vmatpush.bf16.msrb.mxu2 %v6914_v2  ;;  %v6927_v2 = vld [vmem:[%s9719_s6 + $0x2d0] sm:$0xff] }
 0x6ae   : > { %v3160_v24 = vpop.f32.mrf.mxu0  ;;  %v3197_v23 = vpop.f32.mrf.mxu1  ;;  %3766 = vmatpush.bf16.msrb.mxu1 %v6929_v40 }
 0x6af   : > { %v3231_v39 = vpop.f32.mrf.mxu2  ;;  %v3177_v0 = vmax.f32 %v9856_v32, %v3160_v24 }
 0x6b0   : > { %v3268_v62 = vpop.f32.mrf.mxu3  ;;  %v3250_v34 = vmax.f32 %v3213_v12, %v3231_v39  ;;  %v6913_v39 = vld [vmem:[%s9719_s6 + $0x260] sm:$0xff] }
 0x6b1   : > { %3485 = vmatpush.bf16.msrb.mxu2 %v6913_v39 }
 0x6b2   : > { %v3287_v22 = vmax.f32 %v3250_v34, %v3268_v62  ;;  %v3214_v62 = vmax.f32 %v3177_v0, %v3197_v23  ;;  %v6928_v23 = vld [vmem:[%s9719_s6 + $0x2d8] sm:$0xff] }
 0x6b3   : > { %3767 = vmatpush.bf16.msrb.mxu1 %v6928_v23 }
 0x6b4   : > { %v3295_v16 = vadd.f32 %v3287_v22, %v8778_v51 }
 0x6b5   : > { %3486 = vmatpush.bf16.msrb.mxu2 %v6912_v1 }
 0x6b6   : > { %v3588_v31 = vpack.c.bf16 %v3295_v16, %v3294_v44  ;;  %v3162_v9 = vpop.f32.mrf.mxu0  ;;  %v3199_v12 = vpop.f32.mrf.mxu1  ;;  %v3069_v44 = vmax.f32 %v8914_v61, %v8916_v52  ;;  %v9857_v61 = vmax.f32 %v8912_v10, %v8907_v33 }
 0x6b7   : > { %v3234_v54 = vpop.f32.mrf.mxu2  ;;  %v3178_v46 = vmax.f32 %v3141_v60, %v3162_v9  ;;  %3768 = vmatpush.bf16.msrb.mxu1 %v6927_v2 }
 0x6b8   : > { %v3271_v35 = vpop.f32.mrf.mxu3  ;;  %3665 = vmatmul.bf16.vlgmr.msrb.gmra.mxu0 %v3588_v31  ;;  %v3251_v19 = vmax.f32 %v3214_v62, %v3234_v54  ;;  %v3106_v31 = vmax.f32 %v3069_v44, %v8925_v13  ;;  %v6910_v54 = vld [vmem:[%s9719_s6 + $0x248] sm:$0xff]  ;;  %v6909_v62 = vld [vmem:[%s9719_s6 + $0x240] sm:$0xff]  ;;  %v9858_v44 = vmax.f32 %v8942_v7, %v8940_v43  ;;  %v9859_v7 = vmax.f32 %v8665_v48, 0.0 }
 0x6b9   : > { %v3215_v53 = vmax.f32 %v3178_v46, %v3199_v12  ;;  %3487 = vmatpush.bf16.msrb.mxu2 %v6911_v18  ;;  %v6926_v13 = vld [vmem:[%s9719_s6 + $0x2c8] sm:$0xff]  ;;  %v6925_v46 = vld [vmem:[%s9719_s6 + $0x2c0] sm:$0xff] }
 0x6ba   : > { %v3288_v21 = vmax.f32 %v3251_v19, %v3271_v35  ;;  %v3143_v9 = vmax.f32 %v3106_v31, %v8927_v14  ;;  %v3331_v43 = vsub.f32 %v8776_v8, %v9859_v7 }
 0x6bb   : > { %3769 = vmatpush.bf16.msrb.mxu1 %v6926_v13 }
 0x6bc   : > { %v3296_v32 = vadd.f32 %v3288_v21, %v8797_v49  ;;  %v3071_v21 = vmax.f32 %v8944_v3, %v8946_v47 }
 0x6bd   : > { %3488 = vmatpush.bf16.msrb.mxu2 %v6910_v54 }
 0x6be   : > { %v3165_v22 = vpop.f32.mrf.mxu0  ;;  %v3202_v63 = vpop.f32.mrf.mxu1 }
 0x6bf   : > { %v3236_v34 = vpop.f32.mrf.mxu2  ;;  %v3179_v52 = vmax.f32 %v9857_v61, %v3165_v22  ;;  %3770 = vmatpush.bf16.msrb.mxu1 %v6925_v46  ;;  %v3108_v22 = vmax.f32 %v3071_v21, %v8952_v41  ;;  %v3339_v46 = vmul.f32 %v3331_v43, %v9843_v20 }
 0x6c0   : > { %v3273_v24 = vpop.f32.mrf.mxu3  ;;  %v3252_v6 = vmax.f32 %v3215_v53, %v3236_v34 }
 0x6c1   : > { %v3216_v33 = vmax.f32 %v3179_v52, %v3202_v63  ;;  %3489 = vmatpush.bf16.msrb.mxu2 %v6909_v62 }
 0x6c2   : > { %v3289_v16 = vmax.f32 %v3252_v6, %v3273_v24 }
 0x6c4   : > { %v3297_v0 = vadd.f32 %v3289_v16, %v8816_v37 }
 0x6c6   : > { %v3589_v35 = vpack.c.bf16 %v3297_v0, %v3296_v32  ;;  %v3167_v12 = vpop.f32.mrf.mxu0  ;;  %v3204_v39 = vpop.f32.mrf.mxu1  ;;  %v3145_v0 = vmax.f32 %v3108_v22, %v8954_v27  ;;  %v9860_v27 = vmax.f32 %v8668_v42, 0.0 }
 0x6c7   : > { %v3239_v45 = vpop.f32.mrf.mxu2  ;;  %v3180_v10 = vmax.f32 %v3143_v9, %v3167_v12 }
 0x6c8   : > { %v3276_v60 = vpop.f32.mrf.mxu3  ;;  %3670 = vmatmul.bf16.gmra.mxu0 %v3589_v35  ;;  %v3253_v40 = vmax.f32 %v3216_v33, %v3239_v45  ;;  %v3332_v62 = vsub.f32 %v8778_v51, %v9860_v27 }
 0x6c9   : > { %v3217_v19 = vmax.f32 %v3180_v10, %v3204_v39 }
 0x6ca   : > { %v3290_v53 = vmax.f32 %v3253_v40, %v3276_v60 }
 0x6cc   : > { %v3298_v63 = vadd.f32 %v3290_v53, %v8824_v28 }
 0x6ce   : > { %v3170_v24 = vpop.f32.mrf.mxu0  ;;  %v3207_v23 = vpop.f32.mrf.mxu1 }
 0x6cf   : > { %v3241_v1 = vpop.f32.mrf.mxu2  ;;  %v3181_v16 = vmax.f32 %v9858_v44, %v3170_v24 }
 0x6d0   : > { %v3278_v14 = vpop.f32.mrf.mxu3  ;;  %v3254_v34 = vmax.f32 %v3217_v19, %v3241_v1  ;;  %v3340_v1 = vmul.f32 %v3332_v62, %v7855_v36 }
 0x6d1   : > { %v3218_v3 = vmax.f32 %v3181_v16, %v3207_v23  ;;  %v9862_v16 = vmax.f32 %v8684_v55, 0.0 }
 0x6d2   : > { %v3291_v6 = vmax.f32 %v3254_v34, %v3278_v14 }
 0x6d4   : > { %v3299_v18 = vadd.f32 %v3291_v6, %v8834_v50 }
 0x6d6   : > { %v3590_v2 = vpack.c.bf16 %v3299_v18, %v3298_v63  ;;  %v3172_v54 = vpop.f32.mrf.mxu0  ;;  %v3209_v61 = vpop.f32.mrf.mxu1  ;;  %v9861_v18 = vmax.f32 %v8681_v56, 0.0 }
 0x6d7   : > { %v3244_v31 = vpop.f32.mrf.mxu2  ;;  %v3182_v47 = vmax.f32 %v3145_v0, %v3172_v54 }
 0x6d8   : > { %v3281_v32 = vpop.f32.mrf.mxu3  ;;  %3675 = vmatmul.bf16.gmra.mxu0 %v3590_v2  ;;  %v3255_v52 = vmax.f32 %v3218_v3, %v3244_v31  ;;  %v3333_v44 = vsub.f32 %v8797_v49, %v9861_v18  ;;  %v3334_v2 = vsub.f32 %v8816_v37, %v9862_v16  ;;  %v6948_v18 = vld [vmem:[%s9718_s5 + $0x1f4] sm:$0xf0]  ;;  %v6366_v16 = vld [vmem:[%s9718_s5 + $0x1e0] sm:$0xf] }
 0x6d9   : > { %v3219_v41 = vmax.f32 %v3182_v47, %v3209_v61 }
 0x6da   : > { %v3292_v45 = vmax.f32 %v3255_v52, %v3281_v32  ;;  %v3342_v31 = vmul.f32 %v3334_v2, %v9846_v58  ;;  %v6946_v2 = vld [vmem:[%s9718_s5 + $0x1e4] sm:$0xf0] }
 0x6dc   : > { %v3300_v33 = vadd.f32 %v3292_v45, %v8840_v59  ;;  %v9863_v45 = vmax.f32 %v8697_v11, 0.0 }
 0x6de   : > { %v3311_v13 = vpop.f32.mrf.mxu0  ;;  %v3364_v9 = vpop.f32.mrf.mxu1 }
 0x6df   : > { %v3246_v35 = vpop.f32.mrf.mxu2  ;;  %v3365_v19 = vadd.f32 %v3364_v9, %v3339_v46  ;;  %v3312_v53 = vadd.f32 %v3311_v13, %v8776_v8  ;;  %v3341_v8 = vmul.f32 %v3333_v44, %v7870_v4  ;;  %v9864_v13 = vmax.f32 %v8700_v5, 0.0  ;;  %v6376_v44 = vld [vmem:[%s9718_s5 + $0x1f8] sm:$0xf0] }
 0x6e0   : > { %v3256_v60 = vmax.f32 %v3219_v41, %v3246_v35  ;;  %v3283_v12 = vpop.f32.mrf.mxu3 }
 0x6e1   : > { %v3388_v24 = vand.u32 2147483647, %v3365_v19  ;;  %v3336_v9 = vsub.f32 %v8834_v50, %v9864_v13  ;;  %v9865_v19 = vmax.f32 %v8713_v15, 0.0 }
 0x6e2   : > { %v3293_v39 = vmax.f32 %v3256_v60, %v3283_v12  ;;  %v3335_v60 = vsub.f32 %v8824_v28, %v9863_v45 }
 0x6e3   : > { %v3344_v7 = vmul.f32 %v3336_v9, %v9850_v17  ;;  %v6342_v9 = vld [vmem:[%s9718_s5 + $0x1b0] sm:$0xf] }
 0x6e4   : > { %v3301_v10 = vadd.f32 %v3293_v39, %v8846_v30 }
 0x6e6   : > { %v3591_v40 = vpack.c.bf16 %v3301_v10, %v3300_v33  ;;  %v3313_v48 = vpop.f32.mrf.mxu0  ;;  %v3367_v14 = vpop.f32.mrf.mxu1 }
 0x6e7   : > { %v3314_v34 = vadd.f32 %v3313_v48, %v8778_v51  ;;  %v3368_v42 = vadd.f32 %v3367_v14, %v3340_v1  ;;  %v3337_v1 = vsub.f32 %v8840_v59, %v9865_v19  ;;  %v9866_v48 = vmax.f32 %v8716_v25, 0.0  ;;  %v6374_v25 = vld [vmem:[%s9718_s5 + $0x1f0] sm:$0xf] }
 0x6e8   : > { %3680 = vmatmul.bf16.gmra.mxu0 %v3591_v40 }
 0x6e9   : > { %v3413_v23 = vpack.c.bf16 %v3314_v34, %v3312_v53  ;;  %v3389_v21 = vand.u32 2147483647, %v3368_v42  ;;  %v3338_v14 = vsub.f32 %v8846_v30, %v9866_v48 }
 0x6eb   : > { %v3694_v6 = vpack.c.bf16 %v3389_v21, %v3388_v24  ;;  %3490 = vmatmul.bf16.vlgmr.msrb.gmra.mxu2 %v3413_v23  ;;  %v3346_v53 = vmul.f32 %v3338_v14, %v7957_v29  ;;  %v6318_v14 = vld [vmem:[%s9718_s5 + $0x180] sm:$0xf] }
 0x6ed   : > { %3771 = vmatmul.bf16.vlgmr.msrb.gmra.mxu1 %v3694_v6 }
 0x6ee   : > { %v3316_v22 = vpop.f32.mrf.mxu0  ;;  %v3370_v63 = vpop.f32.mrf.mxu1 }
 0x6ef   : > { %v3371_v51 = vadd.f32 %v3370_v63, %v3341_v8  ;;  %v3317_v54 = vadd.f32 %v3316_v22, %v8797_v49  ;;  %v3343_v49 = vmul.f32 %v3335_v60, %v9849_v26  ;;  %v6352_v60 = vld [vmem:[%s9718_s5 + $0x1c8] sm:$0xf0] }
 0x6f1   : > { %v3390_v47 = vand.u32 2147483647, %v3371_v51  ;;  %v6945_v51 = vld [vmem:[%s9718_s5 + $0x1e4] sm:$0xf] }
 0x6f6   : > { %v3318_v32 = vpop.f32.mrf.mxu0  ;;  %v3373_v0 = vpop.f32.mrf.mxu1 }
 0x6f7   : > { %v3319_v61 = vadd.f32 %v3318_v32, %v8816_v37  ;;  %v3374_v3 = vadd.f32 %v3373_v0, %v3342_v31  ;;  %v6368_v31 = vld [vmem:[%s9718_s5 + $0x1e8] sm:$0xf0]  ;;  %v6367_v32 = vor.u32 %v6946_v2, %v6366_v16 }
 0x6f8   : > { %v6371_v0 = vor.u32 %v6945_v51, %v6368_v31 }
 0x6f9   : > { %v3414_v56 = vpack.c.bf16 %v3319_v61, %v3317_v54  ;;  %v3391_v52 = vand.u32 2147483647, %v3374_v3  ;;  %v6358_v54 = vld [vmem:[%s9718_s5 + $0x1d0] sm:$0xf]  ;;  %v6944_v61 = vld [vmem:[%s9718_s5 + $0x1d4] sm:$0xf0] }
 0x6fa   : > { %v6943_v3 = vld [vmem:[%s9718_s5 + $0x1d4] sm:$0xf] }
 0x6fb   : > { %3495 = vmatmul.bf16.gmra.mxu2 %v3414_v56  ;;  %v3695_v41 = vpack.c.bf16 %v3391_v52, %v3390_v47  ;;  %v6359_v47 = vor.u32 %v6944_v61, %v6358_v54  ;;  %v6360_v56 = vld [vmem:[%s9718_s5 + $0x1d8] sm:$0xf0] }
 0x6fc   : > { %v6363_v52 = vor.u32 %v6943_v3, %v6360_v56 }
 0x6fd   : > { %3776 = vmatmul.bf16.gmra.mxu1 %v3695_v41  ;;  %v6350_v41 = vld [vmem:[%s9718_s5 + $0x1c0] sm:$0xf] }
 0x6fe   : > { %v3321_v55 = vpop.f32.mrf.mxu0  ;;  %v3376_v35 = vpop.f32.mrf.mxu1 }
 0x6ff   : > { %v3377_v37 = vadd.f32 %v3376_v35, %v3343_v49  ;;  %v3322_v39 = vadd.f32 %v3321_v55, %v8824_v28  ;;  %v3345_v28 = vmul.f32 %v3337_v1, %v9853_v57  ;;  %v6942_v55 = vld [vmem:[%s9718_s5 + $0x1c4] sm:$0xf0]  ;;  %v6941_v35 = vld [vmem:[%s9718_s5 + $0x1c4] sm:$0xf]  ;;  %v6940_v49 = vld [vmem:[%s9718_s5 + $0x1b4] sm:$0xf0] }
 0x700   : > { %v6351_v45 = vor.u32 %v6942_v55, %v6350_v41  ;;  %v6355_v13 = vor.u32 %v6941_v35, %v6352_v60  ;;  %v6328_v1 = vld [vmem:[%s9718_s5 + $0x198] sm:$0xf0] }
 0x701   : > { %v3392_v33 = vand.u32 2147483647, %v3377_v37  ;;  %v6939_v37 = vld [vmem:[%s9718_s5 + $0x1b4] sm:$0xf] }
 0x706   : > { %v3323_v43 = vpop.f32.mrf.mxu0  ;;  %v3379_v12 = vpop.f32.mrf.mxu1 }
 0x707   : > { %v3324_v27 = vadd.f32 %v3323_v43, %v8834_v50  ;;  %v3380_v62 = vadd.f32 %v3379_v12, %v3344_v7  ;;  %v6343_v7 = vor.u32 %v6940_v49, %v6342_v9  ;;  %v6344_v43 = vld [vmem:[%s9718_s5 + $0x1b8] sm:$0xf0] }
 0x708   : > { %v6347_v12 = vor.u32 %v6939_v37, %v6344_v43 }
 0x709   : > { %v3415_v11 = vpack.c.bf16 %v3324_v27, %v3322_v39  ;;  %v3393_v10 = vand.u32 2147483647, %v3380_v62  ;;  %v6334_v39 = vld [vmem:[%s9718_s5 + $0x1a0] sm:$0xf]  ;;  %v6938_v27 = vld [vmem:[%s9718_s5 + $0x1a4] sm:$0xf0] }
 0x70a   : > { %v6937_v62 = vld [vmem:[%s9718_s5 + $0x1a4] sm:$0xf] }
 0x70b   : > { %3500 = vmatmul.bf16.gmra.mxu2 %v3415_v11  ;;  %v3696_v46 = vpack.c.bf16 %v3393_v10, %v3392_v33  ;;  %v6335_v33 = vor.u32 %v6938_v27, %v6334_v39  ;;  %v6336_v11 = vld [vmem:[%s9718_s5 + $0x1a8] sm:$0xf0] }
 0x70c   : > { %v6339_v10 = vor.u32 %v6937_v62, %v6336_v11  ;;  %v9869_v62 = vld [vmem:[#allocation6_spill] sm:$0xff] }
 0x70d   : > { %3781 = vmatmul.bf16.gmra.mxu1 %v3696_v46  ;;  %v6326_v46 = vld [vmem:[%s9718_s5 + $0x190] sm:$0xf] }
 0x70e   : > { %v3326_v5 = vpop.f32.mrf.mxu0  ;;  %v3382_v40 = vpop.f32.mrf.mxu1 }
 0x70f   : > { %v3383_v50 = vadd.f32 %v3382_v40, %v3345_v28  ;;  %v3327_v24 = vadd.f32 %v3326_v5, %v8840_v59  ;;  %v6947_v59 = vld [vmem:[%s9718_s5 + $0x1f4] sm:$0xf]  ;;  %v6936_v5 = vld [vmem:[%s9718_s5 + $0x194] sm:$0xf0]  ;;  %v6934_v28 = vld [vmem:[%s9718_s5 + $0x184] sm:$0xf0] }
 0x710   : > { %v6379_v8 = vor.u32 %v6947_v59, %v6376_v44  ;;  %v6935_v40 = vld [vmem:[%s9718_s5 + $0x194] sm:$0xf]  ;;  %v6327_v19 = vor.u32 %v6936_v5, %v6326_v46 }
 0x711   : > { %v3394_v6 = vand.u32 2147483647, %v3383_v50  ;;  %v6331_v48 = vor.u32 %v6935_v40, %v6328_v1  ;;  %v6933_v50 = vld [vmem:[%s9718_s5 + $0x184] sm:$0xf] }
 0x712   : > { %3946 = vmatpush.bf16.msra.mxu3 %v6379_v8 }
 0x716   : > { %v3328_v34 = vpop.f32.mrf.mxu0  ;;  %v3385_v42 = vpop.f32.mrf.mxu1  ;;  %3947 = vmatpush.bf16.msra.mxu3 %v6371_v0  ;;  %v9867_v0 = vld [vmem:[#allocation11_spill] sm:$0xff] }
 0x717   : > { %v3329_v23 = vadd.f32 %v3328_v34, %v8846_v30  ;;  %v3386_v21 = vadd.f32 %v3385_v42, %v3346_v53  ;;  %v6375_v30 = vor.u32 %v6948_v18, %v6374_v25  ;;  %v6319_v53 = vor.u32 %v6934_v28, %v6318_v14  ;;  %v6320_v34 = vld [vmem:[%s9718_s5 + $0x188] sm:$0xf0]  ;;  %v3568_v42 = vpop.f32.mrf.mxu3 }
 0x719   : > { %v3416_v15 = vpack.c.bf16 %v3329_v23, %v3327_v24  ;;  %v3395_v22 = vand.u32 2147483647, %v3386_v21  ;;  %3917 = vmatpush.bf16.msra.mxu2 %v6375_v30  ;;  %v6323_v24 = vor.u32 %v6933_v50, %v6320_v34 }
 0x71a   : > { %3948 = vmatpush.bf16.msra.mxu3 %v6363_v52 }
 0x71b   : > { %3505 = vmatmul.bf16.gmra.mxu2 %v3416_v15  ;;  %v3697_v63 = vpack.c.bf16 %v3395_v22, %v3394_v6 }
 0x71d   : > { %3786 = vmatmul.bf16.gmra.mxu1 %v3697_v63  ;;  %3918 = vmatpush.bf16.msra.mxu2 %v6367_v32 }
 0x71e   : > { %3949 = vmatpush.bf16.msra.mxu3 %v6355_v13 }
 0x71f   : > { %v3570_v21 = vpop.f32.mrf.mxu3 }
 0x721   : > { %3919 = vmatpush.bf16.msra.mxu2 %v6359_v47 }
 0x722   : > { %3950 = vmatpush.bf16.msra.mxu3 %v6347_v12  ;;  %v9868_v12 = vld [vmem:[#allocation10_spill] sm:$0xff] }
 0x725   : > { %3920 = vmatpush.bf16.msra.mxu2 %v6351_v45 }
 0x726   : > { %3951 = vmatpush.bf16.msra.mxu3 %v6339_v10 }
 0x727   : > { %v3573_v59 = vpop.f32.mrf.mxu3 }
 0x729   : > { %3921 = vmatpush.bf16.msra.mxu2 %v6343_v7 }
 0x72a   : > { %3952 = vmatpush.bf16.msra.mxu3 %v6331_v48 }
 0x72d   : > { %3922 = vmatpush.bf16.msra.mxu2 %v6335_v33 }
 0x72e   : > { %3953 = vmatpush.bf16.msra.mxu3 %v6323_v24  ;;  %v9870_v24 = vld [vmem:[#allocation8_spill] sm:$0xff] }
 0x72f   : > { %v3575_v61 = vpop.f32.mrf.mxu3 }
 0x731   : > { %3923 = vmatpush.bf16.msra.mxu2 %v6327_v19 }
 0x735   : > { %3924 = vmatpush.bf16.msra.mxu2 %v6319_v53  ;;  %v3666_v23 = vpop.f32.mrf.mxu0 }
 0x737   : > { %v3578_v49 = vpop.f32.mrf.mxu3 }
 0x73d   : > { %v3668_v15 = vpop.f32.mrf.mxu0 }
 0x73f   : > { %v3580_v19 = vpop.f32.mrf.mxu3 }
 0x745   : > { %v3671_v30 = vpop.f32.mrf.mxu0 }
 0x74d   : > { %v3673_v41 = vpop.f32.mrf.mxu0 }
 0x755   : > { %v3676_v7 = vpop.f32.mrf.mxu0 }
 0x75d   : > { %v3678_v48 = vpop.f32.mrf.mxu0 }
 0x76a   : > { %v3772_v6 = vpop.f32.mrf.mxu1 }
 0x76e   : > { %v3491_v22 = vpop.f32.mrf.mxu2 }
 0x76f   : > { %v3569_v63 = vadd.f32 %v3568_v42, %v3491_v22  ;;  %v3681_v22 = vpop.f32.mrf.mxu0 }
 0x771   : > { %v3686_v18 = vadd.f32 %v3666_v23, %v3569_v63 }
 0x772   : > { %v3774_v25 = vpop.f32.mrf.mxu1 }
 0x773   : > { %v3792_v16 = vadd.f32 %v3772_v6, %v3686_v18  ;;  %v9871_v6 = vld [vmem:[#allocation7_spill] sm:$0xff] }
 0x775   : > { %v9177_v31 = vmul.f32 %v3792_v16, %v8136_v38  ;;  %v6964_v38 = vld [vmem:[%s9719_s6 + $0x378] sm:$0xff] }
 0x776   : > { %v3493_v44 = vpop.f32.mrf.mxu2 }
 0x777   : > { %v3571_v2 = vadd.f32 %v3570_v21, %v3493_v44  ;;  %v9776_v47 = vmax.f32 %v9177_v31, 0.0  ;;  %v3583_v21 = vpop.f32.mrf.mxu3 }
 0x779   : > { %v3687_v8 = vadd.f32 %v3668_v15, %v3571_v2 }
 0x77a   : > { %v3777_v51 = vpop.f32.mrf.mxu1 }
 0x77b   : > { %v3793_v32 = vadd.f32 %v3774_v25, %v3687_v8 }
 0x77d   : > { %v9180_v54 = vmul.f32 %v3793_v32, %v9867_v0 }
 0x77e   : > { %v3496_v3 = vpop.f32.mrf.mxu2 }
 0x77f   : > { %v9775_v56 = vmax.f32 %v9180_v54, 0.0  ;;  %v3574_v52 = vadd.f32 %v3573_v59, %v3496_v3  ;;  %v3585_v2 = vpop.f32.mrf.mxu3 }
 0x781   : > { %v9188_v55 = vpack.c.bf16 %v9775_v56, %v9776_v47  ;;  %v3688_v45 = vadd.f32 %v3671_v30, %v3574_v52 }
 0x782   : > { %v3779_v35 = vpop.f32.mrf.mxu1 }
 0x783   : > { %3925 = vmatmul.bf16.vlgmr.msra.gmra.mxu2 %v9188_v55  ;;  %3954 = vmatmul.bf16.vlgmr.msra.gmra.mxu3 %v9188_v55  ;;  %v3794_v13 = vadd.f32 %v3777_v51, %v3688_v45 }
 0x785   : > { %v9193_v39 = vmul.f32 %v3794_v13, %v9868_v12 }
 0x786   : > { %v3498_v60 = vpop.f32.mrf.mxu2 }
 0x787   : > { %v3576_v9 = vadd.f32 %v3575_v61, %v3498_v60  ;;  %v9774_v46 = vmax.f32 %v9193_v39, 0.0  ;;  %v3683_v61 = vpop.f32.mrf.mxu0  ;;  %v9873_v60 = vld [vmem:[#allocation20_spill] sm:$0xff] }
 0x789   : > { %v3689_v37 = vadd.f32 %v3673_v41, %v3576_v9 }
 0x78a   : > { %v3782_v27 = vpop.f32.mrf.mxu1 }
 0x78b   : > { %v3795_v43 = vadd.f32 %v3779_v35, %v3689_v37  ;;  %v9872_v35 = vld [vmem:[#allocation9_spill] sm:$0xff] }
 0x78d   : > { %v9196_v33 = vmul.f32 %v3795_v43, %v9869_v62 }
 0x78e   : > { %v3501_v11 = vpop.f32.mrf.mxu2 }
 0x78f   : > { %v3579_v10 = vadd.f32 %v3578_v49, %v3501_v11  ;;  %v9773_v5 = vmax.f32 %v9196_v33, 0.0 }
 0x791   : > { %v9204_v40 = vpack.c.bf16 %v9773_v5, %v9774_v46  ;;  %v3690_v1 = vadd.f32 %v3676_v7, %v3579_v10  ;;  %v7182_v5 = vld [vmem:[%s7614_s23 + $0x18] sm:$0xff] }
 0x792   : > { %v3784_v14 = vpop.f32.mrf.mxu1 }
 0x793   : > { %3930 = vmatmul.bf16.gmra.mxu2 %v9204_v40  ;;  %3959 = vmatmul.bf16.gmra.mxu3 %v9204_v40  ;;  %v3796_v50 = vadd.f32 %v3782_v27, %v3690_v1 }
 0x795   : > { %v9209_v23 = vmul.f32 %v3796_v50, %v9870_v24 }
 0x796   : > { %v3503_v28 = vpop.f32.mrf.mxu2 }
 0x797   : > { %v3581_v53 = vadd.f32 %v3580_v19, %v3503_v28  ;;  %v9772_v18 = vmax.f32 %v9209_v23, 0.0 }
 0x799   : > { %v3691_v34 = vadd.f32 %v3678_v48, %v3581_v53 }
 0x79a   : > { %v3787_v30 = vpop.f32.mrf.mxu1 }
 0x79b   : > { %v3797_v42 = vadd.f32 %v3784_v14, %v3691_v34  ;;  %v7141_v34 = vld [vmem:[%s7537_s14] sm:$0xff] }
 0x79d   : > { %v9212_v15 = vmul.f32 %v3797_v42, %v9871_v6  ;;  %v7142_v42 = vld [vmem:[%s7537_s14 + $0x20] sm:$0xff] }
 0x79e   : > { %v3506_v63 = vpop.f32.mrf.mxu2 }
 0x79f   : > { %v3584_v25 = vadd.f32 %v3583_v21, %v3506_v63  ;;  %v9771_v59 = vmax.f32 %v9212_v15, 0.0  ;;  %v7143_v21 = vld [vmem:[%s7537_s14 + $0x40] sm:$0xff]  ;;  %v7145_v63 = vld [vmem:[%s7537_s14 + $0x8] sm:$0xff] }
 0x7a1   : > { %v9220_v44 = vpack.c.bf16 %v9771_v59, %v9772_v18  ;;  %v3692_v16 = vadd.f32 %v3681_v22, %v3584_v25  ;;  %v7144_v22 = vld [vmem:[%s7537_s14 + $0x60] sm:$0xff]  ;;  %v7146_v25 = vld [vmem:[%s7537_s14 + $0x28] sm:$0xff] }
 0x7a2   : > { %v3789_v52 = vpop.f32.mrf.mxu1 }
 0x7a3   : > { %3935 = vmatmul.bf16.gmra.mxu2 %v9220_v44  ;;  %3964 = vmatmul.bf16.gmra.mxu3 %v9220_v44  ;;  %v3798_v51 = vadd.f32 %v3787_v30, %v3692_v16  ;;  %v7147_v30 = vld [vmem:[%s7537_s14 + $0x48] sm:$0xff] }
 0x7a4   : > { %v7148_v16 = vld [vmem:[%s7537_s14 + $0x68] sm:$0xff] }
 0x7a5   : > { %v9225_v45 = vmul.f32 %v3798_v51, %v9872_v35  ;;  %v7151_v51 = vld [vmem:[%s7537_s14 + $0x50] sm:$0xff] }
 0x7a6   : > { %v3508_v8 = vpop.f32.mrf.mxu2 }
 0x7a7   : > { %v3586_v32 = vadd.f32 %v3585_v2, %v3508_v8  ;;  %v9770_v9 = vmax.f32 %v9225_v45, 0.0  ;;  %v7149_v2 = vld [vmem:[%s7537_s14 + $0x10] sm:$0xff] }
 0x7a8   : > { %v7150_v8 = vld [vmem:[%s7537_s14 + $0x30] sm:$0xff] }
 0x7a9   : > { %v3693_v3 = vadd.f32 %v3683_v61, %v3586_v32  ;;  %v7152_v32 = vld [vmem:[%s7537_s14 + $0x70] sm:$0xff]  ;;  %v7153_v61 = vld [vmem:[%s7537_s14 + $0x18] sm:$0xff] }
 0x7ab   : > { %v3799_v41 = vadd.f32 %v3789_v52, %v3693_v3  ;;  %v7154_v3 = vld [vmem:[%s7537_s14 + $0x38] sm:$0xff] }
 0x7ac   : > { %v7155_v52 = vld [vmem:[%s7537_s14 + $0x58] sm:$0xff] }
 0x7ad   : > { %v9228_v13 = vmul.f32 %v3799_v41, %v9873_v60  ;;  %v7156_v41 = vld [vmem:[%s7537_s14 + $0x78] sm:$0xff] }
 0x7af   : > { %v9769_v49 = vmax.f32 %v9228_v13, 0.0 }
 0x7b1   : > { %v9236_v37 = vpack.c.bf16 %v9769_v49, %v9770_v9  ;;  %v6966_v9 = vld [vmem:[%s9719_s6 + $0x388] sm:$0xff] }
 0x7b3   : > { %3940 = vmatmul.bf16.gmra.mxu2 %v9236_v37  ;;  %3969 = vmatmul.bf16.gmra.mxu3 %v9236_v37 }
 0x806   : > { %v9240_v7 = vpop.f32.mrf.mxu2 }
 0x80e   : > { %v9242_v43 = vpop.f32.mrf.mxu2 }
 0x80f   : > { %v3975_v53 = vpack.c.bf16 %v9242_v43, %v9240_v7 }
 0x816   : > { %v9244_v27 = vpop.f32.mrf.mxu2 }
 0x81e   : > { %v9246_v11 = vpop.f32.mrf.mxu2 }
 0x81f   : > { %v3976_v50 = vpack.c.bf16 %v9246_v11, %v9244_v27 }
 0x826   : > { %v3936_v10 = vpop.f32.mrf.mxu2 }
 0x82e   : > { %v3938_v19 = vpop.f32.mrf.mxu2 }
 0x82f   : > { %v3977_v28 = vpack.c.bf16 %v3938_v19, %v3936_v10 }
 0x836   : > { %v3941_v1 = vpop.f32.mrf.mxu2 }
 0x83e   : > { %v3943_v48 = vpop.f32.mrf.mxu2 }
 0x83f   : > { %v3978_v14 = vpack.c.bf16 %v3943_v48, %v3941_v1 }
 0x841   : > { %3983 = vmatpush.bf16.msra.mxu0 %v3978_v14  ;;  %4012 = vmatpush.bf16.msra.mxu1 %v3978_v14 }
 0x842   : > { %4049 = vmatpush.bf16.msrb.mxu2 %v3978_v14  ;;  %4086 = vmatpush.bf16.msrb.mxu3 %v3978_v14 }
 0x845   : > { %3984 = vmatpush.bf16.msra.mxu0 %v3977_v28  ;;  %4013 = vmatpush.bf16.msra.mxu1 %v3977_v28 }
 0x846   : > { %4050 = vmatpush.bf16.msrb.mxu2 %v3977_v28  ;;  %4087 = vmatpush.bf16.msrb.mxu3 %v3977_v28 }
 0x849   : > { %3985 = vmatpush.bf16.msra.mxu0 %v3976_v50  ;;  %4014 = vmatpush.bf16.msra.mxu1 %v3976_v50 }
 0x84a   : > { %4051 = vmatpush.bf16.msrb.mxu2 %v3976_v50  ;;  %4088 = vmatpush.bf16.msrb.mxu3 %v3976_v50 }
 0x84d   : > { %3986 = vmatpush.bf16.msra.mxu0 %v3975_v53  ;;  %4015 = vmatpush.bf16.msra.mxu1 %v3975_v53 }
 0x84e   : > { %4052 = vmatpush.bf16.msrb.mxu2 %v3975_v53  ;;  %4089 = vmatpush.bf16.msrb.mxu3 %v3975_v53 }
 0x850   : > { %6380 = vmatmul.msk.bf16.vlgmr.msra.gmra.mxu0 %vm633_vm0, %v7141_v34  ;;  %6384 = vmatmul.msk.bf16.vlgmr.msra.gmra.mxu1 %vm633_vm0, %v7142_v42  ;;  %v7162_v34 = vld [vmem:[%s7537_s14 + $0xa8] sm:$0xff]  ;;  %v6952_v42 = vld [vmem:[%s9719_s6 + $0x318] sm:$0xff] }
 0x851   : > { %4123 = vmatpush.bf16.msrb.mxu0 %v3978_v14  ;;  %4160 = vmatpush.bf16.msrb.mxu1 %v3978_v14 }
 0x852   : > { %4197 = vmatpush.bf16.msra.mxu2 %v3978_v14  ;;  %4234 = vmatpush.bf16.msra.mxu3 %v3978_v14 }
 0x853   : > { %6388 = vmatmul.msk.bf16.vlgmr.msrb.gmra.mxu2 %vm633_vm0, %v7143_v21  ;;  %6392 = vmatmul.msk.bf16.vlgmr.msrb.gmra.mxu3 %vm633_vm0, %v7144_v22  ;;  %v7163_v21 = vld [vmem:[%s7537_s14 + $0xc8] sm:$0xff] }
 0x854   : > { %v7164_v22 = vld [vmem:[%s7537_s14 + $0xe8] sm:$0xff] }
 0x855   : > { %4124 = vmatpush.bf16.msrb.mxu0 %v3977_v28  ;;  %4161 = vmatpush.bf16.msrb.mxu1 %v3977_v28 }
 0x856   : > { %4198 = vmatpush.bf16.msra.mxu2 %v3977_v28  ;;  %4235 = vmatpush.bf16.msra.mxu3 %v3977_v28 }
 0x859   : > { %4125 = vmatpush.bf16.msrb.mxu0 %v3976_v50  ;;  %4162 = vmatpush.bf16.msrb.mxu1 %v3976_v50 }
 0x85a   : > { %4199 = vmatpush.bf16.msra.mxu2 %v3976_v50  ;;  %4236 = vmatpush.bf16.msra.mxu3 %v3976_v50 }
 0x85d   : > { %4126 = vmatpush.bf16.msrb.mxu0 %v3975_v53  ;;  %4163 = vmatpush.bf16.msrb.mxu1 %v3975_v53 }
 0x85e   : > { %4200 = vmatpush.bf16.msra.mxu2 %v3975_v53  ;;  %4237 = vmatpush.bf16.msra.mxu3 %v3975_v53 }
 0x860   : > { %6381 = vmatmul.msk.bf16.gmra.mxu0 %vm633_vm0, %v7145_v63  ;;  %6385 = vmatmul.msk.bf16.gmra.mxu1 %vm633_vm0, %v7146_v25  ;;  %v6951_v63 = vld [vmem:[%s9719_s6 + $0x310] sm:$0xff] }
 0x861   : > { %4279 = vmatpush.bf16.msra.mxu0 %v3978_v14  ;;  %4328 = vmatpush.msra.mxu1 %v3943_v48  ;;  %v6955_v48 = vld [vmem:[%s9719_s6 + $0x330] sm:$0xff]  ;;  %v6954_v14 = vld [vmem:[%s9719_s6 + $0x328] sm:$0xff] }
 0x862   : > { %4455 = vmatpush.bf16.msrb.mxu2 %v6964_v38  ;;  %v6979_v38 = vld [vmem:[%s9719_s6 + $0x3f0] sm:$0xff] }
 0x863   : > { %4329 = vmatpush.msra.mxu1 %v3941_v1  ;;  %6389 = vmatmul.msk.bf16.gmra.mxu2 %vm633_vm0, %v7147_v30  ;;  %v7160_v1 = vld [vmem:[%s7537_s14 + $0xe0] sm:$0xff]  ;;  %v6950_v30 = vld [vmem:[%s9719_s6 + $0x308] sm:$0xff] }
 0x864   : > { %6393 = vmatmul.msk.bf16.gmra.mxu3 %vm633_vm0, %v7148_v16  ;;  %v6949_v16 = vld [vmem:[%s9719_s6 + $0x300] sm:$0xff] }
 0x865   : > { %4280 = vmatpush.bf16.msra.mxu0 %v3977_v28  ;;  %4330 = vmatpush.msra.mxu1 %v3938_v19  ;;  %v7159_v19 = vld [vmem:[%s7537_s14 + $0xc0] sm:$0xff] }
 0x867   : > { %4331 = vmatpush.msra.mxu1 %v3936_v10  ;;  %v6956_v10 = vld [vmem:[%s9719_s6 + $0x338] sm:$0xff] }
 0x868   : > { %4532 = vmatpush.bf16.msrb.mxu3 %v6956_v10  ;;  %v7172_v10 = vld [vmem:[%s7537_s14 + $0xf8] sm:$0xff] }
 0x869   : > { %4281 = vmatpush.bf16.msra.mxu0 %v3976_v50  ;;  %4332 = vmatpush.msra.mxu1 %v9246_v11  ;;  %v7158_v11 = vld [vmem:[%s7537_s14 + $0xa0] sm:$0xff] }
 0x86a   : > { %v6953_v50 = vld [vmem:[%s9719_s6 + $0x320] sm:$0xff] }
 0x86b   : > { %4333 = vmatpush.msra.mxu1 %v9244_v27  ;;  %v7157_v27 = vld [vmem:[%s7537_s14 + $0x80] sm:$0xff] }
 0x86c   : > { %4533 = vmatpush.bf16.msrb.mxu3 %v6955_v48 }
 0x86d   : > { %4282 = vmatpush.bf16.msra.mxu0 %v3975_v53  ;;  %4334 = vmatpush.msra.mxu1 %v9242_v43  ;;  %v7161_v53 = vld [vmem:[%s7537_s14 + $0x88] sm:$0xff] }
 0x86f   : > { %4335 = vmatpush.msra.mxu1 %v9240_v7  ;;  %v9288_v7 = vpop.f32.mrf.mxu3 }
 0x870   : > { %6382 = vmatmul.msk.bf16.gmra.mxu0 %vm633_vm0, %v7149_v2  ;;  %6386 = vmatmul.msk.bf16.gmra.mxu1 %vm633_vm0, %v7150_v8  ;;  %v7165_v8 = vld [vmem:[%s7537_s14 + $0x90] sm:$0xff] }
 0x871   : > { %4534 = vmatpush.bf16.msrb.mxu3 %v6954_v14 }
 0x873   : > { %6390 = vmatmul.msk.bf16.gmra.mxu2 %vm633_vm0, %v7151_v51  ;;  %v7166_v51 = vld [vmem:[%s7537_s14 + $0xb0] sm:$0xff] }
 0x874   : > { %6394 = vmatmul.msk.bf16.gmra.mxu3 %vm633_vm0, %v7152_v32  ;;  %v7167_v32 = vld [vmem:[%s7537_s14 + $0xd0] sm:$0xff] }
 0x875   : > { %4535 = vmatpush.bf16.msrb.mxu3 %v6953_v50  ;;  %v7173_v50 = vld [vmem:[%s7614_s23] sm:$0xff] }
 0x877   : > { %v9290_v43 = vpop.f32.mrf.mxu3 }
 0x879   : > { %4536 = vmatpush.bf16.msrb.mxu3 %v6952_v42 }
 0x87d   : > { %4537 = vmatpush.bf16.msrb.mxu3 %v6951_v63 }
 0x87f   : > { %v9309_v28 = vpop.f32.mrf.mxu3 }
 0x880   : > { %6383 = vmatmul.msk.bf16.gmra.mxu0 %vm633_vm0, %v7153_v61  ;;  %6387 = vmatmul.msk.bf16.gmra.mxu1 %vm633_vm0, %v7154_v3  ;;  %v7168_v61 = vld [vmem:[%s7537_s14 + $0xf0] sm:$0xff] }
 0x881   : > { %4538 = vmatpush.bf16.msrb.mxu3 %v6950_v30 }
 0x883   : > { %6391 = vmatmul.msk.bf16.gmra.mxu2 %vm633_vm0, %v7155_v52  ;;  %v7169_v52 = vld [vmem:[%s7537_s14 + $0x98] sm:$0xff] }
 0x884   : > { %6395 = vmatmul.msk.bf16.gmra.mxu3 %vm633_vm0, %v7156_v41  ;;  %v7170_v41 = vld [vmem:[%s7537_s14 + $0xb8] sm:$0xff] }
 0x885   : > { %4539 = vmatpush.bf16.msrb.mxu3 %v6949_v16  ;;  %v7175_v16 = vld [vmem:[%s7621_s27 + $0x8] sm:$0xff] }
 0x887   : > { %v9328_v25 = vpop.f32.mrf.mxu3 }
 0x88f   : > { %v9336_v2 = vpop.f32.mrf.mxu3 }
 0x890   : > { %6396 = vmatmul.msk.bf16.vlgmr.msrb.gmra.mxu0 %vm633_vm0, %v7157_v27  ;;  %6400 = vmatmul.msk.bf16.vlgmr.msrb.gmra.mxu1 %vm633_vm0, %v7158_v11  ;;  %v7171_v11 = vld [vmem:[%s7537_s14 + $0xd8] sm:$0xff]  ;;  %s7199_s14 = sshra.s32 %s5068_s1, 4  ;;  %s7200_s14 = int_to_ptr.hbm [resolvable:$true] %s7199_s14 }
 0x891   : > { %s7201_s21 = scalar_lea.hbm %s7200_s14, 1  ;;  %p7206_p0 = scmp.lt.s32.totalorder %s7200_s14, %s9722_s9 }
 0x892   : > { %p7202_p11 = scmp.ne.s32.totalorder %s7200_s14, %s7201_s21  ;;  %p7207_p1 = scmp.lt.s32.totalorder %s7205_s28, %s7201_s21 }
 0x893   : > { %6404 = vmatmul.msk.bf16.vlgmr.msra.gmra.mxu2 %vm633_vm0, %v7159_v19 }
 0x894   : > { %6408 = vmatmul.msk.bf16.vlgmr.msra.gmra.mxu3 %vm633_vm0, %v7160_v1  ;;  %p7203_p12 = pnand %p7202_p11, %p7340_p5  ;;  %p7208_p2 = por %p7207_p1, %p7206_p0 }
 0x896   : > { %p7204_p13 = pneg %p7203_p12 }
 0x897   : > { %v9346_v3 = vpop.f32.mrf.mxu3 }
 0x898   : > { %p7209_p3 = pnand %p7208_p2, %p7204_p13 }
 0x89f   : > { %v9352_v27 = vpop.f32.mrf.mxu3 }
 0x8a0   : > { %6397 = vmatmul.msk.bf16.gmra.mxu0 %vm633_vm0, %v7161_v53  ;;  %6401 = vmatmul.msk.bf16.gmra.mxu1 %vm633_vm0, %v7162_v34  ;;  %v7174_v53 = vld [vmem:[%s7621_s27] sm:$0xff] }
 0x8a3   : > { %6405 = vmatmul.msk.bf16.gmra.mxu2 %vm633_vm0, %v7163_v21 }
 0x8a4   : > { %6409 = vmatmul.msk.bf16.gmra.mxu3 %vm633_vm0, %v7164_v22 }
 0x8a7   : > { %v9358_v19 = vpop.f32.mrf.mxu3 }
 0x8b0   : > { %6398 = vmatmul.msk.bf16.gmra.mxu0 %vm633_vm0, %v7165_v8  ;;  %6402 = vmatmul.msk.bf16.gmra.mxu1 %vm633_vm0, %v7166_v51 }
 0x8b3   : > { %6406 = vmatmul.msk.bf16.gmra.mxu2 %vm633_vm0, %v7167_v32 }
 0x8b4   : > { %6410 = vmatmul.msk.bf16.gmra.mxu3 %vm633_vm0, %v7168_v61 }
 0x8c0   : > { %6399 = vmatmul.msk.bf16.gmra.mxu0 %vm633_vm0, %v7169_v52  ;;  %6403 = vmatmul.msk.bf16.gmra.mxu1 %vm633_vm0, %v7170_v41  ;;  %v7176_v52 = vld [vmem:[%s7614_s23 + $0x8] sm:$0xff]  ;;  %v7177_v41 = vld [vmem:[%s7621_s27 + $0x10] sm:$0xff] }
 0x8c3   : > { %6407 = vmatmul.msk.bf16.gmra.mxu2 %vm633_vm0, %v7171_v11 }
 0x8c4   : > { %6411 = vmatmul.msk.bf16.gmra.mxu3 %vm633_vm0, %v7172_v10 }
 0x8cd   : > { %v3988_v1 = vpop.f32.mrf.mxu0  ;;  %v4017_v48 = vpop.f32.mrf.mxu1 }
 0x8ce   : > { %v4037_v14 = vmax.f32 %v3988_v1, %v4017_v48  ;;  %v6972_v1 = vld [vmem:[%s9719_s6 + $0x3b8] sm:$0xff] }
 0x8cf   : > { %4630 = vmatpush.bf16.msrb.mxu0 %v6972_v1  ;;  %v7180_v1 = vld [vmem:[%s7621_s27 + $0x20] sm:$0xff] }
 0x8d0   : > { %6412 = vmatmul.msk.bf16.vlgmr.msra.gmra.mxu0 %vm633_vm0, %v7173_v50  ;;  %6416 = vmatmul.msk.f32.vlgmr.msra.gmra.mxu1 %vm633_vm0, %v7174_v53 }
 0x8d4   : > { %4540 = vmatmul.bf16.vlgmr.msrb.gmra.mxu3 %v9188_v55 }
 0x8d5   : > { %v9369_v22 = vpop.f32.mrf.mxu0  ;;  %v9371_v63 = vpop.f32.mrf.mxu1 }
 0x8d6   : > { %v4054_v34 = vpop.f32.mrf.mxu2  ;;  %v9365_v42 = vpop.f32.mrf.mxu3 }
 0x8d7   : > { %v9367_v21 = vmax.f32 %v4037_v14, %v4054_v34  ;;  %v6971_v34 = vld [vmem:[%s9719_s6 + $0x3b0] sm:$0xff] }
 0x8d8   : > { %6417 = vmatmul.msk.f32.gmra.mxu1 %vm633_vm0, %v7175_v16  ;;  %4631 = vmatpush.bf16.msrb.mxu0 %v6971_v34 }
 0x8d9   : > { %v4111_v30 = vmax.f32 %v9367_v21, %v9365_v42  ;;  %v6980_v42 = vld [vmem:[%s9719_s6 + $0x3f8] sm:$0xff] }
 0x8da   : > { %4736 = vmatpush.bf16.msrb.mxu1 %v6980_v42 }
 0x8dd   : > { %v3993_v55 = vpop.f32.mrf.mxu0  ;;  %v4022_v32 = vpop.f32.mrf.mxu1 }
 0x8de   : > { %v9377_v8 = vpop.f32.mrf.mxu2  ;;  %v9379_v51 = vpop.f32.mrf.mxu3  ;;  %v4039_v61 = vmax.f32 %v3993_v55, %v4022_v32  ;;  %v6970_v32 = vld [vmem:[%s9719_s6 + $0x3a8] sm:$0xff]  ;;  %4737 = vmatpush.bf16.msrb.mxu1 %v6979_v38 }
 0x8df   : > { %4632 = vmatpush.bf16.msrb.mxu0 %v6970_v32  ;;  %v6968_v32 = vld [vmem:[%s9719_s6 + $0x398] sm:$0xff] }
 0x8e0   : > { %6413 = vmatmul.msk.bf16.gmra.mxu0 %vm633_vm0, %v7176_v52  ;;  %6418 = vmatmul.msk.f32.gmra.mxu1 %vm633_vm0, %v7177_v41 }
 0x8e4   : > { %4545 = vmatmul.bf16.gmra.mxu3 %v9204_v40  ;;  %v7178_v40 = vld [vmem:[%s7621_s27 + $0x18] sm:$0xff] }
 0x8e5   : > { %v9393_v14 = vpop.f32.mrf.mxu0  ;;  %v9395_v50 = vpop.f32.mrf.mxu1 }
 0x8e6   : > { %v4059_v11 = vpop.f32.mrf.mxu2 }
 0x8e7   : > { %v9386_v10 = vpop.f32.mrf.mxu3  ;;  %v9391_v48 = vmax.f32 %v4039_v61, %v4059_v11  ;;  %v7179_v11 = vld [vmem:[%s7614_s23 + $0x10] sm:$0xff]  ;;  %s383_s23 = sand.u32 1, %s7239_s10  }
 0x8e8   : > { %6419 = vmatmul.msk.f32.gmra.mxu1 %vm633_vm0, %v7178_v40  ;;  %v6969_v40 = vld [vmem:[%s9719_s6 + $0x3a0] sm:$0xff]  ;;  %s384_s22 = scalar_lea.vmem [#allocation2], %s383_s23  ;;  %s5055_s25 = scalar_lea.sflag [#allocation3], %s383_s23 }
 0x8e9   : > { %4633 = vmatpush.bf16.msrb.mxu0 %v6969_v40  ;;  %v6967_v40 = vld [vmem:[%s9719_s6 + $0x390] sm:$0xff]  ;;  %s5065_s24 = sshll.u32 %s384_s22, 4  ;;  %s5066_s24 = int_to_ptr.vmem [resolvable:$true] %s5065_s24 }
 0x8ed   : > { %v3998_v61 = vpop.f32.mrf.mxu0  ;;  %v4027_v52 = vpop.f32.mrf.mxu1  ;;  %4634 = vmatpush.bf16.msrb.mxu0 %v6968_v32 }
 0x8ee   : > { %v9404_v16 = vpop.f32.mrf.mxu2  ;;  %v4041_v41 = vmax.f32 %v3998_v61, %v4027_v52 }
 0x8ef   : > { %v9406_v55 = vpop.f32.mrf.mxu3 }
 0x8f0   : > { %6414 = vmatmul.msk.bf16.gmra.mxu0 %vm633_vm0, %v7179_v11  ;;  %6420 = vmatmul.msk.f32.gmra.mxu1 %vm633_vm0, %v7180_v1  ;;  %v7181_v1 = vld [vmem:[%s7621_s27 + $0x28] sm:$0xff] }
 0x8f1   : > { %4635 = vmatpush.bf16.msrb.mxu0 %v6967_v40  ;;  %v6965_v40 = vld [vmem:[%s9719_s6 + $0x380] sm:$0xff] }
 0x8f4   : > { %4550 = vmatmul.bf16.gmra.mxu3 %v9220_v44 }
 0x8f5   : > { %v9426_v52 = vpop.f32.mrf.mxu0  ;;  %v9428_v11 = vpop.f32.mrf.mxu1  ;;  %4636 = vmatpush.bf16.msrb.mxu0 %v6966_v9 }
 0x8f6   : > { %v4064_v34 = vpop.f32.mrf.mxu2 }
 0x8f7   : > { %v9419_v49 = vpop.f32.mrf.mxu3  ;;  %v9424_v61 = vmax.f32 %v4041_v41, %v4064_v34 }
 0x8f8   : > { %6421 = vmatmul.msk.f32.gmra.mxu1 %vm633_vm0, %v7181_v1  ;;  %v7183_v1 = vld [vmem:[%s7621_s27 + $0x30] sm:$0xff] }
 0x8f9   : > { %4637 = vmatpush.bf16.msrb.mxu0 %v6965_v40 }
 0x8fd   : > { %v4003_v32 = vpop.f32.mrf.mxu0  ;;  %v4032_v59 = vpop.f32.mrf.mxu1 }
 0x8fe   : > { %v9437_v41 = vpop.f32.mrf.mxu2  ;;  %v4043_v18 = vmax.f32 %v4003_v32, %v4032_v59  ;;  %v7184_v32 = vld [vmem:[%s7621_s27 + $0x38] sm:$0xff] }
 0x8ff   : > { %v9439_v34 = vpop.f32.mrf.mxu3 }
 0x900   : > { %6415 = vmatmul.msk.bf16.gmra.mxu0 %vm633_vm0, %v7182_v5  ;;  %6422 = vmatmul.msk.f32.gmra.mxu1 %vm633_vm0, %v7183_v1 }
 0x904   : > { %4555 = vmatmul.bf16.gmra.mxu3 %v9236_v37 }
 0x905   : > { %v9456_v59 = vpop.f32.mrf.mxu0  ;;  %v9458_v9 = vpop.f32.mrf.mxu1 }
 0x906   : > { %v4069_v46 = vpop.f32.mrf.mxu2 }
 0x907   : > { %v9452_v56 = vpop.f32.mrf.mxu3  ;;  %v9454_v47 = vmax.f32 %v4043_v18, %v4069_v46  ;;  %v4038_v46 = vmax.f32 %v9369_v22, %v9371_v63 }
 0x908   : > { %6423 = vmatmul.msk.f32.gmra.mxu1 %vm633_vm0, %v7184_v32 }
 0x909   : > { %v4075_v18 = vmax.f32 %v4038_v46, %v9377_v8 }
 0x90b   : > { %v4112_v35 = vmax.f32 %v4075_v18, %v9379_v51 }
 0x90d   : > { %v4128_v37 = vpop.f32.mrf.mxu0  ;;  %v4165_v40 = vpop.f32.mrf.mxu1 }
 0x90e   : > { %v9464_v1 = vpop.f32.mrf.mxu2  ;;  %v4148_v53 = vmax.f32 %v4111_v30, %v4128_v37 }
 0x90f   : > { %v9466_v44 = vpop.f32.mrf.mxu3 }
 0x910   : > { %v4185_v24 = vmax.f32 %v4148_v53, %v4165_v40  ;;  %v6962_v53 = vld [vmem:[%s9719_s6 + $0x368] sm:$0xff] }
 0x915   : > { %v4130_v32 = vpop.f32.mrf.mxu0  ;;  %v4167_v6 = vpop.f32.mrf.mxu1 }
 0x916   : > { %v4202_v60 = vpop.f32.mrf.mxu2  ;;  %v4149_v62 = vmax.f32 %v4112_v35, %v4130_v32  ;;  %v4040_v35 = vmax.f32 %v9393_v14, %v9395_v50  ;;  %v9874_v14 = vmax.f32 %v9391_v48, %v9386_v10  ;;  %v6977_v48 = vld [vmem:[%s9719_s6 + $0x3e0] sm:$0xff] }
 0x917   : > { %v4239_v5 = vpop.f32.mrf.mxu3  ;;  %v4222_v12 = vmax.f32 %v4185_v24, %v4202_v60  ;;  %v6963_v24 = vld [vmem:[%s9719_s6 + $0x370] sm:$0xff] }
 0x918   : > { %v4186_v22 = vmax.f32 %v4149_v62, %v4167_v6  ;;  %4456 = vmatpush.bf16.msrb.mxu2 %v6963_v24  ;;  %v4077_v6 = vmax.f32 %v4040_v35, %v9404_v16  ;;  %v6978_v16 = vld [vmem:[%s9719_s6 + $0x3e8] sm:$0xff] }
 0x919   : > { %v4259_v21 = vmax.f32 %v4222_v12, %v4239_v5  ;;  %4738 = vmatpush.bf16.msrb.mxu1 %v6978_v16 }
 0x91a   : > { %v4114_v18 = vmax.f32 %v4077_v6, %v9406_v55  ;;  %v6960_v55 = vld [vmem:[%s9719_s6 + $0x358] sm:$0xff]  ;;  %v6959_v6 = vld [vmem:[%s9719_s6 + $0x350] sm:$0xff] }
 0x91b   : > { %v4267_v12 = vadd.f32 %v4259_v21, %v9288_v7 }
 0x91c   : > { %4457 = vmatpush.bf16.msrb.mxu2 %v6962_v53  ;;  %v6975_v53 = vld [vmem:[%s9719_s6 + $0x3d0] sm:$0xff] }
 0x91d   : > { %v4133_v51 = vpop.f32.mrf.mxu0  ;;  %v4170_v37 = vpop.f32.mrf.mxu1  ;;  %4739 = vmatpush.bf16.msrb.mxu1 %v6977_v48 }
 0x91e   : > { %v4204_v63 = vpop.f32.mrf.mxu2  ;;  %v4150_v50 = vmax.f32 %v9874_v14, %v4133_v51 }
 0x91f   : > { %v4241_v8 = vpop.f32.mrf.mxu3  ;;  %v4223_v30 = vmax.f32 %v4186_v22, %v4204_v63  ;;  %v6961_v63 = vld [vmem:[%s9719_s6 + $0x360] sm:$0xff] }
 0x920   : > { %4458 = vmatpush.bf16.msrb.mxu2 %v6961_v63 }
 0x921   : > { %v4260_v62 = vmax.f32 %v4223_v30, %v4241_v8  ;;  %v4187_v8 = vmax.f32 %v4150_v50, %v4170_v37  ;;  %v6976_v37 = vld [vmem:[%s9719_s6 + $0x3d8] sm:$0xff] }
 0x922   : > { %4740 = vmatpush.bf16.msrb.mxu1 %v6976_v37 }
 0x923   : > { %v4268_v60 = vadd.f32 %v4260_v62, %v9290_v43 }
 0x924   : > { %4459 = vmatpush.bf16.msrb.mxu2 %v6960_v55 }
 0x925   : > { %v4561_v5 = vpack.c.bf16 %v4268_v60, %v4267_v12  ;;  %v4135_v32 = vpop.f32.mrf.mxu0  ;;  %v4172_v22 = vpop.f32.mrf.mxu1  ;;  %v4042_v12 = vmax.f32 %v9426_v52, %v9428_v11  ;;  %v9875_v52 = vmax.f32 %v9424_v61, %v9419_v49 }
 0x926   : > { %v4207_v40 = vpop.f32.mrf.mxu2  ;;  %v4151_v10 = vmax.f32 %v4114_v18, %v4135_v32  ;;  %4741 = vmatpush.bf16.msrb.mxu1 %v6975_v53 }
 0x927   : > { %v4244_v46 = vpop.f32.mrf.mxu3  ;;  %4638 = vmatmul.bf16.vlgmr.msrb.gmra.mxu0 %v4561_v5  ;;  %v4224_v42 = vmax.f32 %v4187_v8, %v4207_v40  ;;  %v4079_v5 = vmax.f32 %v4042_v12, %v9437_v41  ;;  %v6958_v40 = vld [vmem:[%s9719_s6 + $0x348] sm:$0xff]  ;;  %v6957_v8 = vld [vmem:[%s9719_s6 + $0x340] sm:$0xff]  ;;  %v9876_v12 = vmax.f32 %v9454_v47, %v9452_v56  ;;  %v9877_v47 = vmax.f32 %v9177_v31, 0.0 }
 0x928   : > { %v4188_v21 = vmax.f32 %v4151_v10, %v4172_v22  ;;  %4460 = vmatpush.bf16.msrb.mxu2 %v6959_v6  ;;  %v6974_v41 = vld [vmem:[%s9719_s6 + $0x3c8] sm:$0xff]  ;;  %v6973_v10 = vld [vmem:[%s9719_s6 + $0x3c0] sm:$0xff] }
 0x929   : > { %v4261_v24 = vmax.f32 %v4224_v42, %v4244_v46  ;;  %v4116_v32 = vmax.f32 %v4079_v5, %v9439_v34  ;;  %v4304_v56 = vsub.f32 %v9288_v7, %v9877_v47 }
 0x92a   : > { %4742 = vmatpush.bf16.msrb.mxu1 %v6974_v41 }
 0x92b   : > { %v4269_v14 = vadd.f32 %v4261_v24, %v9309_v28  ;;  %v4044_v24 = vmax.f32 %v9456_v59, %v9458_v9 }
 0x92c   : > { %4461 = vmatpush.bf16.msrb.mxu2 %v6958_v40 }
 0x92d   : > { %v4138_v62 = vpop.f32.mrf.mxu0  ;;  %v4175_v38 = vpop.f32.mrf.mxu1 }
 0x92e   : > { %v4209_v30 = vpop.f32.mrf.mxu2  ;;  %v4152_v11 = vmax.f32 %v9875_v52, %v4138_v62  ;;  %4743 = vmatpush.bf16.msrb.mxu1 %v6973_v10  ;;  %v4081_v62 = vmax.f32 %v4044_v24, %v9464_v1  ;;  %v4312_v10 = vmul.f32 %v4304_v56, %v9843_v20 }
 0x92f   : > { %v4246_v51 = vpop.f32.mrf.mxu3  ;;  %v4225_v35 = vmax.f32 %v4188_v21, %v4209_v30 }
 0x930   : > { %v4189_v49 = vmax.f32 %v4152_v11, %v4175_v38  ;;  %4462 = vmatpush.bf16.msrb.mxu2 %v6957_v8 }
 0x931   : > { %v4262_v60 = vmax.f32 %v4225_v35, %v4246_v51 }
 0x933   : > { %v4270_v50 = vadd.f32 %v4262_v60, %v9328_v25 }
 0x935   : > { %v4562_v46 = vpack.c.bf16 %v4270_v50, %v4269_v14  ;;  %v4140_v22 = vpop.f32.mrf.mxu0  ;;  %v4177_v63 = vpop.f32.mrf.mxu1  ;;  %v4118_v50 = vmax.f32 %v4081_v62, %v9466_v44  ;;  %v9878_v44 = vmax.f32 %v9180_v54, 0.0 }
 0x936   : > { %v4212_v16 = vpop.f32.mrf.mxu2  ;;  %v4153_v61 = vmax.f32 %v4116_v32, %v4140_v22 }
 0x937   : > { %v4249_v18 = vpop.f32.mrf.mxu3  ;;  %4643 = vmatmul.bf16.gmra.mxu0 %v4562_v46  ;;  %v4226_v48 = vmax.f32 %v4189_v49, %v4212_v16  ;;  %v4305_v8 = vsub.f32 %v9290_v43, %v9878_v44 }
 0x938   : > { %v4190_v42 = vmax.f32 %v4153_v61, %v4177_v63 }
 0x939   : > { %v4263_v21 = vmax.f32 %v4226_v48, %v4249_v18 }
 0x93b   : > { %v4271_v38 = vadd.f32 %v4263_v21, %v9336_v2 }
 0x93d   : > { %v4143_v51 = vpop.f32.mrf.mxu0  ;;  %v4180_v37 = vpop.f32.mrf.mxu1 }
 0x93e   : > { %v4214_v55 = vpop.f32.mrf.mxu2  ;;  %v4154_v60 = vmax.f32 %v9876_v12, %v4143_v51 }
 0x93f   : > { %v4251_v34 = vpop.f32.mrf.mxu3  ;;  %v4227_v30 = vmax.f32 %v4190_v42, %v4214_v55  ;;  %v4313_v55 = vmul.f32 %v4305_v8, %v7855_v36 }
 0x940   : > { %v4191_v59 = vmax.f32 %v4154_v60, %v4180_v37 }
 0x941   : > { %v4264_v35 = vmax.f32 %v4227_v30, %v4251_v34 }
 0x943   : > { %v4272_v6 = vadd.f32 %v4264_v35, %v9346_v3 }
 0x945   : > { %v4563_v53 = vpack.c.bf16 %v4272_v6, %v4271_v38  ;;  %v4145_v40 = vpop.f32.mrf.mxu0  ;;  %v4182_v52 = vpop.f32.mrf.mxu1  ;;  %v9879_v38 = vmax.f32 %v9193_v39, 0.0  ;;  %v9880_v6 = vmax.f32 %v9196_v33, 0.0 }
 0x946   : > { %v4217_v5 = vpop.f32.mrf.mxu2  ;;  %v4155_v9 = vmax.f32 %v4118_v50, %v4145_v40 }
 0x947   : > { %v4254_v14 = vpop.f32.mrf.mxu3  ;;  %4648 = vmatmul.bf16.gmra.mxu0 %v4563_v53  ;;  %v4228_v11 = vmax.f32 %v4191_v59, %v4217_v5  ;;  %v4306_v36 = vsub.f32 %v9309_v28, %v9879_v38  ;;  %v4307_v12 = vsub.f32 %v9328_v25, %v9880_v6 }
 0x948   : > { %v4192_v1 = vmax.f32 %v4155_v9, %v4182_v52 }
 0x949   : > { %v4265_v16 = vmax.f32 %v4228_v11, %v4254_v14  ;;  %v4315_v60 = vmul.f32 %v4307_v12, %v9846_v58  ;;  %v9882_v58 = vmax.f32 %v9212_v15, 0.0 }
 0x94b   : > { %v4273_v49 = vadd.f32 %v4265_v16, %v9352_v27 }
 0x94d   : > { %v4284_v41 = vpop.f32.mrf.mxu0  ;;  %v4337_v32 = vpop.f32.mrf.mxu1 }
 0x94e   : > { %v4219_v46 = vpop.f32.mrf.mxu2  ;;  %v4338_v42 = vadd.f32 %v4337_v32, %v4312_v10  ;;  %v4285_v21 = vadd.f32 %v4284_v41, %v9288_v7  ;;  %v4314_v7 = vmul.f32 %v4306_v36, %v7870_v4  ;;  %v9881_v4 = vmax.f32 %v9209_v23, 0.0 }
 0x94f   : > { %v4229_v18 = vmax.f32 %v4192_v1, %v4219_v46  ;;  %v4256_v22 = vpop.f32.mrf.mxu3  ;;  %v4309_v46 = vsub.f32 %v9346_v3, %v9882_v58 }
 0x950   : > { %v4361_v51 = vand.u32 2147483647, %v4338_v42  ;;  %v4308_v1 = vsub.f32 %v9336_v2, %v9881_v4 }
 0x951   : > { %v4266_v63 = vmax.f32 %v4229_v18, %v4256_v22  ;;  %v4317_v16 = vmul.f32 %v4309_v46, %v9850_v17  ;;  %v9884_v17 = vmax.f32 %v9228_v13, 0.0 }
 0x953   : > { %v4274_v61 = vadd.f32 %v4266_v63, %v9358_v19 }
 0x955   : > { %v4564_v48 = vpack.c.bf16 %v4274_v61, %v4273_v49  ;;  %v4286_v31 = vpop.f32.mrf.mxu0  ;;  %v4340_v34 = vpop.f32.mrf.mxu1  ;;  %v4311_v61 = vsub.f32 %v9358_v19, %v9884_v17  ;;  %v6981_v17 = vld [vmem:[%s9720_s7] sm:$0xff] }
 0x956   : > { %v4287_v30 = vadd.f32 %v4286_v31, %v9290_v43  ;;  %v4341_v54 = vadd.f32 %v4340_v34, %v4313_v55 }
 0x957   : > { %4653 = vmatmul.bf16.gmra.mxu0 %v4564_v48  ;;  %v4319_v10 = vmul.f32 %v4311_v61, %v7957_v29  ;;  %v4541_v13 = vpop.f32.mrf.mxu3 }
 0x958   : > { %v4386_v37 = vpack.c.bf16 %v4287_v30, %v4285_v21  ;;  %v4362_v24 = vand.u32 2147483647, %v4341_v54 }
 0x95a   : > { %v4667_v35 = vpack.c.bf16 %v4362_v24, %v4361_v51  ;;  %4463 = vmatmul.bf16.vlgmr.msrb.gmra.mxu2 %v4386_v37 }
 0x95c   : > { %4744 = vmatmul.bf16.vlgmr.msrb.gmra.mxu1 %v4667_v35 }
 0x95d   : > { %v4289_v62 = vpop.f32.mrf.mxu0  ;;  %v4343_v20 = vpop.f32.mrf.mxu1 }
 0x95e   : > { %v4344_v43 = vadd.f32 %v4343_v20, %v4314_v7  ;;  %v4290_v14 = vadd.f32 %v4289_v62, %v9309_v28  ;;  %v4316_v28 = vmul.f32 %v4308_v1, %v9849_v26  ;;  %v9883_v26 = vmax.f32 %v9225_v45, 0.0  ;;  %v6988_v7 = vld [vmem:[%s9720_s7 + $0x38] sm:$0xff] }
 0x95f   : > { %v4543_v37 = vpop.f32.mrf.mxu3  ;;  %4876 = vmatpush.bf16.msra.mxu2 %v6988_v7 }
 0x960   : > { %v4363_v52 = vand.u32 2147483647, %v4344_v43  ;;  %v4310_v49 = vsub.f32 %v9352_v27, %v9883_v26 }
 0x965   : > { %v4291_v53 = vpop.f32.mrf.mxu0  ;;  %v4346_v5 = vpop.f32.mrf.mxu1 }
 0x966   : > { %v4292_v50 = vadd.f32 %v4291_v53, %v9328_v25  ;;  %v4347_v40 = vadd.f32 %v4346_v5, %v4315_v60  ;;  %v6987_v60 = vld [vmem:[%s9720_s7 + $0x30] sm:$0xff] }
 0x967   : > { %v4546_v62 = vpop.f32.mrf.mxu3  ;;  %4877 = vmatpush.bf16.msra.mxu2 %v6987_v60 }
 0x968   : > { %v4387_v39 = vpack.c.bf16 %v4292_v50, %v4290_v14  ;;  %v4364_v59 = vand.u32 2147483647, %v4347_v40  ;;  %v6986_v14 = vld [vmem:[%s9720_s7 + $0x28] sm:$0xff] }
 0x96a   : > { %v4668_v9 = vpack.c.bf16 %v4364_v59, %v4363_v52  ;;  %4468 = vmatmul.bf16.gmra.mxu2 %v4387_v39  ;;  %v6985_v52 = vld [vmem:[%s9720_s7 + $0x20] sm:$0xff] }
 0x96b   : > { %4878 = vmatpush.bf16.msra.mxu2 %v6986_v14 }
 0x96c   : > { %4749 = vmatmul.bf16.gmra.mxu1 %v4668_v9 }
 0x96d   : > { %v4294_v33 = vpop.f32.mrf.mxu0  ;;  %v4349_v11 = vpop.f32.mrf.mxu1 }
 0x96e   : > { %v4350_v25 = vadd.f32 %v4349_v11, %v4316_v28  ;;  %v4295_v32 = vadd.f32 %v4294_v33, %v9336_v2  ;;  %v4318_v2 = vmul.f32 %v4310_v49, %v9853_v57  ;;  %v6984_v11 = vld [vmem:[%s9720_s7 + $0x18] sm:$0xff] }
 0x96f   : > { %v4548_v36 = vpop.f32.mrf.mxu3  ;;  %4879 = vmatpush.bf16.msra.mxu2 %v6985_v52 }
 0x970   : > { %v4365_v22 = vand.u32 2147483647, %v4350_v25 }
 0x973   : > { %4880 = vmatpush.bf16.msra.mxu2 %v6984_v11 }
 0x975   : > { %v4296_v18 = vpop.f32.mrf.mxu0  ;;  %v4352_v41 = vpop.f32.mrf.mxu1 }
 0x976   : > { %v4297_v47 = vadd.f32 %v4296_v18, %v9346_v3  ;;  %v4353_v56 = vadd.f32 %v4352_v41, %v4317_v16  ;;  %v6983_v41 = vld [vmem:[%s9720_s7 + $0x10] sm:$0xff] }
 0x977   : > { %v4551_v53 = vpop.f32.mrf.mxu3  ;;  %4881 = vmatpush.bf16.msra.mxu2 %v6983_v41 }
 0x978   : > { %v4388_v23 = vpack.c.bf16 %v4297_v47, %v4295_v32  ;;  %v4366_v63 = vand.u32 2147483647, %v4353_v56 }
 0x97a   : > { %v4669_v44 = vpack.c.bf16 %v4366_v63, %v4365_v22  ;;  %4473 = vmatmul.bf16.gmra.mxu2 %v4388_v23 }
 0x97c   : > { %4754 = vmatmul.bf16.gmra.mxu1 %v4669_v44  ;;  %v6982_v44 = vld [vmem:[%s9720_s7 + $0x8] sm:$0xff] }
 0x97d   : > { %v4299_v15 = vpop.f32.mrf.mxu0  ;;  %v4355_v8 = vpop.f32.mrf.mxu1  ;;  %4882 = vmatpush.bf16.msra.mxu2 %v6982_v44 }
 0x97e   : > { %v4356_v3 = vadd.f32 %v4355_v8, %v4318_v2  ;;  %v4300_v55 = vadd.f32 %v4299_v15, %v9352_v27  ;;  %v9885_v2 = vld [vmem:[#allocation5_spill] sm:$0xff] }
 0x97f   : > { %v4553_v59 = vpop.f32.mrf.mxu3 }
 0x980   : > { %v4367_v21 = vand.u32 2147483647, %v4356_v3 }
 0x981   : > { %4883 = vmatpush.bf16.msra.mxu2 %v6981_v17 }
 0x985   : > { %v4301_v48 = vpop.f32.mrf.mxu0  ;;  %v4358_v42 = vpop.f32.mrf.mxu1 }
 0x986   : > { %v4302_v31 = vadd.f32 %v4301_v48, %v9358_v19  ;;  %v4359_v34 = vadd.f32 %v4358_v42, %v4319_v10  ;;  %v9886_v48 = vld [vmem:[#allocation10_spill] sm:$0xff] }
 0x987   : > { %v4556_v15 = vpop.f32.mrf.mxu3 }
 0x988   : > { %v4389_v45 = vpack.c.bf16 %v4302_v31, %v4300_v55  ;;  %v4368_v30 = vand.u32 2147483647, %v4359_v34 }
 0x98a   : > { %v4670_v54 = vpack.c.bf16 %v4368_v30, %v4367_v21  ;;  %4478 = vmatmul.bf16.gmra.mxu2 %v4389_v45  ;;  %v9887_v45 = vld [vmem:[#allocation6_spill] sm:$0xff] }
 0x98c   : > { %4759 = vmatmul.bf16.gmra.mxu1 %v4670_v54 }
 0x9a4   : > { %v4639_v51 = vpop.f32.mrf.mxu0 }
 0x9ac   : > { %v4641_v24 = vpop.f32.mrf.mxu0 }
 0x9b4   : > { %v4644_v20 = vpop.f32.mrf.mxu0 }
 0x9bc   : > { %v4646_v6 = vpop.f32.mrf.mxu0 }
 0x9c4   : > { %v4649_v5 = vpop.f32.mrf.mxu0 }
 0x9cc   : > { %v4651_v4 = vpop.f32.mrf.mxu0 }
 0x9d4   : > { %v4654_v61 = vpop.f32.mrf.mxu0 }
 0x9d9   : > { %v4745_v57 = vpop.f32.mrf.mxu1 }
 0x9dd   : > { %v4464_v35 = vpop.f32.mrf.mxu2 }
 0x9de   : > { %v4542_v9 = vadd.f32 %v4541_v13, %v4464_v35  ;;  %v7251_v35 = vmov 64.0  }
 0x9df   : > { %7053 = vrcp.f32 %v7251_v35 }
 0x9e0   : > { %v4659_v46 = vadd.f32 %v4639_v51, %v4542_v9 }
 0x9e1   : > { %v4747_v29 = vpop.f32.mrf.mxu1 }
 0x9e2   : > { %v4765_v22 = vadd.f32 %v4745_v57, %v4659_v46 }
 0x9e4   : > { %v4773_v3 = vmul.f32 %v4765_v22, %v9885_v2  ;;  %v6990_v2 = vld [vmem:[%s9720_s7 + $0x48] sm:$0xff] }
 0x9e5   : > { %v4466_v38 = vpop.f32.mrf.mxu2  ;;  %v7054_v14 = vpop.eup %7053 }
 0x9e6   : > { %v4544_v39 = vadd.f32 %v4543_v37, %v4466_v38  ;;  %v4781_v13 = vmax.f32 %v4773_v3, 0.0  ;;  %v9888_v37 = vld [vmem:[#allocation8_spill] sm:$0xff]  ;;  %v9889_v38 = vld [vmem:[#allocation7_spill] sm:$0xff]  ;;  %vm4807_vm1 = vweird.f32 %v7054_v14 }
 0x9e7   : > { %v6989_v3 = vld [vmem:[%s9720_s7 + $0x40] sm:$0xff] }
 0x9e8   : > { %v4660_v1 = vadd.f32 %v4641_v24, %v4544_v39  ;;  %v6994_v39 = vld [vmem:[%s9720_s7 + $0x68] sm:$0xff] }
 0x9e9   : > { %v4750_v27 = vpop.f32.mrf.mxu1 }
 0x9ea   : > { %v4766_v32 = vadd.f32 %v4747_v29, %v4660_v1  ;;  %v6996_v29 = vld [vmem:[%s9720_s7 + $0x78] sm:$0xff] }
 0x9eb   : > { %4958 = vmatpush.bf16.msra.mxu3 %v6996_v29 }
 0x9ec   : > { %v4774_v8 = vmul.f32 %v4766_v32, %v9867_v0  ;;  %v6992_v32 = vld [vmem:[%s9720_s7 + $0x58] sm:$0xff] }
 0x9ed   : > { %v4469_v19 = vpop.f32.mrf.mxu2 }
 0x9ee   : > { %v4547_v33 = vadd.f32 %v4546_v62, %v4469_v19  ;;  %v4782_v21 = vmax.f32 %v4774_v8, 0.0  ;;  %v4558_v19 = vpop.f32.mrf.mxu3 }
 0x9f0   : > { %v4661_v16 = vadd.f32 %v4644_v20, %v4547_v33  ;;  %v4789_v62 = vadd.f32 %v4782_v21, %v4781_v13  ;;  %v4827_v21 = vld [vmem:[%s9721_s8] sm:$0x1] }
 0x9f1   : > { %v4752_v12 = vpop.f32.mrf.mxu1 }
 0x9f2   : > { %v4767_v23 = vadd.f32 %v4750_v27, %v4661_v16 }
 0x9f4   : > { %v4775_v42 = vmul.f32 %v4767_v23, %v9886_v48  ;;  %v6991_v23 = vld [vmem:[%s9720_s7 + $0x50] sm:$0xff] }
 0x9f5   : > { %v4471_v43 = vpop.f32.mrf.mxu2  ;;  %v7003_v48 = vld [vmem:[%s9720_s7 + $0xb0] sm:$0xff] }
 0x9f6   : > { %v4549_v58 = vadd.f32 %v4548_v36, %v4471_v43  ;;  %v4783_v51 = vmax.f32 %v4775_v42, 0.0  ;;  %v6995_v36 = vld [vmem:[%s9720_s7 + $0x70] sm:$0xff]  ;;  %v9890_v43 = vld [vmem:[#allocation9_spill] sm:$0xff] }
 0x9f7   : > { %4959 = vmatpush.bf16.msra.mxu3 %v6995_v36  ;;  %v7002_v42 = vld [vmem:[%s9720_s7 + $0xa8] sm:$0xff] }
 0x9f8   : > { %v4662_v47 = vadd.f32 %v4646_v6, %v4549_v58  ;;  %v9891_v58 = vld [vmem:[#allocation20_spill] sm:$0xff] }
 0x9f9   : > { %v4755_v50 = vpop.f32.mrf.mxu1 }
 0x9fa   : > { %v4768_v26 = vadd.f32 %v4752_v12, %v4662_v47  ;;  %v4790_v12 = vadd.f32 %v4789_v62, %v4783_v51  ;;  %v6998_v51 = vld [vmem:[%s9720_s7 + $0x88] sm:$0xff] }
 0x9fb   : > { %4960 = vmatpush.bf16.msra.mxu3 %v6994_v39 }
 0x9fc   : > { %v4776_v30 = vmul.f32 %v4768_v26, %v9887_v45 }
 0x9fd   : > { %v4474_v40 = vpop.f32.mrf.mxu2 }
 0x9fe   : > { %v4552_v18 = vadd.f32 %v4551_v53, %v4474_v40  ;;  %v4784_v20 = vmax.f32 %v4776_v30, 0.0 }
 0xa00   : > { %v4663_v63 = vadd.f32 %v4649_v5, %v4552_v18  ;;  %v4656_v5 = vpop.f32.mrf.mxu0 }
 0xa01   : > { %v4757_v28 = vpop.f32.mrf.mxu1 }
 0xa02   : > { %v4769_v55 = vadd.f32 %v4755_v50, %v4663_v63  ;;  %v4791_v50 = vadd.f32 %v4790_v12, %v4784_v20 }
 0xa04   : > { %v4777_v57 = vmul.f32 %v4769_v55, %v9888_v37  ;;  %v7001_v55 = vld [vmem:[%s9720_s7 + $0xa0] sm:$0xff] }
 0xa05   : > { %v4476_v25 = vpop.f32.mrf.mxu2  ;;  %v6997_v37 = vld [vmem:[%s9720_s7 + $0x80] sm:$0xff] }
 0xa06   : > { %v4554_v56 = vadd.f32 %v4553_v59, %v4476_v25  ;;  %v4785_v7 = vmax.f32 %v4777_v57, 0.0  ;;  %v6664_v57 = vld [vmem:[%s9721_s8 + $0x1] sm:$0x1] }
 0xa08   : > { %v4664_v49 = vadd.f32 %v4651_v4, %v4554_v56  ;;  %v4792_v9 = vadd.f32 %v4791_v50, %v4785_v7  ;;  %v4803_v4 = vmul.f32 64.0, %v7054_v14 }
 0xa09   : > { %v4760_v34 = vpop.f32.mrf.mxu1 }
 0xa0a   : > { %v4770_v0 = vadd.f32 %v4757_v28, %v4664_v49  ;;  %v6993_v28 = vld [vmem:[%s9720_s7 + $0x60] sm:$0xff]  ;;  %v4804_v18 = vsub.f32 1.0, %v4803_v4 }
 0xa0b   : > { %4961 = vmatpush.bf16.msra.mxu3 %v6993_v28 }
 0xa0c   : > { %v4778_v27 = vmul.f32 %v4770_v0, %v9889_v38  ;;  %v4805_v56 = vmul.f32 %v7054_v14, %v4804_v18  ;;  %v6713_v38 = vld [vmem:[%s9721_s8 + $0x2] sm:$0x1] }
 0xa0d   : > { %v4479_v10 = vpop.f32.mrf.mxu2 }
 0xa0e   : > { %v4557_v31 = vadd.f32 %v4556_v15, %v4479_v10  ;;  %v4786_v40 = vmax.f32 %v4778_v27, 0.0  ;;  %v4806_v44 = vadd.f32 %v7054_v14, %v4805_v56  ;;  %v7004_v10 = vld [vmem:[%s9720_s7 + $0xb8] sm:$0xff] }
 0xa0f   : > { %4962 = vmatpush.bf16.msra.mxu3 %v6992_v32  ;;  %5040 = vmatpush.bf16.msra.mxu0 %v7004_v10 }
 0xa10   : > { %v4665_v54 = vadd.f32 %v4654_v61, %v4557_v31  ;;  %v4793_v1 = vadd.f32 %v4792_v9, %v4786_v40  ;;  %v4808_v26 = vsel %vm4807_vm1, %v7054_v14, %v4806_v44  ;;  %v7000_v31 = vld [vmem:[%s9720_s7 + $0x98] sm:$0xff] }
 0xa11   : > { %v4762_v59 = vpop.f32.mrf.mxu1 }
 0xa12   : > { %v4771_v24 = vadd.f32 %v4760_v34, %v4665_v54  ;;  %v6999_v34 = vld [vmem:[%s9720_s7 + $0x90] sm:$0xff] }
 0xa13   : > { %4963 = vmatpush.bf16.msra.mxu3 %v6991_v23  ;;  %5041 = vmatpush.bf16.msra.mxu0 %v7003_v48 }
 0xa14   : > { %v4779_v60 = vmul.f32 %v4771_v24, %v9890_v43 }
 0xa15   : > { %v4481_v6 = vpop.f32.mrf.mxu2 }
 0xa16   : > { %v4559_v53 = vadd.f32 %v4558_v19, %v4481_v6  ;;  %v4787_v33 = vmax.f32 %v4779_v60, 0.0 }
 0xa17   : > { %4964 = vmatpush.bf16.msra.mxu3 %v6990_v2  ;;  %5042 = vmatpush.bf16.msra.mxu0 %v7002_v42 }
 0xa18   : > { %v4666_v52 = vadd.f32 %v4656_v5, %v4559_v53  ;;  %v4794_v25 = vadd.f32 %v4793_v1, %v4787_v33 }
 0xa1a   : > { %v4772_v11 = vadd.f32 %v4762_v59, %v4666_v52 }
 0xa1b   : > { %4965 = vmatpush.bf16.msra.mxu3 %v6989_v3  ;;  %5043 = vmatpush.bf16.msra.mxu0 %v7001_v55 }
 0xa1c   : > { %v4780_v46 = vmul.f32 %v4772_v11, %v9891_v58 }
 0xa1e   : > { %v4788_v16 = vmax.f32 %v4780_v46, 0.0 }
 0xa1f   : > { %5044 = vmatpush.bf16.msra.mxu0 %v7000_v31 }
 0xa20   : > { %v4795_v41 = vadd.f32 %v4794_v25, %v4788_v16 }
 0xa22   : > { %v4796_v47 = vrot.slane %v4795_v41, 4 }
 0xa23   : > { %5045 = vmatpush.bf16.msra.mxu0 %v6999_v34 }
 0xa24   : > { %v4797_v22 = vadd.f32 %v4796_v47, %v4795_v41 }
 0xa26   : > { %v4798_v63 = vrot.slane %v4797_v22, 2 }
 0xa27   : > { %5046 = vmatpush.bf16.msra.mxu0 %v6998_v51 }
 0xa28   : > { %v4799_v15 = vadd.f32 %v4798_v63, %v4797_v22 }
 0xa2a   : > { %v4800_v8 = vrot.slane %v4799_v15, 1 }
 0xa2b   : > { %5047 = vmatpush.bf16.msra.mxu0 %v6997_v37 }
 0xa2c   : > { %v4801_v49 = vadd.f32 %v4800_v8, %v4799_v15 }
 0xa2e   : > { %v4809_v17 = vmul.f32 %v4808_v26, %v4801_v49 }
 0xa30   : > { %v4810_v61 = vpack.c.bf16 %v4809_v17, %v4809_v17 }
 0xa32   : > { %4884 = vmatmul.bf16.vlgmr.msra.gmra.mxu2 %v4810_v61 }
 0xab5   : > { %v4885_v45 = vpop.f32.mrf.mxu2 }
 0xab6   : > { %v4886_v30 = vadd.f32 %v4885_v45, %v4827_v21 }
 0xab8   : > { %v4889_v0 = vmax.f32 %v4886_v30, 0.0 }
 0xaba   : > { %v4890_v54 = vpack.c.bf16 %v4889_v0, %v4889_v0 }
 0xabc   : > { %4966 = vmatmul.bf16.vlgmr.msra.gmra.mxu3 %v4890_v54 }
 0xabd   : > { %v4887_v13 = vpop.f32.mrf.mxu2 }
 0xb3f   : > { %v4967_v24 = vpop.f32.mrf.mxu3 }
 0xb40   : > { %v4968_v35 = vadd.f32 %v6664_v57, %v4967_v24 }
 0xb42   : > { %v4971_v29 = vmax.f32 %v4968_v35, 0.0 }
 0xb44   : > { %v4972_v62 = vpack.c.bf16 %v4971_v29, %v4971_v29 }
 0xb46   : > { %5048 = vmatmul.bf16.vlgmr.msra.gmra.mxu0 %v4972_v62 }
 0xb47   : > { %v4969_v20 = vpop.f32.mrf.mxu3 }
 0xbc3   : > { %v5049_v27 = vpop.f32.mrf.mxu0 }
 0xbc4   : > { %v5050_v36 = vadd.f32 %v6713_v38, %v5049_v27 }
 0xbc6   : > { %5053 = vst [vmem:[%s384_s22] sm:$0x1] %v5050_v36 }
 0xbc7   : > { %7212 = shalt.err (!%p7209_p3)
}
 0xbc8   : > { %7005 = dma.vmem_to_hbm [thread:$0]  (%p7340_p5), %s5066_s24, 16, %s5068_s1, %s5055_s25  }
 0xbcb   : > { %v5051_v19 = vpop.f32.mrf.mxu0 }
 0xbcc PF: > { %p7011_p4 = scmp.ge.s32.totalorder %s7247_s12, 2  ;;  %s5079_s23 = sand.u32 1, %s7235_s30  }
 0xbcd   : > { %s5080_s0 = scalar_lea.sflag [#allocation3], %s5079_s23 }
 0xbce   : > { %p7008_p7 = pnand %p7011_p4, %p7344_p6 }
 0xbd0   : > { %p7009_p8 = pneg %p7008_p7 }
 0xbd2   : > { %7230 = dma.done.wait (%p7009_p8), %s5080_s0, 16  }
 0xbd3   : > { %7232 = vsyncadd (%p7009_p8), %s5080_s0, 4294967280  ;;  %p19_p9 = scmp.ge.s32.totalorder %s7327_s15, 6   ;;  %s9892_s30 = smov %s7239_s10 }
 0xbd4   : > { %s9893_s10 = smov %s7243_s11  ;;  %s9894_s11 = smov %s7338_s18 }
 0xbd5   : > { %s9895_s12 = smov %s7327_s15  ;;  %21 = sbr.rel (!%p19_p9) target bundleno = 6 (0x6), region = 132 }
 0xbda   :  { %5085 = vsyncpa [#allocation3], 1 }
 0xbdb   :  { %5087 = vsyncpa [#allocation3 + $0x1], 1 }

</bundles_post_ra>
